<compile_context>
chip_gen: v5e
topology: v5e:2x2
jax: 0.10.0
libtpu: 0.0.40
codegen_flags: <defaults>
</compile_context>

<pallas_src>
import functools
import math

import jax
import jax.numpy as jnp
from jax.experimental import pallas as pl
from jax.experimental.pallas import tpu as pltpu


# ----------------------------------------------------------------------------
# Pallas kernel: one fused matmul (conv + bias) -> GroupNorm -> LeakyReLU per grid step.
# ----------------------------------------------------------------------------
def _upconv_kernel(x_ref, w_ref, gamma_ref, beta_ref, gmat_ref, gmatT_ref, o_ref,
                   *, inv_count, eps=1e-5, slope=0.2):
    # x_ref     : (B, M, Kp)  compute_dtype patch matrix (ones column appended -> bias folded)
    # w_ref     : (Kp, R)     compute_dtype fused tap/rep weight (+ bias row), R = n_rep*Co
    # gamma/beta: (1, R) f32 per-channel affine params tiled over the replication axis
    # gmat      : (R, G) one-hot (rep,channel)->group ; gmatT : (G, R)
    # o_ref     : (B, M, R)   lane-dense output tile
    B, M, Kp = x_ref.shape
    R = o_ref.shape[2]

    w = w_ref[...]
    gamma = gamma_ref[...]
    beta = beta_ref[...]
    gmat = gmat_ref[...]
    gmatT = gmatT_ref[...]

    # Single MXU matmul for every sample in this tile (bias included via ones column).
    acc = jnp.dot(x_ref[...].reshape(B * M, Kp), w,
                  preferred_element_type=jnp.float32).reshape(B, M, R)      # f32

    # GroupNorm stats, batched over the tile (two small dots per statistic).
    ch_sum = jnp.sum(acc, axis=1)                                            # (B, R)
    g_mean = jnp.dot(ch_sum, gmat, preferred_element_type=jnp.float32) * inv_count   # (B, G)
    mean_r = jnp.dot(g_mean, gmatT, preferred_element_type=jnp.float32)     # (B, R)

    d = acc - mean_r[:, None, :]                    # centered, consumed immediately (two-pass var)
    ch_sq = jnp.sum(d * d, axis=1)                                           # (B, R)
    g_var = jnp.dot(ch_sq, gmat, preferred_element_type=jnp.float32) * inv_count
    inv_r = jnp.dot(jax.lax.rsqrt(g_var + eps), gmatT,
                    preferred_element_type=jnp.float32)                      # (B, R)

    # Fold mean / inv-std / gamma / beta into one scale+shift pass over acc (no live `cent`).
    scale = inv_r * gamma                           # (B, R)
    shift = beta - mean_r * scale                   # (B, R)
    y = acc * scale[:, None, :] + shift[:, None, :]
    o_ref[...] = jnp.maximum(y, slope * y).astype(o_ref.dtype)              # LeakyReLU(0.2)


# ----------------------------------------------------------------------------
# Device-aware tiling helpers.
# ----------------------------------------------------------------------------
def _num_tensorcores():
    """Best-effort TensorCore-per-chip query (1 on v5e/v6e, 2 on v7x)."""
    try:
        info = pltpu.get_tpu_info()
        for attr in ("num_cores", "num_tensorcores", "tensorcores_per_chip",
                     "cores_per_chip", "core_count"):
            v = getattr(info, attr, None)
            if isinstance(v, int) and 0 < v <= 16:
                return v
    except Exception:
        pass
    try:
        v = getattr(jax.devices()[0], "num_cores", None)
        if isinstance(v, int) and 0 < v <= 16:
            return v
    except Exception:
        pass
    return 1


def _pick_batch_tile(N, per_sample_vmem_bytes, vmem_budget=24 * 1024 * 1024):
    """One grid step per TensorCore, capped so a tile fits a conservative VMEM budget."""
    n_tc = max(1, _num_tensorcores())
    steps = n_tc if N % n_tc == 0 else 1
    bt = max(1, N // steps)
    while bt > 1 and bt * per_sample_vmem_bytes > vmem_budget:
        bt -= 1
        while bt > 1 and N % bt != 0:
            bt -= 1
    return bt


# ----------------------------------------------------------------------------
# Jitted implementation: im2col, weight re-packing, pallas_call, un-interleave.
# ----------------------------------------------------------------------------
@functools.partial(jax.jit, static_argnames=("stride", "num_groups", "compute_dtype",
                                             "out_dtype", "batch_tile"))
def _dcgan_upconv_impl(x_nchw, w_t, bias, gamma, beta, *, stride, num_groups,
                       compute_dtype, out_dtype, batch_tile):
    N, Ci, H, W = x_nchw.shape
    Co = w_t.shape[1]
    HW = H * W
    if Co % num_groups != 0:
        raise ValueError("GroupNorm requires Cout % num_groups == 0")
    cg = Co // num_groups

    if stride == 2:
        # Sub-pixel (phase) decomposition: output (2i+r, 2j+s) needs input shifts (dh,dw) in {0,1}^2.
        xp = jnp.pad(x_nchw, ((0, 0), (0, 0), (0, 1), (0, 1)))          # high-side zero pad only
        x_nhwc = jnp.transpose(xp, (0, 2, 3, 1)).astype(jnp.float32)
        shifts = ((0, 0), (0, 1), (1, 0), (1, 1))
        cols = [x_nhwc[:, dh:dh + H, dw:dw + W, :].reshape(N, HW, Ci) for dh, dw in shifts]
        patches = jnp.concatenate(cols, axis=-1)                        # (N, HW, 4*Ci)
        n_rep, M_rows = 4, HW
        # W_big[d*Ci + ci, p*Co + co] = w_t[ci, co, r+1-2dh, s+1-2dw]  (zero block if out of range)
        phase_blocks = []
        for (r, s) in shifts:
            rows = []
            for (dh, dw) in shifts:
                kh, kw = r + 1 - 2 * dh, s + 1 - 2 * dw
                rows.append(w_t[:, :, kh, kw] if (0 <= kh < 3 and 0 <= kw < 3)
                            else jnp.zeros((Ci, Co), w_t.dtype))
            phase_blocks.append(jnp.concatenate(rows, axis=0))          # (4*Ci, Co)
        w_mat = jnp.concatenate(phase_blocks, axis=1)                   # (4*Ci, 4*Co)
    else:
        # Stride 1: plain 3x3 correlation with the flipped kernel over a pad-1 input.
        xp = jnp.pad(x_nchw, ((0, 0), (0, 0), (1, 1), (1, 1)))
        x_nhwc = jnp.transpose(xp, (0, 2, 3, 1)).astype(jnp.float32)
        taps = tuple((u, v) for u in range(3) for v in range(3))
        cols = [x_nhwc[:, u:u + H, v:v + W, :].reshape(N, HW, Ci) for u, v in taps]
        p0 = jnp.concatenate(cols, axis=-1)                             # (N, HW, 9*Ci)
        # Pack `pack` spatial positions per output row so the store is 128-lane dense.
        pack = 128 // math.gcd(Co, 128)
        if HW % pack != 0:
            pack = 1
        n_rep, M_rows = pack, HW // pack
        patches = p0.reshape(N, M_rows, pack * 9 * Ci)
        w_single = jnp.concatenate([w_t[:, :, 2 - u, 2 - v] for (u, v) in taps], axis=0)  # (9Ci, Co)
        w_mat = (jnp.kron(jnp.eye(pack, dtype=w_single.dtype), w_single)
                 if pack > 1 else w_single)                             # block-diag (pack*9Ci, pack*Co)

    R = n_rep * Co
    K = w_mat.shape[0]
    Kp = K + 1

    # Fold bias into the matmul: ones column on the patches, bias row on the weight.
    bias_row = jnp.tile(bias.astype(jnp.float32), n_rep).reshape(1, R)
    w_big = jnp.concatenate([w_mat.astype(jnp.float32), bias_row], axis=0).astype(compute_dtype)
    ones_col = jnp.ones((N, M_rows, 1), jnp.float32)
    patches = jnp.concatenate([patches, ones_col], axis=-1).astype(compute_dtype)   # (N, M_rows, Kp)

    # Per-channel affine params tiled over the replication axis (column q*Co+co -> channel co).
    g_r = jnp.tile(gamma.astype(jnp.float32), n_rep).reshape(1, R)
    be_r = jnp.tile(beta.astype(jnp.float32), n_rep).reshape(1, R)

    # (rep, channel) -> group one-hot matrices (group reduce / broadcast as tiny matmuls).
    co_idx = jnp.tile(jnp.arange(Co), n_rep)
    gmat = (co_idx[:, None] // cg == jnp.arange(num_groups)[None, :]).astype(jnp.float32)  # (R, G)
    gmatT = gmat.T

    inv_count = 1.0 / float(n_rep * M_rows * cg)       # elements per (sample, group)

    grid = (N // batch_tile,)
    kernel = functools.partial(_upconv_kernel, inv_count=inv_count)

    out = pl.pallas_call(
        kernel,
        out_shape=jax.ShapeDtypeStruct((N, M_rows, R), out_dtype),
        grid_spec=pltpu.PrefetchScalarGridSpec(
            num_scalar_prefetch=0,
            grid=grid,
            in_specs=[
                pl.BlockSpec((batch_tile, M_rows, Kp), lambda n: (n, 0, 0)),
                pl.BlockSpec((Kp, R), lambda n: (0, 0)),
                pl.BlockSpec((1, R), lambda n: (0, 0)),
                pl.BlockSpec((1, R), lambda n: (0, 0)),
                pl.BlockSpec((R, num_groups), lambda n: (0, 0)),
                pl.BlockSpec((num_groups, R), lambda n: (0, 0)),
            ],
            out_specs=pl.BlockSpec((batch_tile, M_rows, R), lambda n: (n, 0, 0)),
        ),
        compiler_params=pltpu.CompilerParams(dimension_semantics=("parallel",)),
    )(patches, w_big, g_r, be_r, gmat, gmatT)

    # Un-interleave back to NCHW to match the PyTorch module.
    # TODO(synk): if the downstream consumer can take NHWC / phase-major, drop this transpose.
    if stride == 2:
        out = out.reshape(N, H, W, 2, 2, Co)            # [n, i, j, r, s, co]
        out = jnp.transpose(out, (0, 5, 1, 3, 2, 4)).reshape(N, Co, 2 * H, 2 * W)
    else:
        out = out.reshape(N, HW, Co).reshape(N, H, W, Co)
        out = jnp.transpose(out, (0, 3, 1, 2))
    return out


# ----------------------------------------------------------------------------
# Public wrapper: derives tiling (device-aware) outside of jit.
# ----------------------------------------------------------------------------
def dcgan_upconv_pallas(x_nchw, w_t, bias, gamma, beta, *, stride, num_groups=16,
                        compute_dtype=jnp.bfloat16, out_dtype=jnp.float32, batch_tile=None):
    """x_nchw: (N, Cin, H, W); w_t: (Cin, Cout, 3, 3) (PyTorch ConvTranspose2d layout)."""
    if stride not in (1, 2):
        raise NotImplementedError("dcgan_upconv uses stride 1 or 2 only")
    N, Ci, H, W = x_nchw.shape
    Co = w_t.shape[1]
    HW = H * W

    if stride == 2:
        n_rep, M_rows, K = 4, HW, 4 * Ci
    else:
        pack = 128 // math.gcd(Co, 128)
        if HW % pack != 0:
            pack = 1
        n_rep, M_rows, K = pack, HW // pack, pack * 9 * Ci
    R, Kp = n_rep * Co, K + 1

    if batch_tile is None:
        in_b = M_rows * Kp * jnp.dtype(compute_dtype).itemsize
        out_b = M_rows * R * jnp.dtype(out_dtype).itemsize
        # double-buffered in/out blocks + two live (M_rows, R) f32 intermediates per sample
        per_sample = 2 * (in_b + out_b) + 2 * M_rows * R * 4
        batch_tile = _pick_batch_tile(N, per_sample)
    if N % batch_tile != 0:
        raise ValueError("batch_tile must divide the batch size")

    return _dcgan_upconv_impl(x_nchw, w_t, bias, gamma, beta, stride=stride,
                              num_groups=num_groups, compute_dtype=compute_dtype,
                              out_dtype=out_dtype, batch_tile=batch_tile)


# ----------------------------------------------------------------------------
# Pure-JAX reference (matches PyTorch semantics) for correctness checks.
# ----------------------------------------------------------------------------
def _reference(x_nchw, w_t, bias, gamma, beta, stride, num_groups=16, eps=1e-5):
    out_pad = 1 if stride == 2 else 0
    w_conv = jnp.flip(jnp.transpose(w_t, (1, 0, 2, 3)), axis=(2, 3))  # OIHW
    y = jax.lax.conv_general_dilated(
        x_nchw, w_conv, window_strides=(1, 1),
        padding=((1, 1 + out_pad), (1, 1 + out_pad)),
        lhs_dilation=(stride, stride),
        dimension_numbers=("NCHW", "OIHW", "NCHW"))
    y = y + bias[None, :, None, None]
    N, C, H, W = y.shape
    yg = y.reshape(N, num_groups, C // num_groups, H, W)
    mean = yg.mean(axis=(2, 3, 4), keepdims=True)
    var = yg.var(axis=(2, 3, 4), keepdims=True)
    yn = ((yg - mean) / jnp.sqrt(var + eps)).reshape(N, C, H, W)
    yn = yn * gamma[None, :, None, None] + beta[None, :, None, None]
    return jnp.where(yn > 0, yn, 0.2 * yn)


if __name__ == "__main__":
    # Shapes consistent with dcgan_upconv(nin=16, nout=32); GroupNorm(16, nout) -> nout % 16 == 0.
    N, Cin, Cout, H, W = 4, 16, 32, 16, 16

    key = jax.random.PRNGKey(0)
    kx, kw_, kb, kg, kbe = jax.random.split(key, 5)
    x = jax.random.normal(kx, (N, Cin, H, W), jnp.float32)
    w_t = 0.05 * jax.random.normal(kw_, (Cin, Cout, 3, 3), jnp.float32)  # ConvTranspose2d weight
    bias = 0.01 * jax.random.normal(kb, (Cout,), jnp.float32)
    gamma = 1.0 + 0.1 * jax.random.normal(kg, (Cout,), jnp.float32)
    beta = 0.1 * jax.random.normal(kbe, (Cout,), jnp.float32)

    # bf16-rounded operands, for a tight check of the bf16 MXU path
    xq = x.astype(jnp.bfloat16).astype(jnp.float32)
    wq = w_t.astype(jnp.bfloat16).astype(jnp.float32)

    for stride in (2, 1):
        out_pad = 1 if stride == 2 else 0
        Ho = (H - 1) * stride - 2 + 3 + out_pad
        ref = _reference(x, w_t, bias, gamma, beta, stride)

        # exact path (f32 matmul operands): tight tolerance vs. reference
        out_f32 = jax.block_until_ready(
            dcgan_upconv_pallas(x, w_t, bias, gamma, beta, stride=stride,
                                compute_dtype=jnp.float32))
        assert out_f32.shape == (N, Cout, Ho, Ho), out_f32.shape
        err = float(jnp.max(jnp.abs(out_f32 - ref)))
        assert err < 1e-3, ("f32 path mismatch", stride, err)

        # fast path (bf16 MXU operands, f32 accumulation + f32 GroupNorm)
        out_bf = jax.block_until_ready(
            dcgan_upconv_pallas(x, w_t, bias, gamma, beta, stride=stride,
                                compute_dtype=jnp.bfloat16))
        ref_bf = _reference(xq, wq, bias, gamma, beta, stride)   # same operand rounding
        err_bf_tight = float(jnp.max(jnp.abs(out_bf - ref_bf)))
        err_bf_full = float(jnp.max(jnp.abs(out_bf - ref)))
        assert err_bf_tight < 2e-3, ("bf16 path mismatch", stride, err_bf_tight)
        assert err_bf_full < 1e-1, ("bf16 path too far from f32 reference", stride, err_bf_full)

        # bf16 outputs (halved writeback / VMEM); GroupNorm stats stay f32 in-kernel
        out_bf16o = jax.block_until_ready(
            dcgan_upconv_pallas(x, w_t, bias, gamma, beta, stride=stride,
                                compute_dtype=jnp.bfloat16, out_dtype=jnp.bfloat16))
        err_o = float(jnp.max(jnp.abs(out_bf16o.astype(jnp.float32) - ref_bf)))
        assert err_o < 5e-2, ("bf16-out path mismatch", stride, err_o)

    print("KERNEL_OK")
</pallas_src>

<mosaic_0001>
module attributes {stable_mosaic.version = 11 : i64} {
  func.func @_upconv_kernel(%arg0: i32, %arg1: memref<4x256x65xf32, #tpu.memory_space<vmem>>, %arg2: memref<65x128xf32, #tpu.memory_space<vmem>>, %arg3: memref<1x128xf32, #tpu.memory_space<vmem>>, %arg4: memref<1x128xf32, #tpu.memory_space<vmem>>, %arg5: memref<128x16xf32, #tpu.memory_space<vmem>>, %arg6: memref<16x128xf32, #tpu.memory_space<vmem>>, %arg7: memref<4x256x128xf32, #tpu.memory_space<vmem>>) attributes {dimension_semantics = [#tpu.dimension_semantics<parallel>], iteration_bounds = array<i64: 1>, scalar_prefetch = 0 : i64, scratch_operands = 0 : i64, tpu.core_type = #tpu.core_type<tc>, window_params = [{transform_indices = @transform_0, window_bounds = array<i64: 4, 256, 65>}, {pipeline_mode = #tpu.pipeline_mode<synchronous>, transform_indices = @transform_1, window_bounds = array<i64: 65, 128>}, {pipeline_mode = #tpu.pipeline_mode<synchronous>, transform_indices = @transform_2, window_bounds = array<i64: 1, 128>}, {pipeline_mode = #tpu.pipeline_mode<synchronous>, transform_indices = @transform_3, window_bounds = array<i64: 1, 128>}, {pipeline_mode = #tpu.pipeline_mode<synchronous>, transform_indices = @transform_4, window_bounds = array<i64: 128, 16>}, {pipeline_mode = #tpu.pipeline_mode<synchronous>, transform_indices = @transform_5, window_bounds = array<i64: 16, 128>}, {transform_indices = @transform_6, window_bounds = array<i64: 4, 256, 128>}]} {
    %c0 = arith.constant 0 : index
    %c0_0 = arith.constant 0 : index
    %0 = vector.load %arg2[%c0, %c0_0] : memref<65x128xf32, #tpu.memory_space<vmem>>, vector<65x128xf32>
    %c0_1 = arith.constant 0 : index
    %c0_2 = arith.constant 0 : index
    %1 = vector.load %arg3[%c0_1, %c0_2] : memref<1x128xf32, #tpu.memory_space<vmem>>, vector<1x128xf32>
    %c0_3 = arith.constant 0 : index
    %c0_4 = arith.constant 0 : index
    %2 = vector.load %arg4[%c0_3, %c0_4] : memref<1x128xf32, #tpu.memory_space<vmem>>, vector<1x128xf32>
    %c0_5 = arith.constant 0 : index
    %c0_6 = arith.constant 0 : index
    %3 = vector.load %arg5[%c0_5, %c0_6] : memref<128x16xf32, #tpu.memory_space<vmem>>, vector<128x16xf32>
    %c0_7 = arith.constant 0 : index
    %c0_8 = arith.constant 0 : index
    %4 = vector.load %arg6[%c0_7, %c0_8] : memref<16x128xf32, #tpu.memory_space<vmem>>, vector<16x128xf32>
    %c0_9 = arith.constant 0 : index
    %c0_10 = arith.constant 0 : index
    %c0_11 = arith.constant 0 : index
    %5 = vector.load %arg1[%c0_9, %c0_10, %c0_11] : memref<4x256x65xf32, #tpu.memory_space<vmem>>, vector<4x256x65xf32>
    %6 = vector.shape_cast %5 : vector<4x256x65xf32> to vector<1024x65xf32>
    %cst = arith.constant dense<0.000000e+00> : vector<1024x128xf32>
    %7 = tpu.matmul %6, %0, %cst {dimension_numbers = #tpu.dot_dimension_numbers<[1], [0], [0], [1], [0, 0, 1, 1], [], []>} : vector<1024x65xf32>, vector<65x128xf32>, vector<1024x128xf32> -> vector<1024x128xf32>
    %8 = vector.shape_cast %7 : vector<1024x128xf32> to vector<4x256x128xf32>
    %cst_12 = arith.constant dense<0.000000e+00> : vector<4x128xf32>
    %9 = vector.multi_reduction <add>, %8, %cst_12 [1] : vector<4x256x128xf32> to vector<4x128xf32>
    %cst_13 = arith.constant dense<0.000000e+00> : vector<4x16xf32>
    %10 = tpu.matmul %9, %3, %cst_13 {dimension_numbers = #tpu.dot_dimension_numbers<[1], [0], [0], [1], [0, 0, 1, 1], [], []>} : vector<4x128xf32>, vector<128x16xf32>, vector<4x16xf32> -> vector<4x16xf32>
    %cst_14 = arith.constant 4.8828125E-4 : f32
    %11 = vector.broadcast %cst_14 : f32 to vector<4x16xf32>
    %12 = arith.mulf %10, %11 : vector<4x16xf32>
    %cst_15 = arith.constant dense<0.000000e+00> : vector<4x128xf32>
    %13 = tpu.matmul %12, %4, %cst_15 {dimension_numbers = #tpu.dot_dimension_numbers<[1], [0], [0], [1], [0, 0, 1, 1], [], []>} : vector<4x16xf32>, vector<16x128xf32>, vector<4x128xf32> -> vector<4x128xf32>
    %14 = vector.shape_cast %13 : vector<4x128xf32> to vector<4x1x128xf32>
    %15 = vector.broadcast %14 : vector<4x1x128xf32> to vector<4x256x128xf32>
    %16 = arith.subf %8, %15 : vector<4x256x128xf32>
    %17 = arith.mulf %16, %16 : vector<4x256x128xf32>
    %cst_16 = arith.constant dense<0.000000e+00> : vector<4x128xf32>
    %18 = vector.multi_reduction <add>, %17, %cst_16 [1] : vector<4x256x128xf32> to vector<4x128xf32>
    %cst_17 = arith.constant dense<0.000000e+00> : vector<4x16xf32>
    %19 = tpu.matmul %18, %3, %cst_17 {dimension_numbers = #tpu.dot_dimension_numbers<[1], [0], [0], [1], [0, 0, 1, 1], [], []>} : vector<4x128xf32>, vector<128x16xf32>, vector<4x16xf32> -> vector<4x16xf32>
    %cst_18 = arith.constant 4.8828125E-4 : f32
    %20 = vector.broadcast %cst_18 : f32 to vector<4x16xf32>
    %21 = arith.mulf %19, %20 : vector<4x16xf32>
    %cst_19 = arith.constant 9.99999974E-6 : f32
    %22 = vector.broadcast %cst_19 : f32 to vector<4x16xf32>
    %23 = arith.addf %21, %22 : vector<4x16xf32>
    %24 = math.rsqrt %23 : vector<4x16xf32>
    %cst_20 = arith.constant dense<0.000000e+00> : vector<4x128xf32>
    %25 = tpu.matmul %24, %4, %cst_20 {dimension_numbers = #tpu.dot_dimension_numbers<[1], [0], [0], [1], [0, 0, 1, 1], [], []>} : vector<4x16xf32>, vector<16x128xf32>, vector<4x128xf32> -> vector<4x128xf32>
    %26 = vector.broadcast %1 : vector<1x128xf32> to vector<4x128xf32>
    %27 = arith.mulf %25, %26 : vector<4x128xf32>
    %28 = arith.mulf %13, %27 : vector<4x128xf32>
    %29 = vector.broadcast %2 : vector<1x128xf32> to vector<4x128xf32>
    %30 = arith.subf %29, %28 : vector<4x128xf32>
    %31 = vector.shape_cast %27 : vector<4x128xf32> to vector<4x1x128xf32>
    %32 = vector.broadcast %31 : vector<4x1x128xf32> to vector<4x256x128xf32>
    %33 = arith.mulf %8, %32 : vector<4x256x128xf32>
    %34 = vector.shape_cast %30 : vector<4x128xf32> to vector<4x1x128xf32>
    %35 = vector.broadcast %34 : vector<4x1x128xf32> to vector<4x256x128xf32>
    %36 = arith.addf %33, %35 : vector<4x256x128xf32>
    %cst_21 = arith.constant 2.000000e-01 : f32
    %37 = vector.broadcast %cst_21 : f32 to vector<4x256x128xf32>
    %38 = arith.mulf %37, %36 : vector<4x256x128xf32>
    %39 = arith.maximumf %36, %38 : vector<4x256x128xf32>
    %c0_22 = arith.constant 0 : index
    %c0_23 = arith.constant 0 : index
    %c0_24 = arith.constant 0 : index
    %40 = vector.load %arg7[%c0_22, %c0_23, %c0_24] : memref<4x256x128xf32, #tpu.memory_space<vmem>>, vector<4x256x128xf32>
    tpu.vector_store %arg7[%c0_22, %c0_23, %c0_24], %39 {strides = array<i32>} : memref<4x256x128xf32, #tpu.memory_space<vmem>>, vector<4x256x128xf32>,
    return
  }
  func.func @transform_0(%arg0: i32) -> (i32, i32, i32) {
    %c0_i32 = arith.constant 0 : i32
    %c0_i32_0 = arith.constant 0 : i32
    %c0_i32_1 = arith.constant 0 : i32
    return %arg0, %c0_i32, %c0_i32_0 : i32, i32, i32
  }
  func.func @transform_1(%arg0: i32) -> (i32, i32) {
    %c0_i32 = arith.constant 0 : i32
    %c0_i32_0 = arith.constant 0 : i32
    %c0_i32_1 = arith.constant 0 : i32
    return %c0_i32, %c0_i32_0 : i32, i32
  }
  func.func @transform_2(%arg0: i32) -> (i32, i32) {
    %c0_i32 = arith.constant 0 : i32
    %c0_i32_0 = arith.constant 0 : i32
    %c0_i32_1 = arith.constant 0 : i32
    return %c0_i32, %c0_i32_0 : i32, i32
  }
  func.func @transform_3(%arg0: i32) -> (i32, i32) {
    %c0_i32 = arith.constant 0 : i32
    %c0_i32_0 = arith.constant 0 : i32
    %c0_i32_1 = arith.constant 0 : i32
    return %c0_i32, %c0_i32_0 : i32, i32
  }
  func.func @transform_4(%arg0: i32) -> (i32, i32) {
    %c0_i32 = arith.constant 0 : i32
    %c0_i32_0 = arith.constant 0 : i32
    %c0_i32_1 = arith.constant 0 : i32
    return %c0_i32, %c0_i32_0 : i32, i32
  }
  func.func @transform_5(%arg0: i32) -> (i32, i32) {
    %c0_i32 = arith.constant 0 : i32
    %c0_i32_0 = arith.constant 0 : i32
    %c0_i32_1 = arith.constant 0 : i32
    return %c0_i32, %c0_i32_0 : i32, i32
  }
  func.func @transform_6(%arg0: i32) -> (i32, i32, i32) {
    %c0_i32 = arith.constant 0 : i32
    %c0_i32_0 = arith.constant 0 : i32
    %c0_i32_1 = arith.constant 0 : i32
    return %arg0, %c0_i32, %c0_i32_0 : i32, i32, i32
  }
}

</mosaic_0001>

<bundles_post_ra>
// kernel: tile.24
= control target key start
LH: loop header
LB: loop body
LE: loop exit
PB: predicated region body
PF: predicated region fallthrough
CT: control target
= control target key end

     0   :  { %s37_s8 = smov 32   ;;  %s38_s9 = smov 64   ;;  %vm7_vm0 = vcmask 261120   ;;  %vm13_vm1 = vcmask 1048320   ;;  %vm19_vm2 = vcmask 785920   ;;  %vm25_vm3 = vcmask 523520   ;;  %s55_s0 = inlined_call_operand.vmem [shape: f32[4,32], index: 0, kind: input, shape index: {}]   ;;  %s56_s1 = inlined_call_operand.vmem [shape: f32[1,128], index: 1, kind: output, shape index: {}]  }
   0x1   :  { %v4_v0 = vld [vmem:[%s55_s0] sm:$0xf]  ;;  %s36_s0 = smov 96  }
   0x2   :  { %5 = vst [vmem:[#allocation1] sm:$0xf] %v4_v0 }
   0x9   :  { %v10_v1 = vld [vmem:[#allocation1 + $0x3] sm:$0x1]   ;;  %v22_v2 = vld [vmem:[#allocation1 + $0x1] sm:$0x1]   ;;  %v16_v3 = vld [vmem:[#allocation1 + $0x2] sm:$0x1]  }
   0xa   :  { %11 = vrot.lane.b32.xlu0 %v10_v1, %s36_s0  ;;  %23 = vrot.lane.b32.xlu1 %v22_v2, %s37_s8  ;;  %v6_v4 = vld [vmem:[#allocation1] sm:$0x1]  }
   0xb   :  { %8 = vst.msk [vmem:[#allocation0] sm:$0x1] %vm7_vm0, %v6_v4  }
  0x12   :  { %17 = vrot.lane.b32.xlu0 %v16_v3, %s38_s9 }
  0x7c   :  { %v12_v5 = vpop.permute.xlu0 %11   ;;  %v24_v6 = vpop.permute.xlu1 %23  }
  0x7d   :  { %14 = vst.msk [vmem:[#allocation0] sm:$0x1] %vm13_vm1, %v12_v5  }
  0x84   :  { %v18_v7 = vpop.permute.xlu0 %17  }
  0x85   :  { %20 = vst.msk [vmem:[#allocation0] sm:$0x1] %vm19_vm2, %v18_v7  }
  0x86   :  { %26 = vst.msk [vmem:[#allocation0] sm:$0x1] %vm25_vm3, %v24_v6  }
  0x8d   :  { %v29_v8 = vld [vmem:[#allocation0] sm:$0x1] }
  0x8e   :  { %32 = vst [vmem:[%s56_s1] sm:$0x1] %v29_v8 }

// kernel: tile.23
= control target key start
LH: loop header
LB: loop body
LE: loop exit
PB: predicated region body
PF: predicated region fallthrough
CT: control target
= control target key end

     0   :  { %2 = vsyncpa [#allocation1], 0  ;;  %s48_s8 = smov [#allocation0]   ;;  %s65_s0 = inlined_call_operand.hbm [shape: f32[32], index: 0, kind: input, shape index: {}]   ;;  %s66_s1 = inlined_call_operand.vmem [shape: f32[4,32], index: 1, kind: output, shape index: {}]  }
   0x1   :  { %s8_s0 = sshll.u32 %s65_s0, 4  ;;  %s10_s9 = sshll.u32 %s48_s8, 4  ;;  %s9_s0 = int_to_ptr.hbm [resolvable:$true] %s8_s0  ;;  %s11_s9 = int_to_ptr.vmem [resolvable:$true] %s10_s9 }
   0x2   :  { %13 = dma.hbm_to_vmem [thread:$0]  %s9_s0, 16, %s11_s9, [#allocation1]  }
   0x3   :  { %46 = dma.done.wait [#allocation1], 16  }
   0x4   :  { %47 = vsyncadd [#allocation1], 4294967280  ;;  %v18_v0 = vld [vmem:[#allocation0] ss:$0 sm:$0xff] }
   0x5   :  { %19 = vst [vmem:[%s66_s1] sm:$0xf] %v18_v0 }
   0x6   :  { %20 = vsyncpa [#allocation1], 1 }

// kernel: _dcgan_upconv_impl.1
= control target key start
LH: loop header
LB: loop body
LE: loop exit
PB: predicated region body
PF: predicated region fallthrough
CT: control target
= control target key end

     0   :  { %vm565_vm0 = vcmask 1040384   ;;  %vm180_vm1 = vcmask 531456   ;;  %vm1122_vm2 = vcmask 1041409   ;;  %vm1124_vm3 = vcmask 1042434   ;;  %s5568_s1 = inlined_call_operand.vmem [shape: f32[65,128], index: 1, kind: input, shape index: {}]   ;;  %s5569_s0 = inlined_call_operand.vmem [shape: f32[4,256,65], index: 0, kind: input, shape index: {}]   ;;  %s5570_s4 = inlined_call_operand.vmem [shape: f32[128,16], index: 4, kind: input, shape index: {}]   ;;  %s5571_s5 = inlined_call_operand.vmem [shape: f32[16,128], index: 5, kind: input, shape index: {}]   ;;  %s5572_s2 = inlined_call_operand.vmem [shape: f32[1,128], index: 2, kind: input, shape index: {}]   ;;  %s5573_s3 = inlined_call_operand.vmem [shape: f32[1,128], index: 3, kind: input, shape index: {}]   ;;  %s5574_s6 = inlined_call_operand.vmem [shape: f32[4,256,128], index: 6, kind: output, shape index: {}]  }
   0x1   :  { %v31_v0 = vld [vmem:[%s5568_s1 + $0x40] sm:$0x1]  ;;  %v30_v1 = vld [vmem:[%s5568_s1 + $0x38] sm:$0xff]  ;;  %v29_v2 = vld [vmem:[%s5568_s1 + $0x30] sm:$0xff]  ;;  %vm1126_vm4 = vcmask 1043459   ;;  %vm1150_vm5 = vcmask 130048  }
   0x2   :  { %2330 = vmatpush.msk.msra.mxu0 %vm565_vm0, %v31_v0  ;;  %2461 = vmatpush.msk.msra.mxu1 %vm565_vm0, %v31_v0  ;;  %v28_v3 = vld [vmem:[%s5568_s1 + $0x28] sm:$0xff]  ;;  %v27_v4 = vld [vmem:[%s5568_s1 + $0x20] sm:$0xff]  ;;  %v26_v5 = vld [vmem:[%s5568_s1 + $0x18] sm:$0xff] }
   0x3   :  { %2462 = vmatpush.msk.msra.mxu2 %vm565_vm0, %v31_v0  ;;  %2463 = vmatpush.msk.msra.mxu3 %vm565_vm0, %v31_v0  ;;  %v25_v6 = vld [vmem:[%s5568_s1 + $0x10] sm:$0xff]  ;;  %v24_v7 = vld [vmem:[%s5568_s1 + $0x8] sm:$0xff]  ;;  %v23_v8 = vld [vmem:[%s5568_s1] sm:$0xff] }
   0x4   :  { %577 = vmatpush.msra.mxu0 %v30_v1  ;;  %2464 = vmatpush.msra.mxu1 %v30_v1  ;;  %v52_v9 = vld [vmem:[%s5569_s0] sm:$0xff]  ;;  %v86_v10 = vld [vmem:[%s5569_s0 + $0x110] sm:$0xff]  ;;  %v53_v12 = vld [vmem:[%s5569_s0 + $0x8] sm:$0xff] }
   0x5   :  { %2465 = vmatpush.msra.mxu2 %v30_v1  ;;  %2466 = vmatpush.msra.mxu3 %v30_v1  ;;  %v118_v11 = vld [vmem:[%s5569_s0 + $0x210] sm:$0xff]  ;;  %v87_v13 = vld [vmem:[%s5569_s0 + $0x118] sm:$0xff]  ;;  %v88_v16 = vld [vmem:[%s5569_s0 + $0x120] sm:$0xff] }
   0x6   :  { %578 = vmatpush.msra.mxu0 %v29_v2  ;;  %2467 = vmatpush.msra.mxu1 %v29_v2  ;;  %v119_v14 = vld [vmem:[%s5569_s0 + $0x218] sm:$0xff]  ;;  %v54_v15 = vld [vmem:[%s5569_s0 + $0x10] sm:$0xff]  ;;  %v120_v17 = vld [vmem:[%s5569_s0 + $0x220] sm:$0xff] }
   0x7   :  { %2468 = vmatpush.msra.mxu2 %v29_v2  ;;  %2469 = vmatpush.msra.mxu3 %v29_v2  ;;  %v55_v18 = vld [vmem:[%s5569_s0 + $0x18] sm:$0xff]  ;;  %v89_v19 = vld [vmem:[%s5569_s0 + $0x128] sm:$0xff]  ;;  %v56_v21 = vld [vmem:[%s5569_s0 + $0x20] sm:$0xff] }
   0x8   :  { %579 = vmatpush.msra.mxu0 %v28_v3  ;;  %2470 = vmatpush.msra.mxu1 %v28_v3  ;;  %v121_v20 = vld [vmem:[%s5569_s0 + $0x228] sm:$0xff]  ;;  %v90_v22 = vld [vmem:[%s5569_s0 + $0x130] sm:$0xff]  ;;  %v91_v25 = vld [vmem:[%s5569_s0 + $0x138] sm:$0xff] }
   0x9   :  { %2471 = vmatpush.msra.mxu2 %v28_v3  ;;  %2472 = vmatpush.msra.mxu3 %v28_v3  ;;  %v122_v23 = vld [vmem:[%s5569_s0 + $0x230] sm:$0xff]  ;;  %v57_v24 = vld [vmem:[%s5569_s0 + $0x28] sm:$0xff]  ;;  %v123_v26 = vld [vmem:[%s5569_s0 + $0x238] sm:$0xff] }
   0xa   :  { %580 = vmatpush.msra.mxu0 %v27_v4  ;;  %2473 = vmatpush.msra.mxu1 %v27_v4  ;;  %v150_v27 = vld [vmem:[%s5569_s0 + $0x310] sm:$0xff]  ;;  %v92_v29 = vld [vmem:[%s5569_s0 + $0x140] sm:$0xff]  ;;  %v151_v31 = vld [vmem:[%s5569_s0 + $0x318] sm:$0xff] }
   0xb   :  { %2474 = vmatpush.msra.mxu2 %v27_v4  ;;  %2475 = vmatpush.msra.mxu3 %v27_v4  ;;  %v58_v28 = vld [vmem:[%s5569_s0 + $0x30] sm:$0xff]  ;;  %v124_v30 = vld [vmem:[%s5569_s0 + $0x240] sm:$0xff]  ;;  %v59_v32 = vld [vmem:[%s5569_s0 + $0x38] sm:$0xff] }
   0xc   :  { %581 = vmatpush.msra.mxu0 %v26_v5  ;;  %2476 = vmatpush.msra.mxu1 %v26_v5  ;;  %v93_v33 = vld [vmem:[%s5569_s0 + $0x148] sm:$0xff]  ;;  %v152_v35 = vld [vmem:[%s5569_s0 + $0x320] sm:$0xff]  ;;  %v94_v37 = vld [vmem:[%s5569_s0 + $0x150] sm:$0xff] }
   0xd   :  { %2477 = vmatpush.msra.mxu2 %v26_v5  ;;  %2478 = vmatpush.msra.mxu3 %v26_v5  ;;  %v125_v34 = vld [vmem:[%s5569_s0 + $0x248] sm:$0xff]  ;;  %v60_v36 = vld [vmem:[%s5569_s0 + $0x40] sm:$0xff]  ;;  %v126_v38 = vld [vmem:[%s5569_s0 + $0x250] sm:$0xff] }
   0xe   :  { %582 = vmatpush.msra.mxu0 %v25_v6  ;;  %2479 = vmatpush.msra.mxu1 %v25_v6  ;;  %v153_v39 = vld [vmem:[%s5569_s0 + $0x328] sm:$0xff]  ;;  %v95_v41 = vld [vmem:[%s5569_s0 + $0x158] sm:$0xff]  ;;  %v154_v43 = vld [vmem:[%s5569_s0 + $0x330] sm:$0xff] }
   0xf   :  { %2480 = vmatpush.msra.mxu2 %v25_v6  ;;  %2481 = vmatpush.msra.mxu3 %v25_v6  ;;  %v61_v40 = vld [vmem:[%s5569_s0 + $0x48] sm:$0xff]  ;;  %v127_v42 = vld [vmem:[%s5569_s0 + $0x258] sm:$0xff]  ;;  %v62_v44 = vld [vmem:[%s5569_s0 + $0x50] sm:$0xff] }
  0x10   :  { %583 = vmatpush.msra.mxu0 %v24_v7  ;;  %2482 = vmatpush.msra.mxu1 %v24_v7  ;;  %v96_v45 = vld [vmem:[%s5569_s0 + $0x160] sm:$0xff]  ;;  %v155_v47 = vld [vmem:[%s5569_s0 + $0x338] sm:$0xff]  ;;  %v97_v49 = vld [vmem:[%s5569_s0 + $0x168] sm:$0xff] }
  0x11   :  { %2483 = vmatpush.msra.mxu2 %v24_v7  ;;  %2484 = vmatpush.msra.mxu3 %v24_v7  ;;  %v128_v46 = vld [vmem:[%s5569_s0 + $0x260] sm:$0xff]  ;;  %v63_v48 = vld [vmem:[%s5569_s0 + $0x58] sm:$0xff]  ;;  %v129_v50 = vld [vmem:[%s5569_s0 + $0x268] sm:$0xff] }
  0x12   :  { %584 = vmatpush.msra.mxu0 %v23_v8  ;;  %2485 = vmatpush.msra.mxu1 %v23_v8  ;;  %v156_v51 = vld [vmem:[%s5569_s0 + $0x340] sm:$0xff]  ;;  %v98_v53 = vld [vmem:[%s5569_s0 + $0x170] sm:$0xff]  ;;  %v157_v55 = vld [vmem:[%s5569_s0 + $0x348] sm:$0xff] }
  0x13   :  { %2486 = vmatpush.msra.mxu2 %v23_v8  ;;  %2331 = vmatmul.msk.f32.vlgmr.msra.gmra.mxu0 %vm180_vm1, %v52_v9  ;;  %v64_v52 = vld [vmem:[%s5569_s0 + $0x60] sm:$0xff]  ;;  %v130_v54 = vld [vmem:[%s5569_s0 + $0x270] sm:$0xff]  ;;  %v65_v56 = vld [vmem:[%s5569_s0 + $0x68] sm:$0xff] }
  0x14   :  { %2365 = vmatmul.msk.f32.vlgmr.msra.gmra.mxu1 %vm180_vm1, %v86_v10  ;;  %2397 = vmatmul.msk.f32.vlgmr.msra.gmra.mxu2 %vm180_vm1, %v118_v11  ;;  %v99_v57 = vld [vmem:[%s5569_s0 + $0x178] sm:$0xff]  ;;  %v158_v59 = vld [vmem:[%s5569_s0 + $0x350] sm:$0xff]  ;;  %v100_v61 = vld [vmem:[%s5569_s0 + $0x180] sm:$0xff] }
  0x15   :  { %2487 = vmatpush.msra.mxu3 %v23_v8  ;;  %v131_v58 = vld [vmem:[%s5569_s0 + $0x278] sm:$0xff]  ;;  %v66_v60 = vld [vmem:[%s5569_s0 + $0x70] sm:$0xff]  ;;  %v132_v62 = vld [vmem:[%s5569_s0 + $0x280] sm:$0xff] }
  0x16   :  { %2429 = vmatmul.msk.f32.vlgmr.msra.gmra.mxu3 %vm180_vm1, %v150_v27  ;;  %v159_v63 = vld [vmem:[%s5569_s0 + $0x358] sm:$0xff]  ;;  %v101_v1 = vld [vmem:[%s5569_s0 + $0x188] sm:$0xff]  ;;  %v160_v3 = vld [vmem:[%s5569_s0 + $0x360] sm:$0xff] }
  0x17   :  { %v67_v0 = vld [vmem:[%s5569_s0 + $0x78] sm:$0xff]  ;;  %v133_v2 = vld [vmem:[%s5569_s0 + $0x288] sm:$0xff]  ;;  %v68_v5 = vld [vmem:[%s5569_s0 + $0x80] sm:$0xff] }
  0x18   :  { %v102_v7 = vld [vmem:[%s5569_s0 + $0x190] sm:$0xff]  ;;  %v161_v10 = vld [vmem:[%s5569_s0 + $0x368] sm:$0xff] }
  0x19   :  { %v134_v8 = vld [vmem:[%s5569_s0 + $0x290] sm:$0xff] }
  0x1b   :  { %2332 = vmatmul.msk.f32.gmra.mxu0 %vm180_vm1, %v53_v12  ;;  %v69_v12 = vld [vmem:[%s5569_s0 + $0x88] sm:$0xff] }
  0x1c   :  { %2366 = vmatmul.msk.f32.gmra.mxu1 %vm180_vm1, %v87_v13  ;;  %2398 = vmatmul.msk.f32.gmra.mxu2 %vm180_vm1, %v119_v14  ;;  %v103_v14 = vld [vmem:[%s5569_s0 + $0x198] sm:$0xff] }
  0x1e   :  { %2430 = vmatmul.msk.f32.gmra.mxu3 %vm180_vm1, %v151_v31  ;;  %v164_v31 = vld [vmem:[%s5569_s0 + $0x380] sm:$0xff] }
  0x23   :  { %2333 = vmatmul.msk.f32.gmra.mxu0 %vm180_vm1, %v54_v15  ;;  %v135_v15 = vld [vmem:[%s5569_s0 + $0x298] sm:$0xff] }
  0x24   :  { %2367 = vmatmul.msk.f32.gmra.mxu1 %vm180_vm1, %v88_v16  ;;  %2399 = vmatmul.msk.f32.gmra.mxu2 %vm180_vm1, %v120_v17  ;;  %v162_v17 = vld [vmem:[%s5569_s0 + $0x370] sm:$0xff] }
  0x26   :  { %2431 = vmatmul.msk.f32.gmra.mxu3 %vm180_vm1, %v152_v35  ;;  %v106_v35 = vld [vmem:[%s5569_s0 + $0x1b0] sm:$0xff] }
  0x2b   :  { %2334 = vmatmul.msk.f32.gmra.mxu0 %vm180_vm1, %v55_v18 }
  0x2c   :  { %2368 = vmatmul.msk.f32.gmra.mxu1 %vm180_vm1, %v89_v19  ;;  %2400 = vmatmul.msk.f32.gmra.mxu2 %vm180_vm1, %v121_v20  ;;  %v70_v19 = vld [vmem:[%s5569_s0 + $0x90] sm:$0xff] }
  0x2e   :  { %2432 = vmatmul.msk.f32.gmra.mxu3 %vm180_vm1, %v153_v39 }
  0x33   :  { %2335 = vmatmul.msk.f32.gmra.mxu0 %vm180_vm1, %v56_v21  ;;  %v104_v21 = vld [vmem:[%s5569_s0 + $0x1a0] sm:$0xff] }
  0x34   :  { %2369 = vmatmul.msk.f32.gmra.mxu1 %vm180_vm1, %v90_v22  ;;  %2401 = vmatmul.msk.f32.gmra.mxu2 %vm180_vm1, %v122_v23  ;;  %v136_v22 = vld [vmem:[%s5569_s0 + $0x2a0] sm:$0xff] }
  0x36   :  { %2433 = vmatmul.msk.f32.gmra.mxu3 %vm180_vm1, %v154_v43  ;;  %v139_v43 = vld [vmem:[%s5569_s0 + $0x2b8] sm:$0xff] }
  0x3b   :  { %2336 = vmatmul.msk.f32.gmra.mxu0 %vm180_vm1, %v57_v24  ;;  %v163_v24 = vld [vmem:[%s5569_s0 + $0x378] sm:$0xff] }
  0x3c   :  { %2370 = vmatmul.msk.f32.gmra.mxu1 %vm180_vm1, %v91_v25  ;;  %2402 = vmatmul.msk.f32.gmra.mxu2 %vm180_vm1, %v123_v26  ;;  %v71_v26 = vld [vmem:[%s5569_s0 + $0x98] sm:$0xff] }
  0x3e   :  { %2434 = vmatmul.msk.f32.gmra.mxu3 %vm180_vm1, %v155_v47  ;;  %v74_v47 = vld [vmem:[%s5569_s0 + $0xb0] sm:$0xff] }
  0x43   :  { %2337 = vmatmul.msk.f32.gmra.mxu0 %vm180_vm1, %v58_v28  ;;  %v105_v28 = vld [vmem:[%s5569_s0 + $0x1a8] sm:$0xff] }
  0x44   :  { %2371 = vmatmul.msk.f32.gmra.mxu1 %vm180_vm1, %v92_v29  ;;  %2403 = vmatmul.msk.f32.gmra.mxu2 %vm180_vm1, %v124_v30  ;;  %v137_v29 = vld [vmem:[%s5569_s0 + $0x2a8] sm:$0xff] }
  0x46   :  { %2435 = vmatmul.msk.f32.gmra.mxu3 %vm180_vm1, %v156_v51 }
  0x4b   :  { %2338 = vmatmul.msk.f32.gmra.mxu0 %vm180_vm1, %v59_v32 }
  0x4c   :  { %2372 = vmatmul.msk.f32.gmra.mxu1 %vm180_vm1, %v93_v33  ;;  %2404 = vmatmul.msk.f32.gmra.mxu2 %vm180_vm1, %v125_v34  ;;  %v72_v33 = vld [vmem:[%s5569_s0 + $0xa0] sm:$0xff] }
  0x4e   :  { %2436 = vmatmul.msk.f32.gmra.mxu3 %vm180_vm1, %v157_v55 }
  0x53   :  { %2339 = vmatmul.msk.f32.gmra.mxu0 %vm180_vm1, %v60_v36  ;;  %v138_v36 = vld [vmem:[%s5569_s0 + $0x2b0] sm:$0xff] }
  0x54   :  { %2373 = vmatmul.msk.f32.gmra.mxu1 %vm180_vm1, %v94_v37  ;;  %2405 = vmatmul.msk.f32.gmra.mxu2 %vm180_vm1, %v126_v38  ;;  %v165_v38 = vld [vmem:[%s5569_s0 + $0x388] sm:$0xff] }
  0x56   :  { %2437 = vmatmul.msk.f32.gmra.mxu3 %vm180_vm1, %v158_v59  ;;  %v141_v59 = vld [vmem:[%s5569_s0 + $0x2c8] sm:$0xff] }
  0x5b   :  { %2340 = vmatmul.msk.f32.gmra.mxu0 %vm180_vm1, %v61_v40  ;;  %v73_v40 = vld [vmem:[%s5569_s0 + $0xa8] sm:$0xff] }
  0x5c   :  { %2374 = vmatmul.msk.f32.gmra.mxu1 %vm180_vm1, %v95_v41  ;;  %2406 = vmatmul.msk.f32.gmra.mxu2 %vm180_vm1, %v127_v42  ;;  %v107_v42 = vld [vmem:[%s5569_s0 + $0x1b8] sm:$0xff] }
  0x5e   :  { %2438 = vmatmul.msk.f32.gmra.mxu3 %vm180_vm1, %v159_v63 }
  0x63   :  { %2341 = vmatmul.msk.f32.gmra.mxu0 %vm180_vm1, %v62_v44 }
  0x64   :  { %2375 = vmatmul.msk.f32.gmra.mxu1 %vm180_vm1, %v96_v45  ;;  %2407 = vmatmul.msk.f32.gmra.mxu2 %vm180_vm1, %v128_v46  ;;  %v166_v45 = vld [vmem:[%s5569_s0 + $0x390] sm:$0xff] }
  0x66   :  { %2439 = vmatmul.msk.f32.gmra.mxu3 %vm180_vm1, %v160_v3  ;;  %v142_v3 = vld [vmem:[%s5569_s0 + $0x2d0] sm:$0xff] }
  0x6b   :  { %2342 = vmatmul.msk.f32.gmra.mxu0 %vm180_vm1, %v63_v48 }
  0x6c   :  { %2376 = vmatmul.msk.f32.gmra.mxu1 %vm180_vm1, %v97_v49  ;;  %2408 = vmatmul.msk.f32.gmra.mxu2 %vm180_vm1, %v129_v50  ;;  %v108_v49 = vld [vmem:[%s5569_s0 + $0x1c0] sm:$0xff] }
  0x6d   :  { %v140_v50 = vld [vmem:[%s5569_s0 + $0x2c0] sm:$0xff] }
  0x6e   :  { %2440 = vmatmul.msk.f32.gmra.mxu3 %vm180_vm1, %v161_v10  ;;  %v169_v10 = vld [vmem:[%s5569_s0 + $0x3a8] sm:$0xff] }
  0x73   :  { %2343 = vmatmul.msk.f32.gmra.mxu0 %vm180_vm1, %v64_v52 }
  0x74   :  { %2377 = vmatmul.msk.f32.gmra.mxu1 %vm180_vm1, %v98_v53  ;;  %2409 = vmatmul.msk.f32.gmra.mxu2 %vm180_vm1, %v130_v54  ;;  %v49_v53 = vld [vmem:[%s5570_s4 + $0x78] sm:$0xff] }
  0x75   :  { %v167_v54 = vld [vmem:[%s5569_s0 + $0x398] sm:$0xff]  ;;  %1129 = vmatpush.msrb.mxu1 %v49_v53  ;;  %1598 = vmatpush.msrb.mxu3 %v49_v53 }
  0x76   :  { %2441 = vmatmul.msk.f32.gmra.mxu3 %vm180_vm1, %v162_v17  ;;  %v111_v17 = vld [vmem:[%s5569_s0 + $0x1d8] sm:$0xff] }
  0x7b   :  { %2344 = vmatmul.msk.f32.gmra.mxu0 %vm180_vm1, %v65_v56  ;;  %v75_v56 = vld [vmem:[%s5569_s0 + $0xb8] sm:$0xff] }
  0x7c   :  { %2378 = vmatmul.msk.f32.gmra.mxu1 %vm180_vm1, %v99_v57  ;;  %2410 = vmatmul.msk.f32.gmra.mxu2 %vm180_vm1, %v131_v58  ;;  %v109_v58 = vld [vmem:[%s5569_s0 + $0x1c8] sm:$0xff] }
  0x7e   :  { %2442 = vmatmul.msk.f32.gmra.mxu3 %vm180_vm1, %v163_v24  ;;  %v170_v24 = vld [vmem:[%s5569_s0 + $0x3b0] sm:$0xff] }
  0x83   :  { %2345 = vmatmul.msk.f32.gmra.mxu0 %vm180_vm1, %v66_v60 }
  0x84   :  { %2379 = vmatmul.msk.f32.gmra.mxu1 %vm180_vm1, %v100_v61  ;;  %2411 = vmatmul.msk.f32.gmra.mxu2 %vm180_vm1, %v132_v62  ;;  %v168_v62 = vld [vmem:[%s5569_s0 + $0x3a0] sm:$0xff] }
  0x86   :  { %2443 = vmatmul.msk.f32.gmra.mxu3 %vm180_vm1, %v164_v31  ;;  %v112_v31 = vld [vmem:[%s5569_s0 + $0x1e0] sm:$0xff] }
  0x8b   :  { %2346 = vmatmul.msk.f32.gmra.mxu0 %vm180_vm1, %v67_v0  ;;  %v76_v0 = vld [vmem:[%s5569_s0 + $0xc0] sm:$0xff] }
  0x8c   :  { %2380 = vmatmul.msk.f32.gmra.mxu1 %vm180_vm1, %v101_v1  ;;  %2412 = vmatmul.msk.f32.gmra.mxu2 %vm180_vm1, %v133_v2  ;;  %v110_v2 = vld [vmem:[%s5569_s0 + $0x1d0] sm:$0xff] }
  0x8e   :  { %2444 = vmatmul.msk.f32.gmra.mxu3 %vm180_vm1, %v165_v38  ;;  %v47_v38 = vld [vmem:[%s5570_s4 + $0x68] sm:$0xff] }
  0x90   :  { %v2789_v4 = vpop.f32.mrf.mxu0 }
  0x91   :  { %5808 = vst [vmem:[#allocation2_spill] sm:$0xff] %v2789_v4  ;;  %v2795_v6 = vpop.f32.mrf.mxu1 }
  0x92   :  { %5809 = vst [vmem:[#allocation3_spill] sm:$0xff] %v2795_v6 }
  0x93   :  { %2347 = vmatmul.msk.f32.gmra.mxu0 %vm180_vm1, %v68_v5 }
  0x94   :  { %2381 = vmatmul.msk.f32.gmra.mxu1 %vm180_vm1, %v102_v7  ;;  %2413 = vmatmul.msk.f32.gmra.mxu2 %vm180_vm1, %v134_v8  ;;  %v48_v8 = vld [vmem:[%s5570_s4 + $0x70] sm:$0xff] }
  0x95   :  { %1130 = vmatpush.msrb.mxu1 %v48_v8  ;;  %1599 = vmatpush.msrb.mxu3 %v48_v8  ;;  %v46_v8 = vld [vmem:[%s5570_s4 + $0x60] sm:$0xff] }
  0x96   :  { %2445 = vmatmul.msk.f32.gmra.mxu3 %vm180_vm1, %v166_v45 }
  0x97   :  { %v2806_v9 = vpop.f32.mrf.mxu2  ;;  %1131 = vmatpush.msrb.mxu1 %v47_v38  ;;  %1600 = vmatpush.msrb.mxu3 %v47_v38  ;;  %v174_v38 = vld [vmem:[%s5569_s0 + $0x3d0] sm:$0xff] }
  0x98   :  { %5810 = vst [vmem:[#allocation4_spill] sm:$0xff] %v2806_v9  ;;  %v2811_v11 = vpop.f32.mrf.mxu0 }
  0x99   :  { %5811 = vst [vmem:[#allocation5_spill] sm:$0xff] %v2811_v11  ;;  %v2817_v13 = vpop.f32.mrf.mxu1  ;;  %v2935_v51 = vpop.f32.mrf.mxu3  ;;  %1132 = vmatpush.msrb.mxu1 %v46_v8  ;;  %1601 = vmatpush.msrb.mxu3 %v46_v8  ;;  %v175_v8 = vld [vmem:[%s5569_s0 + $0x3d8] sm:$0xff] }
  0x9a   :  { %5812 = vst [vmem:[#allocation6_spill] sm:$0xff] %v2817_v13 }
  0x9b   :  { %2348 = vmatmul.msk.f32.gmra.mxu0 %vm180_vm1, %v69_v12  ;;  %5828 = vst [vmem:[#allocation22_spill] sm:$0xff] %v2935_v51 }
  0x9c   :  { %2382 = vmatmul.msk.f32.gmra.mxu1 %vm180_vm1, %v103_v14  ;;  %2414 = vmatmul.msk.f32.gmra.mxu2 %vm180_vm1, %v135_v15  ;;  %v77_v14 = vld [vmem:[%s5569_s0 + $0xc8] sm:$0xff] }
  0x9e   :  { %2446 = vmatmul.msk.f32.gmra.mxu3 %vm180_vm1, %v167_v54  ;;  %v172_v54 = vld [vmem:[%s5569_s0 + $0x3c0] sm:$0xff] }
  0x9f   :  { %v2828_v16 = vpop.f32.mrf.mxu2 }
  0xa0   :  { %5813 = vst [vmem:[#allocation7_spill] sm:$0xff] %v2828_v16  ;;  %v2833_v18 = vpop.f32.mrf.mxu0 }
  0xa1   :  { %5814 = vst [vmem:[#allocation8_spill] sm:$0xff] %v2833_v18  ;;  %v2839_v20 = vpop.f32.mrf.mxu1  ;;  %v2962_v60 = vpop.f32.mrf.mxu3 }
  0xa2   :  { %5815 = vst [vmem:[#allocation9_spill] sm:$0xff] %v2839_v20 }
  0xa3   :  { %2349 = vmatmul.msk.f32.gmra.mxu0 %vm180_vm1, %v70_v19  ;;  %5832 = vst [vmem:[#allocation26_spill] sm:$0xff] %v2962_v60  ;;  %v143_v19 = vld [vmem:[%s5569_s0 + $0x2d8] sm:$0xff] }
  0xa4   :  { %2383 = vmatmul.msk.f32.gmra.mxu1 %vm180_vm1, %v104_v21  ;;  %2415 = vmatmul.msk.f32.gmra.mxu2 %vm180_vm1, %v136_v22 }
  0xa6   :  { %2447 = vmatmul.msk.f32.gmra.mxu3 %vm180_vm1, %v168_v62  ;;  %v114_v62 = vld [vmem:[%s5569_s0 + $0x1f0] sm:$0xff] }
  0xa7   :  { %v2850_v23 = vpop.f32.mrf.mxu2 }
  0xa8   :  { %5816 = vst [vmem:[#allocation10_spill] sm:$0xff] %v2850_v23  ;;  %v2855_v25 = vpop.f32.mrf.mxu0 }
  0xa9   :  { %5817 = vst [vmem:[#allocation11_spill] sm:$0xff] %v2855_v25  ;;  %v2861_v27 = vpop.f32.mrf.mxu1  ;;  %v2986_v5 = vpop.f32.mrf.mxu3 }
  0xaa   :  { %5818 = vst [vmem:[#allocation12_spill] sm:$0xff] %v2861_v27 }
  0xab   :  { %2350 = vmatmul.msk.f32.gmra.mxu0 %vm180_vm1, %v71_v26  ;;  %5836 = vst [vmem:[#allocation30_spill] sm:$0xff] %v2986_v5 }
  0xac   :  { %2384 = vmatmul.msk.f32.gmra.mxu1 %vm180_vm1, %v105_v28  ;;  %2416 = vmatmul.msk.f32.gmra.mxu2 %vm180_vm1, %v137_v29  ;;  %v78_v28 = vld [vmem:[%s5569_s0 + $0xd0] sm:$0xff] }
  0xae   :  { %2448 = vmatmul.msk.f32.gmra.mxu3 %vm180_vm1, %v169_v10  ;;  %v173_v10 = vld [vmem:[%s5569_s0 + $0x3c8] sm:$0xff] }
  0xaf   :  { %v2872_v30 = vpop.f32.mrf.mxu2 }
  0xb0   :  { %5819 = vst [vmem:[#allocation13_spill] sm:$0xff] %v2872_v30  ;;  %v2877_v32 = vpop.f32.mrf.mxu0 }
  0xb1   :  { %5820 = vst [vmem:[#allocation14_spill] sm:$0xff] %v2877_v32  ;;  %v2883_v34 = vpop.f32.mrf.mxu1  ;;  %v3013_v21 = vpop.f32.mrf.mxu3 }
  0xb2   :  { %5821 = vst [vmem:[#allocation15_spill] sm:$0xff] %v2883_v34 }
  0xb3   :  { %2351 = vmatmul.msk.f32.gmra.mxu0 %vm180_vm1, %v72_v33  ;;  %5840 = vst [vmem:[#allocation34_spill] sm:$0xff] %v3013_v21  ;;  %v144_v33 = vld [vmem:[%s5569_s0 + $0x2e0] sm:$0xff] }
  0xb4   :  { %2385 = vmatmul.msk.f32.gmra.mxu1 %vm180_vm1, %v106_v35  ;;  %2417 = vmatmul.msk.f32.gmra.mxu2 %vm180_vm1, %v138_v36 }
  0xb6   :  { %2449 = vmatmul.msk.f32.gmra.mxu3 %vm180_vm1, %v170_v24  ;;  %v115_v24 = vld [vmem:[%s5569_s0 + $0x1f8] sm:$0xff] }
  0xb7   :  { %v2894_v37 = vpop.f32.mrf.mxu2 }
  0xb8   :  { %5822 = vst [vmem:[#allocation16_spill] sm:$0xff] %v2894_v37  ;;  %v2899_v39 = vpop.f32.mrf.mxu0 }
  0xb9   :  { %5823 = vst [vmem:[#allocation17_spill] sm:$0xff] %v2899_v39  ;;  %v2905_v41 = vpop.f32.mrf.mxu1  ;;  %v3037_v35 = vpop.f32.mrf.mxu3 }
  0xba   :  { %5824 = vst [vmem:[#allocation18_spill] sm:$0xff] %v2905_v41 }
  0xbb   :  { %2352 = vmatmul.msk.f32.gmra.mxu0 %vm180_vm1, %v73_v40  ;;  %5844 = vst [vmem:[#allocation38_spill] sm:$0xff] %v3037_v35  ;;  %v171_v40 = vld [vmem:[%s5569_s0 + $0x3b8] sm:$0xff] }
  0xbc   :  { %2386 = vmatmul.msk.f32.gmra.mxu1 %vm180_vm1, %v107_v42  ;;  %2418 = vmatmul.msk.f32.gmra.mxu2 %vm180_vm1, %v139_v43  ;;  %v79_v43 = vld [vmem:[%s5569_s0 + $0xd8] sm:$0xff] }
  0xbe   :  { %2450 = vmatmul.msk.f32.gmra.mxu3 %vm180_vm1, %v171_v40 }
  0xbf   :  { %v2916_v44 = vpop.f32.mrf.mxu2 }
  0xc0   :  { %5825 = vst [vmem:[#allocation19_spill] sm:$0xff] %v2916_v44  ;;  %v2921_v46 = vpop.f32.mrf.mxu0 }
  0xc1   :  { %5826 = vst [vmem:[#allocation20_spill] sm:$0xff] %v2921_v46  ;;  %v2927_v48 = vpop.f32.mrf.mxu1 }
  0xc2   :  { %5827 = vst [vmem:[#allocation21_spill] sm:$0xff] %v2927_v48 }
  0xc3   :  { %2353 = vmatmul.msk.f32.gmra.mxu0 %vm180_vm1, %v74_v47  ;;  %v113_v47 = vld [vmem:[%s5569_s0 + $0x1e8] sm:$0xff] }
  0xc4   :  { %2387 = vmatmul.msk.f32.gmra.mxu1 %vm180_vm1, %v108_v49  ;;  %2419 = vmatmul.msk.f32.gmra.mxu2 %vm180_vm1, %v140_v50  ;;  %v145_v49 = vld [vmem:[%s5569_s0 + $0x2e8] sm:$0xff]  ;;  %v3064_v50 = vpop.f32.mrf.mxu3 }
  0xc5   :  { %5848 = vst [vmem:[#allocation42_spill] sm:$0xff] %v3064_v50 }
  0xc6   :  { %2451 = vmatmul.msk.f32.gmra.mxu3 %vm180_vm1, %v172_v54  ;;  %v148_v54 = vld [vmem:[%s5569_s0 + $0x300] sm:$0xff] }
  0xc7   :  { %v2940_v52 = vpop.f32.mrf.mxu2 }
  0xc8   :  { %5829 = vst [vmem:[#allocation23_spill] sm:$0xff] %v2940_v52  ;;  %v2948_v55 = vpop.f32.mrf.mxu0 }
  0xc9   :  { %5830 = vst [vmem:[#allocation24_spill] sm:$0xff] %v2948_v55  ;;  %v2954_v57 = vpop.f32.mrf.mxu1 }
  0xca   :  { %5831 = vst [vmem:[#allocation25_spill] sm:$0xff] %v2954_v57 }
  0xcb   :  { %2354 = vmatmul.msk.f32.gmra.mxu0 %vm180_vm1, %v75_v56 }
  0xcc   :  { %2388 = vmatmul.msk.f32.gmra.mxu1 %vm180_vm1, %v109_v58  ;;  %2420 = vmatmul.msk.f32.gmra.mxu2 %vm180_vm1, %v141_v59  ;;  %v80_v58 = vld [vmem:[%s5569_s0 + $0xe0] sm:$0xff] }
  0xce   :  { %2452 = vmatmul.msk.f32.gmra.mxu3 %vm180_vm1, %v173_v10 }
  0xcf   :  { %v2967_v61 = vpop.f32.mrf.mxu2 }
  0xd0   :  { %5833 = vst [vmem:[#allocation27_spill] sm:$0xff] %v2967_v61  ;;  %v2972_v63 = vpop.f32.mrf.mxu0 }
  0xd1   :  { %5834 = vst [vmem:[#allocation28_spill] sm:$0xff] %v2972_v63  ;;  %v2978_v1 = vpop.f32.mrf.mxu1 }
  0xd2   :  { %5835 = vst [vmem:[#allocation29_spill] sm:$0xff] %v2978_v1 }
  0xd3   :  { %2355 = vmatmul.msk.f32.gmra.mxu0 %vm180_vm1, %v76_v0  ;;  %v146_v0 = vld [vmem:[%s5569_s0 + $0x2f0] sm:$0xff] }
  0xd4   :  { %2389 = vmatmul.msk.f32.gmra.mxu1 %vm180_vm1, %v110_v2  ;;  %2421 = vmatmul.msk.f32.gmra.mxu2 %vm180_vm1, %v142_v3  ;;  %v3088_v2 = vpop.f32.mrf.mxu3 }
  0xd5   :  { %5852 = vst [vmem:[#allocation46_spill] sm:$0xff] %v3088_v2 }
  0xd6   :  { %2453 = vmatmul.msk.f32.gmra.mxu3 %vm180_vm1, %v174_v38  ;;  %v149_v38 = vld [vmem:[%s5569_s0 + $0x308] sm:$0xff] }
  0xd7   :  { %v2991_v7 = vpop.f32.mrf.mxu2 }
  0xd8   :  { %5837 = vst [vmem:[#allocation31_spill] sm:$0xff] %v2991_v7  ;;  %v2999_v12 = vpop.f32.mrf.mxu0 }
  0xd9   :  { %5838 = vst [vmem:[#allocation32_spill] sm:$0xff] %v2999_v12  ;;  %v3005_v15 = vpop.f32.mrf.mxu1 }
  0xda   :  { %5839 = vst [vmem:[#allocation33_spill] sm:$0xff] %v3005_v15 }
  0xdb   :  { %2356 = vmatmul.msk.f32.gmra.mxu0 %vm180_vm1, %v77_v14 }
  0xdc   :  { %2390 = vmatmul.msk.f32.gmra.mxu1 %vm180_vm1, %v111_v17  ;;  %2422 = vmatmul.msk.f32.gmra.mxu2 %vm180_vm1, %v143_v19  ;;  %v81_v17 = vld [vmem:[%s5569_s0 + $0xe8] sm:$0xff] }
  0xde   :  { %2454 = vmatmul.msk.f32.gmra.mxu3 %vm180_vm1, %v175_v8 }
  0xdf   :  { %v3018_v22 = vpop.f32.mrf.mxu2 }
  0xe0   :  { %5841 = vst [vmem:[#allocation35_spill] sm:$0xff] %v3018_v22  ;;  %v3023_v26 = vpop.f32.mrf.mxu0 }
  0xe1   :  { %5842 = vst [vmem:[#allocation36_spill] sm:$0xff] %v3023_v26  ;;  %v3029_v29 = vpop.f32.mrf.mxu1 }
  0xe2   :  { %5843 = vst [vmem:[#allocation37_spill] sm:$0xff] %v3029_v29 }
  0xe3   :  { %2357 = vmatmul.msk.f32.gmra.mxu0 %vm180_vm1, %v78_v28  ;;  %v147_v28 = vld [vmem:[%s5569_s0 + $0x2f8] sm:$0xff] }
  0xe4   :  { %2391 = vmatmul.msk.f32.gmra.mxu1 %vm180_vm1, %v112_v31  ;;  %2423 = vmatmul.msk.f32.gmra.mxu2 %vm180_vm1, %v144_v33  ;;  %v3116_v31 = vpop.f32.mrf.mxu3 }
  0xe5   :  { %5856 = vst [vmem:[#allocation50_spill] sm:$0xff] %v3116_v31 }
  0xe7   :  { %v3042_v36 = vpop.f32.mrf.mxu2 }
  0xe8   :  { %5845 = vst [vmem:[#allocation39_spill] sm:$0xff] %v3042_v36  ;;  %v3050_v42 = vpop.f32.mrf.mxu0 }
  0xe9   :  { %5846 = vst [vmem:[#allocation40_spill] sm:$0xff] %v3050_v42  ;;  %v3056_v45 = vpop.f32.mrf.mxu1 }
  0xea   :  { %5847 = vst [vmem:[#allocation41_spill] sm:$0xff] %v3056_v45  ;;  %v178_v45 = vld [vmem:[%s5569_s0 + $0x3f0] sm:$0xff] }
  0xeb   :  { %2358 = vmatmul.msk.f32.gmra.mxu0 %vm180_vm1, %v79_v43  ;;  %v82_v43 = vld [vmem:[%s5569_s0 + $0xf0] sm:$0xff] }
  0xec   :  { %2392 = vmatmul.msk.f32.gmra.mxu1 %vm180_vm1, %v113_v47  ;;  %2424 = vmatmul.msk.f32.gmra.mxu2 %vm180_vm1, %v145_v49  ;;  %v116_v49 = vld [vmem:[%s5569_s0 + $0x200] sm:$0xff] }
  0xef   :  { %v3069_v53 = vpop.f32.mrf.mxu2 }
  0xf0   :  { %5849 = vst [vmem:[#allocation43_spill] sm:$0xff] %v3069_v53  ;;  %v3074_v56 = vpop.f32.mrf.mxu0 }
  0xf1   :  { %5850 = vst [vmem:[#allocation44_spill] sm:$0xff] %v3074_v56  ;;  %v3080_v59 = vpop.f32.mrf.mxu1 }
  0xf2   :  { %5851 = vst [vmem:[#allocation45_spill] sm:$0xff] %v3080_v59 }
  0xf3   :  { %2359 = vmatmul.msk.f32.gmra.mxu0 %vm180_vm1, %v80_v58  ;;  %v3140_v58 = vpop.f32.mrf.mxu3 }
  0xf4   :  { %2393 = vmatmul.msk.f32.gmra.mxu1 %vm180_vm1, %v114_v62  ;;  %2425 = vmatmul.msk.f32.gmra.mxu2 %vm180_vm1, %v146_v0  ;;  %5860 = vst [vmem:[#allocation54_spill] sm:$0xff] %v3140_v58  ;;  %v45_v0 = vld [vmem:[%s5570_s4 + $0x58] sm:$0xff] }
  0xf5   :  { %1133 = vmatpush.msrb.mxu1 %v45_v0  ;;  %1602 = vmatpush.msrb.mxu3 %v45_v0  ;;  %v84_v0 = vld [vmem:[%s5569_s0 + $0x100] sm:$0xff] }
  0xf7   :  { %v3093_v3 = vpop.f32.mrf.mxu2 }
  0xf8   :  { %5853 = vst [vmem:[#allocation47_spill] sm:$0xff] %v3093_v3  ;;  %v3101_v14 = vpop.f32.mrf.mxu0 }
  0xf9   :  { %5854 = vst [vmem:[#allocation48_spill] sm:$0xff] %v3101_v14  ;;  %v3107_v19 = vpop.f32.mrf.mxu1 }
  0xfa   :  { %5855 = vst [vmem:[#allocation49_spill] sm:$0xff] %v3107_v19 }
  0xfb   :  { %2360 = vmatmul.msk.f32.gmra.mxu0 %vm180_vm1, %v81_v17  ;;  %v83_v17 = vld [vmem:[%s5569_s0 + $0xf8] sm:$0xff] }
  0xfc   :  { %2394 = vmatmul.msk.f32.gmra.mxu1 %vm180_vm1, %v115_v24  ;;  %2426 = vmatmul.msk.f32.gmra.mxu2 %vm180_vm1, %v147_v28  ;;  %v117_v28 = vld [vmem:[%s5569_s0 + $0x208] sm:$0xff] }
  0xff   :  { %v3120_v33 = vpop.f32.mrf.mxu2 }
 0x100   :  { %5857 = vst [vmem:[#allocation51_spill] sm:$0xff] %v3120_v33  ;;  %v3125_v40 = vpop.f32.mrf.mxu0 }
 0x101   :  { %5858 = vst [vmem:[#allocation52_spill] sm:$0xff] %v3125_v40  ;;  %v3131_v47 = vpop.f32.mrf.mxu1 }
 0x102   :  { %5859 = vst [vmem:[#allocation53_spill] sm:$0xff] %v3131_v47  ;;  %v177_v47 = vld [vmem:[%s5569_s0 + $0x3e8] sm:$0xff] }
 0x103   :  { %2361 = vmatmul.msk.f32.gmra.mxu0 %vm180_vm1, %v82_v43  ;;  %v3167_v43 = vpop.f32.mrf.mxu3 }
 0x104   :  { %2395 = vmatmul.msk.f32.gmra.mxu1 %vm180_vm1, %v116_v49  ;;  %2427 = vmatmul.msk.f32.gmra.mxu2 %vm180_vm1, %v148_v54  ;;  %5864 = vst [vmem:[#allocation58_spill] sm:$0xff] %v3167_v43  ;;  %v176_v54 = vld [vmem:[%s5569_s0 + $0x3e0] sm:$0xff] }
 0x105   :  { %2455 = vmatmul.msk.f32.gmra.mxu3 %vm180_vm1, %v176_v54  ;;  %v85_v54 = vld [vmem:[%s5569_s0 + $0x108] sm:$0xff] }
 0x107   :  { %v3144_v62 = vpop.f32.mrf.mxu2 }
 0x108   :  { %5861 = vst [vmem:[#allocation55_spill] sm:$0xff] %v3144_v62  ;;  %v3152_v10 = vpop.f32.mrf.mxu0 }
 0x109   :  { %5862 = vst [vmem:[#allocation56_spill] sm:$0xff] %v3152_v10  ;;  %v3158_v24 = vpop.f32.mrf.mxu1 }
 0x10a   :  { %5863 = vst [vmem:[#allocation57_spill] sm:$0xff] %v3158_v24  ;;  %v44_v24 = vld [vmem:[%s5570_s4 + $0x50] sm:$0xff] }
 0x10b   :  { %2362 = vmatmul.msk.f32.gmra.mxu0 %vm180_vm1, %v83_v17  ;;  %1134 = vmatpush.msrb.mxu1 %v44_v24 }
 0x10c   :  { %2396 = vmatmul.msk.f32.gmra.mxu1 %vm180_vm1, %v117_v28  ;;  %2428 = vmatmul.msk.f32.gmra.mxu2 %vm180_vm1, %v149_v38  ;;  %v3185_v28 = vpop.f32.mrf.mxu3 }
 0x10d   :  { %5868 = vst [vmem:[#allocation62_spill] sm:$0xff] %v3185_v28  ;;  %2456 = vmatmul.msk.f32.gmra.mxu3 %vm180_vm1, %v177_v47 }
 0x10e   :  { %1603 = vmatpush.msrb.mxu3 %v44_v24  ;;  %v43_v24 = vld [vmem:[%s5570_s4 + $0x48] sm:$0xff] }
 0x10f   :  { %v3171_v49 = vpop.f32.mrf.mxu2  ;;  %1135 = vmatpush.msrb.mxu1 %v43_v24 }
 0x110   :  { %5865 = vst [vmem:[#allocation59_spill] sm:$0xff] %v3171_v49  ;;  %v3176_v8 = vpop.f32.mrf.mxu0  ;;  %1604 = vmatpush.msrb.mxu3 %v43_v24 }
 0x111   :  { %5866 = vst [vmem:[#allocation60_spill] sm:$0xff] %v3176_v8  ;;  %v3182_v17 = vpop.f32.mrf.mxu1 }
 0x112   :  { %5867 = vst [vmem:[#allocation61_spill] sm:$0xff] %v3182_v17 }
 0x113   :  { %2363 = vmatmul.msk.f32.gmra.mxu0 %vm180_vm1, %v84_v0 }
 0x114   :  { %v3204_v17 = vpop.f32.mrf.mxu3 }
 0x115   :  { %5872 = vst [vmem:[#allocation66_spill] sm:$0xff] %v3204_v17  ;;  %2457 = vmatmul.msk.f32.gmra.mxu3 %vm180_vm1, %v178_v45 }
 0x117   :  { %v3187_v38 = vpop.f32.mrf.mxu2 }
 0x118   :  { %5869 = vst [vmem:[#allocation63_spill] sm:$0xff] %v3187_v38  ;;  %v3195_v19 = vpop.f32.mrf.mxu0 }
 0x119   :  { %5870 = vst [vmem:[#allocation64_spill] sm:$0xff] %v3195_v19  ;;  %v3201_v0 = vpop.f32.mrf.mxu1 }
 0x11a   :  { %5871 = vst [vmem:[#allocation65_spill] sm:$0xff] %v3201_v0 }
 0x11b   :  { %2364 = vmatmul.msk.f32.gmra.mxu0 %vm180_vm1, %v85_v54  ;;  %v179_v54 = vld [vmem:[%s5569_s0 + $0x3f8] sm:$0xff] }
 0x11c   :  { %v3216_v47 = vpop.f32.mrf.mxu3 }
 0x11d   :  { %5876 = vst [vmem:[#allocation70_spill] sm:$0xff] %v3216_v47  ;;  %2458 = vmatmul.msk.f32.gmra.mxu3 %vm180_vm1, %v179_v54 }
 0x11f   :  { %v3206_v59 = vpop.f32.mrf.mxu2 }
 0x120   :  { %5873 = vst [vmem:[#allocation67_spill] sm:$0xff] %v3206_v59  ;;  %v3211_v29 = vpop.f32.mrf.mxu0 }
 0x121   :  { %5874 = vst [vmem:[#allocation68_spill] sm:$0xff] %v3211_v29  ;;  %v3214_v15 = vpop.f32.mrf.mxu1 }
 0x122   :  { %5875 = vst [vmem:[#allocation69_spill] sm:$0xff] %v3214_v15 }
 0x124   :  { %v3231_v15 = vpop.f32.mrf.mxu3 }
 0x125   :  { %5880 = vst [vmem:[#allocation74_spill] sm:$0xff] %v3231_v15 }
 0x127   :  { %v3218_v0 = vpop.f32.mrf.mxu2 }
 0x128   :  { %5877 = vst [vmem:[#allocation71_spill] sm:$0xff] %v3218_v0  ;;  %v3226_v59 = vpop.f32.mrf.mxu0 }
 0x129   :  { %5878 = vst [vmem:[#allocation72_spill] sm:$0xff] %v3226_v59  ;;  %v3229_v45 = vpop.f32.mrf.mxu1  ;;  %v42_v59 = vld [vmem:[%s5570_s4 + $0x40] sm:$0xff] }
 0x12a   :  { %5879 = vst [vmem:[#allocation73_spill] sm:$0xff] %v3229_v45  ;;  %1136 = vmatpush.msrb.mxu1 %v42_v59  ;;  %1605 = vmatpush.msrb.mxu3 %v42_v59  ;;  %v3268_v59 = vld [vmem:[%s5571_s5 + $0x8] sm:$0xff] }
 0x12b   :  { %5894 = vst [vmem:[#allocation88_spill] sm:$0xff] %v3268_v59  ;;  %1168 = vmatpush.msrb.mxu2 %v3268_v59 }
 0x12c   :  { %v3239_v38 = vpop.f32.mrf.mxu3 }
 0x12d   :  { %5884 = vst [vmem:[#allocation78_spill] sm:$0xff] %v3239_v38 }
 0x12f   :  { %v3233_v29 = vpop.f32.mrf.mxu2 }
 0x130   :  { %5881 = vst [vmem:[#allocation75_spill] sm:$0xff] %v3233_v29  ;;  %v3235_v0 = vpop.f32.mrf.mxu0 }
 0x131   :  { %5882 = vst [vmem:[#allocation76_spill] sm:$0xff] %v3235_v0  ;;  %v3237_v19 = vpop.f32.mrf.mxu1 }
 0x132   :  { %5883 = vst [vmem:[#allocation77_spill] sm:$0xff] %v3237_v19 }
 0x134   :  { %v3250_v45 = vpop.f32.mrf.mxu3 }
 0x135   :  { %5888 = vst [vmem:[#allocation82_spill] sm:$0xff] %v3250_v45 }
 0x137   :  { %v3241_v1 = vpop.f32.mrf.mxu2 }
 0x138   :  { %5885 = vst [vmem:[#allocation79_spill] sm:$0xff] %v3241_v1  ;;  %v3246_v54 = vpop.f32.mrf.mxu0 }
 0x139   :  { %5886 = vst [vmem:[#allocation80_spill] sm:$0xff] %v3246_v54  ;;  %v3248_v24 = vpop.f32.mrf.mxu1  ;;  %v41_v54 = vld [vmem:[%s5570_s4 + $0x38] sm:$0xff] }
 0x13a   :  { %5887 = vst [vmem:[#allocation81_spill] sm:$0xff] %v3248_v24  ;;  %1137 = vmatpush.msrb.mxu1 %v41_v54  ;;  %1606 = vmatpush.msrb.mxu3 %v41_v54 }
 0x13c   :  { %v3260_v1 = vpop.f32.mrf.mxu3 }
 0x13d   :  { %5893 = vst [vmem:[#allocation87_spill] sm:$0xff] %v3260_v1 }
 0x13f   :  { %v3252_v29 = vpop.f32.mrf.mxu2 }
 0x140   :  { %5889 = vst [vmem:[#allocation83_spill] sm:$0xff] %v3252_v29  ;;  %v3254_v0 = vpop.f32.mrf.mxu0 }
 0x141   :  { %5890 = vst [vmem:[#allocation84_spill] sm:$0xff] %v3254_v0  ;;  %v3256_v19 = vpop.f32.mrf.mxu1 }
 0x142   :  { %5891 = vst [vmem:[#allocation85_spill] sm:$0xff] %v3256_v19 }
 0x144   :  { %v3281_v1 = vpop.f32.mrf.mxu3 }
 0x145   :  { %5900 = vst [vmem:[#allocation94_spill] sm:$0xff] %v3281_v1 }
 0x147   :  { %v3258_v38 = vpop.f32.mrf.mxu2 }
 0x148   :  { %5892 = vst [vmem:[#allocation86_spill] sm:$0xff] %v3258_v38  ;;  %v3270_v24 = vpop.f32.mrf.mxu0 }
 0x149   :  { %5895 = vst [vmem:[#allocation89_spill] sm:$0xff] %v3270_v24  ;;  %v3273_v0 = vpop.f32.mrf.mxu1  ;;  %v40_v24 = vld [vmem:[%s5570_s4 + $0x30] sm:$0xff] }
 0x14a   :  { %5896 = vst [vmem:[#allocation90_spill] sm:$0xff] %v3273_v0  ;;  %1138 = vmatpush.msrb.mxu1 %v40_v24  ;;  %1607 = vmatpush.msrb.mxu3 %v40_v24 }
 0x14c   :  { %v3292_v54 = vpop.f32.mrf.mxu3 }
 0x14d   :  { %5904 = vst [vmem:[#allocation98_spill] sm:$0xff] %v3292_v54 }
 0x14f   :  { %v3275_v19 = vpop.f32.mrf.mxu2 }
 0x150   :  { %5897 = vst [vmem:[#allocation91_spill] sm:$0xff] %v3275_v19  ;;  %v3277_v38 = vpop.f32.mrf.mxu0 }
 0x151   :  { %5898 = vst [vmem:[#allocation92_spill] sm:$0xff] %v3277_v38  ;;  %v3279_v29 = vpop.f32.mrf.mxu1 }
 0x152   :  { %5899 = vst [vmem:[#allocation93_spill] sm:$0xff] %v3279_v29 }
 0x154   :  { %v3300_v19 = vpop.f32.mrf.mxu3 }
 0x155   :  { %5908 = vst [vmem:[#allocation102_spill] sm:$0xff] %v3300_v19 }
 0x157   :  { %v3283_v45 = vpop.f32.mrf.mxu2 }
 0x158   :  { %5901 = vst [vmem:[#allocation95_spill] sm:$0xff] %v3283_v45  ;;  %v3288_v15 = vpop.f32.mrf.mxu0 }
 0x159   :  { %5902 = vst [vmem:[#allocation96_spill] sm:$0xff] %v3288_v15  ;;  %v3290_v0 = vpop.f32.mrf.mxu1  ;;  %v39_v15 = vld [vmem:[%s5570_s4 + $0x28] sm:$0xff] }
 0x15a   :  { %5903 = vst [vmem:[#allocation97_spill] sm:$0xff] %v3290_v0  ;;  %1139 = vmatpush.msrb.mxu1 %v39_v15  ;;  %1608 = vmatpush.msrb.mxu3 %v39_v15 }
 0x15f   :  { %v3294_v59 = vpop.f32.mrf.mxu2 }
 0x160   :  { %5905 = vst [vmem:[#allocation99_spill] sm:$0xff] %v3294_v59  ;;  %v3296_v38 = vpop.f32.mrf.mxu0  ;;  %v3313_v59 = vpop.f32.mrf.mxu3 }
 0x161   :  { %5906 = vst [vmem:[#allocation100_spill] sm:$0xff] %v3296_v38  ;;  %v3298_v29 = vpop.f32.mrf.mxu1 }
 0x162   :  { %5907 = vst [vmem:[#allocation101_spill] sm:$0xff] %v3298_v29 }
 0x163   :  { %5913 = vst [vmem:[#allocation107_spill] sm:$0xff] %v3313_v59 }
 0x167   :  { %v3302_v45 = vpop.f32.mrf.mxu2 }
 0x168   :  { %5909 = vst [vmem:[#allocation103_spill] sm:$0xff] %v3302_v45  ;;  %v3307_v1 = vpop.f32.mrf.mxu0  ;;  %v3325_v8 = vpop.f32.mrf.mxu3 }
 0x169   :  { %5910 = vst [vmem:[#allocation104_spill] sm:$0xff] %v3307_v1  ;;  %v3309_v24 = vpop.f32.mrf.mxu1 }
 0x16a   :  { %5911 = vst [vmem:[#allocation105_spill] sm:$0xff] %v3309_v24 }
 0x16b   :  { %5919 = vst [vmem:[#allocation113_spill] sm:$0xff] %v3325_v8 }
 0x16f   :  { %v3311_v0 = vpop.f32.mrf.mxu2 }
 0x170   :  { %5912 = vst [vmem:[#allocation106_spill] sm:$0xff] %v3311_v0  ;;  %v3315_v38 = vpop.f32.mrf.mxu0  ;;  %v3333_v0 = vpop.f32.mrf.mxu3 }
 0x171   :  { %5914 = vst [vmem:[#allocation108_spill] sm:$0xff] %v3315_v38  ;;  %v3317_v29 = vpop.f32.mrf.mxu1 }
 0x172   :  { %5915 = vst [vmem:[#allocation109_spill] sm:$0xff] %v3317_v29 }
 0x173   :  { %5923 = vst [vmem:[#allocation117_spill] sm:$0xff] %v3333_v0 }
 0x177   :  { %v3319_v19 = vpop.f32.mrf.mxu2 }
 0x178   :  { %5916 = vst [vmem:[#allocation110_spill] sm:$0xff] %v3319_v19  ;;  %v3321_v45 = vpop.f32.mrf.mxu0 }
 0x179   :  { %5917 = vst [vmem:[#allocation111_spill] sm:$0xff] %v3321_v45  ;;  %v3323_v54 = vpop.f32.mrf.mxu1  ;;  %v3346_v45 = vpop.f32.mrf.mxu3 }
 0x17a   :  { %5918 = vst [vmem:[#allocation112_spill] sm:$0xff] %v3323_v54 }
 0x17b   :  { %5927 = vst [vmem:[#allocation121_spill] sm:$0xff] %v3346_v45 }
 0x17f   :  { %v3327_v1 = vpop.f32.mrf.mxu2 }
 0x180   :  { %5920 = vst [vmem:[#allocation114_spill] sm:$0xff] %v3327_v1  ;;  %v3329_v15 = vpop.f32.mrf.mxu0  ;;  %v970_v1 = vadd.f32 %v2811_v11, %v2789_v4 }
 0x181   :  { %5921 = vst [vmem:[#allocation115_spill] sm:$0xff] %v3329_v15  ;;  %v3331_v24 = vpop.f32.mrf.mxu1 }
 0x182   :  { %5922 = vst [vmem:[#allocation116_spill] sm:$0xff] %v3331_v24  ;;  %v971_v0 = vadd.f32 %v970_v1, %v2833_v18 }
 0x187   :  { %v3335_v59 = vpop.f32.mrf.mxu2 }
 0x188   :  { %5924 = vst [vmem:[#allocation118_spill] sm:$0xff] %v3335_v59  ;;  %v3337_v38 = vpop.f32.mrf.mxu0 }
 0x189   :  { %5925 = vst [vmem:[#allocation119_spill] sm:$0xff] %v3337_v38  ;;  %v3339_v29 = vpop.f32.mrf.mxu1 }
 0x18a   :  { %5926 = vst [vmem:[#allocation120_spill] sm:$0xff] %v3339_v29  ;;  %v1044_v19 = vadd.f32 %v3339_v29, %v3331_v24 }
 0x18c   :  { %v1045_v54 = vadd.f32 %v1044_v19, %v2806_v9  ;;  %v972_v19 = vadd.f32 %v971_v0, %v2855_v25 }
 0x18e   :  { %v1046_v15 = vadd.f32 %v1045_v54, %v2828_v16  ;;  %v973_v24 = vadd.f32 %v972_v19, %v2877_v32 }
 0x18f   :  { %v3350_v8 = vpop.f32.mrf.mxu2 }
 0x190   :  { %5928 = vst [vmem:[#allocation122_spill] sm:$0xff] %v3350_v8  ;;  %v1047_v38 = vadd.f32 %v1046_v15, %v2850_v23  ;;  %v1081_v47 = vadd.f32 %v3350_v8, %v3335_v59  ;;  %v3355_v49 = vpop.f32.mrf.mxu0  ;;  %v974_v16 = vadd.f32 %v973_v24, %v2899_v39  ;;  %v3367_v23 = vpop.f32.mrf.mxu3 }
 0x191   :  { %5929 = vst [vmem:[#allocation123_spill] sm:$0xff] %v3355_v49 }
 0x192   :  { %v1048_v9 = vadd.f32 %v1047_v38, %v2872_v30  ;;  %v1082_v29 = vadd.f32 %v1081_v47, %v2935_v51  ;;  %v975_v59 = vadd.f32 %v974_v16, %v2921_v46  ;;  %5930 = vst [vmem:[#allocation124_spill] sm:$0xff] %v3367_v23 }
 0x194   :  { %v1049_v54 = vadd.f32 %v1048_v9, %v2894_v37  ;;  %v1083_v1 = vadd.f32 %v1082_v29, %v2962_v60  ;;  %v976_v9 = vadd.f32 %v975_v59, %v2948_v55  ;;  %v5943_v60 = vld [vmem:[#allocation78_spill] sm:$0xff]  ;;  %v5966_v37 = vld [vmem:[#allocation57_spill] sm:$0xff] }
 0x196   :  { %v1050_v15 = vadd.f32 %v1049_v54, %v2916_v44  ;;  %v1084_v8 = vadd.f32 %v1083_v1, %v2986_v5  ;;  %v977_v54 = vadd.f32 %v976_v9, %v2972_v63 }
 0x198   :  { %v1051_v38 = vadd.f32 %v1050_v15, %v2940_v52  ;;  %v1085_v0 = vadd.f32 %v1084_v8, %v3013_v21  ;;  %v3371_v47 = vpop.f32.mrf.mxu0  ;;  %v978_v8 = vadd.f32 %v977_v54, %v2999_v12  ;;  %v5956_v52 = vld [vmem:[#allocation80_spill] sm:$0xff] }
 0x199   :  { %5931 = vst [vmem:[#allocation125_spill] sm:$0xff] %v3371_v47  ;;  %v1007_v29 = vadd.f32 %v3371_v47, %v3355_v49 }
 0x19a   :  { %v1052_v24 = vadd.f32 %v1051_v38, %v2967_v61  ;;  %v1086_v19 = vadd.f32 %v1085_v0, %v3037_v35  ;;  %v38_v38 = vld [vmem:[%s5570_s4 + $0x20] sm:$0xff]  ;;  %v979_v0 = vadd.f32 %v978_v8, %v3023_v26  ;;  %v37_v8 = vld [vmem:[%s5570_s4 + $0x18] sm:$0xff]  ;;  %v5955_v61 = vld [vmem:[#allocation79_spill] sm:$0xff] }
 0x19b   :  { %v1008_v16 = vadd.f32 %v1007_v29, %v2795_v6  ;;  %1140 = vmatpush.msrb.mxu1 %v38_v38  ;;  %1609 = vmatpush.msrb.mxu3 %v38_v38 }
 0x19c   :  { %v1053_v1 = vadd.f32 %v1052_v24, %v2991_v7  ;;  %v1087_v15 = vadd.f32 %v1086_v19, %v3064_v50  ;;  %v980_v19 = vadd.f32 %v979_v0, %v3050_v42  ;;  %v5941_v50 = vld [vmem:[#allocation33_spill] sm:$0xff]  ;;  %v5952_v7 = vld [vmem:[#allocation76_spill] sm:$0xff] }
 0x19d   :  { %v1009_v21 = vadd.f32 %v1008_v16, %v2817_v13  ;;  %v3395_v16 = vpop.f32.mrf.mxu3  ;;  %1141 = vmatpush.msrb.mxu1 %v37_v8  ;;  %1610 = vmatpush.msrb.mxu3 %v37_v8 }
 0x19e   :  { %v1054_v59 = vadd.f32 %v1053_v1, %v3018_v22  ;;  %v1088_v5 = vadd.f32 %v1087_v15, %v3088_v2  ;;  %5932 = vst [vmem:[#allocation126_spill] sm:$0xff] %v3395_v16  ;;  %v5951_v22 = vld [vmem:[#allocation75_spill] sm:$0xff] }
 0x19f   :  { %v1010_v9 = vadd.f32 %v1009_v21, %v2839_v20  ;;  %v981_v21 = vadd.f32 %v980_v19, %v3074_v56  ;;  %v36_v19 = vld [vmem:[%s5570_s4 + $0x10] sm:$0xff] }
 0x1a0   :  { %v1055_v29 = vadd.f32 %v1054_v59, %v3042_v36  ;;  %v1089_v24 = vadd.f32 %v1088_v5, %v3116_v31  ;;  %1142 = vmatpush.msrb.mxu1 %v36_v19  ;;  %1611 = vmatpush.msrb.mxu3 %v36_v19  ;;  %v5936_v31 = vld [vmem:[#allocation29_spill] sm:$0xff]  ;;  %v5948_v36 = vld [vmem:[#allocation72_spill] sm:$0xff] }
 0x1a1   :  { %v1011_v54 = vadd.f32 %v1010_v9, %v2861_v27  ;;  %v982_v0 = vadd.f32 %v981_v21, %v3101_v14 }
 0x1a2   :  { %v1056_v1 = vadd.f32 %v1055_v29, %v3069_v53  ;;  %v1090_v15 = vadd.f32 %v1089_v24, %v3140_v58  ;;  %v5935_v58 = vld [vmem:[#allocation60_spill] sm:$0xff]  ;;  %v5947_v53 = vld [vmem:[#allocation71_spill] sm:$0xff] }
 0x1a3   :  { %v1012_v59 = vadd.f32 %v1011_v54, %v2883_v34  ;;  %v983_v54 = vadd.f32 %v982_v0, %v3125_v40  ;;  %v35_v0 = vld [vmem:[%s5570_s4 + $0x8] sm:$0xff] }
 0x1a4   :  { %v1057_v5 = vadd.f32 %v1056_v1, %v3093_v3  ;;  %v1091_v38 = vadd.f32 %v1090_v15, %v3167_v43  ;;  %1143 = vmatpush.msrb.mxu1 %v35_v0  ;;  %1612 = vmatpush.msrb.mxu3 %v35_v0 }
 0x1a5   :  { %v1013_v9 = vadd.f32 %v1012_v59, %v2905_v41  ;;  %v984_v21 = vadd.f32 %v983_v54, %v3152_v10  ;;  %v3426_v2 = vpop.f32.mrf.mxu3  ;;  %v5939_v54 = vld [vmem:[#allocation74_spill] sm:$0xff] }
 0x1a6   :  { %v1058_v29 = vadd.f32 %v1057_v5, %v3120_v33  ;;  %v1092_v24 = vadd.f32 %v1091_v38, %v3185_v28  ;;  %v5933_v5 = vld [vmem:[#allocation59_spill] sm:$0xff]  ;;  %v5934_v28 = vld [vmem:[#allocation70_spill] sm:$0xff]  ;;  %5937 = vst [vmem:[#allocation127_spill] sm:$0xff] %v3426_v2 }
 0x1a7   :  { %v1014_v8 = vadd.f32 %v1013_v9, %v2927_v48  ;;  %v985_v9 = vadd.f32 %v984_v21, %v5935_v58  ;;  %v5946_v33 = vld [vmem:[#allocation82_spill] sm:$0xff]  ;;  %v5999_v48 = vld [vmem:[#allocation105_spill] sm:$0xff] }
 0x1a8   :  { %v1059_v1 = vadd.f32 %v1058_v29, %v3144_v62  ;;  %v1093_v15 = vadd.f32 %v1092_v24, %v3204_v17  ;;  %v5938_v29 = vld [vmem:[#allocation63_spill] sm:$0xff]  ;;  %v5940_v17 = vld [vmem:[#allocation64_spill] sm:$0xff]  ;;  %v5945_v62 = vld [vmem:[#allocation37_spill] sm:$0xff] }
 0x1a9   :  { %v1015_v59 = vadd.f32 %v1014_v8, %v2954_v57  ;;  %v5987_v57 = vld [vmem:[#allocation81_spill] sm:$0xff] }
 0x1aa   :  { %v1060_v38 = vadd.f32 %v1059_v1, %v5933_v5  ;;  %v1094_v43 = vadd.f32 %v1093_v15, %v5934_v28  ;;  %v986_v1 = vadd.f32 %v985_v9, %v5940_v17  ;;  %v5942_v28 = vld [vmem:[#allocation67_spill] sm:$0xff]  ;;  %v5944_v5 = vld [vmem:[#allocation68_spill] sm:$0xff] }
 0x1ab   :  { %v1016_v19 = vadd.f32 %v1015_v59, %v5936_v31  ;;  %v5976_v31 = vld [vmem:[#allocation99_spill] sm:$0xff] }
 0x1ac   :  { %v1061_v24 = vadd.f32 %v1060_v38, %v5938_v29  ;;  %v1095_v8 = vadd.f32 %v1094_v43, %v5939_v54  ;;  %v987_v21 = vadd.f32 %v986_v1, %v5944_v5  ;;  %v5949_v29 = vld [vmem:[#allocation41_spill] sm:$0xff]  ;;  %v5950_v54 = vld [vmem:[#allocation87_spill] sm:$0xff] }
 0x1ad   :  { %v1017_v15 = vadd.f32 %v1016_v19, %v5941_v50  ;;  %v5973_v50 = vld [vmem:[#allocation96_spill] sm:$0xff] }
 0x1ae   :  { %v1062_v35 = vadd.f32 %v1061_v24, %v5942_v28  ;;  %v1096_v51 = vadd.f32 %v1095_v8, %v5943_v60  ;;  %v988_v38 = vadd.f32 %v987_v21, %v5948_v36  ;;  %v5953_v28 = vld [vmem:[#allocation45_spill] sm:$0xff]  ;;  %v5954_v60 = vld [vmem:[#allocation94_spill] sm:$0xff] }
 0x1af   :  { %v1018_v59 = vadd.f32 %v1017_v15, %v5945_v62  ;;  %v5959_v21 = vld [vmem:[#allocation98_spill] sm:$0xff]  ;;  %v5971_v62 = vld [vmem:[#allocation113_spill] sm:$0xff] }
 0x1b0   :  { %v1097_v3 = vadd.f32 %v1096_v51, %v5946_v33  ;;  %v1063_v0 = vadd.f32 %v1062_v35, %v5947_v53  ;;  %v989_v24 = vadd.f32 %v988_v38, %v5952_v7  ;;  %v5957_v33 = vld [vmem:[#allocation49_spill] sm:$0xff]  ;;  %v3448_v53 = vpop.f32.mrf.mxu3 }
 0x1b1   :  { %v1019_v43 = vadd.f32 %v1018_v59, %v5949_v29  ;;  %5958 = vst [vmem:[#allocation128_spill] sm:$0xff] %v3448_v53  ;;  %v5969_v29 = vld [vmem:[#allocation92_spill] sm:$0xff] }
 0x1b2   :  { %v1098_v9 = vadd.f32 %v1097_v3, %v5950_v54  ;;  %v1064_v19 = vadd.f32 %v1063_v0, %v5951_v22  ;;  %v990_v51 = vadd.f32 %v989_v24, %v5956_v52  ;;  %v34_v3 = vld [vmem:[%s5570_s4] sm:$0xff]  ;;  %v5960_v0 = vld [vmem:[#allocation83_spill] sm:$0xff]  ;;  %v5961_v54 = vld [vmem:[#allocation84_spill] sm:$0xff] }
 0x1b3   :  { %v1020_v8 = vadd.f32 %v1019_v43, %v5953_v28  ;;  %v5962_v22 = vld [vmem:[#allocation53_spill] sm:$0xff]  ;;  %1144 = vmatpush.msrb.mxu1 %v34_v3  ;;  %1613 = vmatpush.msrb.mxu3 %v34_v3 }
 0x1b4   :  { %v1099_v1 = vadd.f32 %v1098_v9, %v5954_v60  ;;  %v1065_v15 = vadd.f32 %v1064_v19, %v5955_v61  ;;  %v991_v43 = vadd.f32 %v990_v51, %v5961_v54  ;;  %v5963_v19 = vld [vmem:[#allocation102_spill] sm:$0xff]  ;;  %v5965_v61 = vld [vmem:[#allocation89_spill] sm:$0xff] }
 0x1b5   :  { %v1021_v35 = vadd.f32 %v1020_v8, %v5957_v33  ;;  %v5964_v60 = vld [vmem:[#allocation86_spill] sm:$0xff]  ;;  %v5968_v33 = vld [vmem:[#allocation91_spill] sm:$0xff] }
 0x1b6   :  { %v1100_v59 = vadd.f32 %v1099_v1, %v5959_v21  ;;  %v1066_v38 = vadd.f32 %v1065_v15, %v5960_v0  ;;  %v992_v44 = vadd.f32 %v991_v43, %v5965_v61  ;;  %v5967_v21 = vld [vmem:[#allocation107_spill] sm:$0xff]  ;;  %v5970_v0 = vld [vmem:[#allocation61_spill] sm:$0xff] }
 0x1b7   :  { %v1022_v9 = vadd.f32 %v1021_v35, %v5962_v22  ;;  %v5972_v22 = vld [vmem:[#allocation95_spill] sm:$0xff] }
 0x1b8   :  { %v1101_v24 = vadd.f32 %v1100_v59, %v5963_v19  ;;  %v1067_v8 = vadd.f32 %v1066_v38, %v5964_v60  ;;  %v993_v15 = vadd.f32 %v992_v44, %v5969_v29  ;;  %v5974_v19 = vld [vmem:[#allocation65_spill] sm:$0xff] }
 0x1b9   :  { %v1023_v1 = vadd.f32 %v1022_v9, %v5966_v37  ;;  %v5975_v60 = vld [vmem:[#allocation117_spill] sm:$0xff]  ;;  %v5977_v37 = vld [vmem:[#allocation100_spill] sm:$0xff] }
 0x1ba   :  { %v1102_v30 = vadd.f32 %v1101_v24, %v5967_v21  ;;  %v1068_v28 = vadd.f32 %v1067_v8, %v5968_v33  ;;  %v994_v59 = vadd.f32 %v993_v15, %v5973_v50  ;;  %v5978_v21 = vld [vmem:[#allocation69_spill] sm:$0xff]  ;;  %v3473_v33 = vpop.f32.mrf.mxu3 }
 0x1bb   :  { %v1024_v51 = vadd.f32 %v1023_v1, %v5970_v0  ;;  %5979 = vst [vmem:[#allocation129_spill] sm:$0xff] %v3473_v33  ;;  %v5980_v1 = vld [vmem:[#allocation103_spill] sm:$0xff] }
 0x1bc   :  { %v1103_v35 = vadd.f32 %v1102_v30, %v5971_v62  ;;  %v1069_v3 = vadd.f32 %v1068_v28, %v5972_v22  ;;  %v995_v24 = vadd.f32 %v994_v59, %v5977_v37  ;;  %v5981_v62 = vld [vmem:[#allocation104_spill] sm:$0xff]  ;;  %v5982_v22 = vld [vmem:[#allocation73_spill] sm:$0xff] }
 0x1bd   :  { %v1025_v38 = vadd.f32 %v1024_v51, %v5974_v19  ;;  %v5983_v19 = vld [vmem:[#allocation106_spill] sm:$0xff] }
 0x1be   :  { %v1104_v43 = vadd.f32 %v1103_v35, %v5975_v60  ;;  %v1070_v9 = vadd.f32 %v1069_v3, %v5976_v31  ;;  %v996_v28 = vadd.f32 %v995_v24, %v5981_v62  ;;  %v5984_v60 = vld [vmem:[#allocation108_spill] sm:$0xff]  ;;  %v5985_v31 = vld [vmem:[#allocation77_spill] sm:$0xff] }
 0x1bf   :  { %v1026_v8 = vadd.f32 %v1025_v38, %v5978_v21  ;;  %v5986_v21 = vld [vmem:[#allocation111_spill] sm:$0xff] }
 0x1c0   :  { %v1105_v44 = vadd.f32 %v1104_v43, %v3346_v45  ;;  %v1071_v30 = vadd.f32 %v1070_v9, %v5980_v1  ;;  %v997_v3 = vadd.f32 %v996_v28, %v5984_v60  ;;  %v5988_v45 = vld [vmem:[#allocation110_spill] sm:$0xff]  ;;  %v5996_v1 = vld [vmem:[#allocation93_spill] sm:$0xff] }
 0x1c1   :  { %v1027_v15 = vadd.f32 %v1026_v8, %v5982_v22  ;;  %v50_v8 = vld [vmem:[%s5571_s5] sm:$0xff] }
 0x1c2   :  { %v1106_v51 = vadd.f32 %v1105_v44, %v3367_v23  ;;  %v1072_v35 = vadd.f32 %v1071_v30, %v5983_v19  ;;  %v998_v0 = vadd.f32 %v997_v3, %v5986_v21  ;;  %v5989_v44 = vld [vmem:[#allocation115_spill] sm:$0xff]  ;;  %v5990_v23 = vld [vmem:[#allocation85_spill] sm:$0xff]  ;;  %1169 = vmatpush.msrb.mxu2 %v50_v8 }
 0x1c3   :  { %v1028_v59 = vadd.f32 %v1027_v15, %v5985_v31  ;;  %v5992_v3 = vld [vmem:[#allocation119_spill] sm:$0xff]  ;;  %v5998_v31 = vld [vmem:[#allocation101_spill] sm:$0xff] }
 0x1c4   :  { %v1107_v38 = vadd.f32 %v1106_v51, %v3395_v16  ;;  %v1073_v24 = vadd.f32 %v1072_v35, %v5988_v45  ;;  %v999_v30 = vadd.f32 %v998_v0, %v5989_v44  ;;  %v5991_v51 = vld [vmem:[#allocation88_spill] sm:$0xff]  ;;  %v5995_v45 = vld [vmem:[#allocation114_spill] sm:$0xff] }
 0x1c5   :  { %v1029_v43 = vadd.f32 %v1028_v59, %v5987_v57  ;;  %1647 = vmatpush.msra.mxu2 %v5991_v51  ;;  %v3496_v59 = vpop.f32.mrf.mxu3  ;;  %v5997_v57 = vld [vmem:[#allocation97_spill] sm:$0xff] }
 0x1c6   :  { %v1108_v9 = vadd.f32 %v1107_v38, %v3426_v2  ;;  %v1000_v16 = vadd.f32 %v999_v30, %v5992_v3  ;;  %5993 = vst [vmem:[#allocation88_spill] sm:$0xff] %v3496_v59  ;;  %v5994_v38 = vld [vmem:[#allocation90_spill] sm:$0xff]  ;;  %v1074_v19 = vadd.f32 %v1073_v24, %v5995_v45 }
 0x1c7   :  { %v1030_v28 = vadd.f32 %v1029_v43, %v5990_v23  ;;  %1648 = vmatpush.msra.mxu2 %v50_v8  ;;  %v6001_v8 = vld [vmem:[#allocation112_spill] sm:$0xff] }
 0x1c8   :  { %v1109_v15 = vadd.f32 %v1108_v9, %v3448_v53  ;;  %v1001_v23 = vrot.slane %v1000_v16, 4  ;;  %v1075_v53 = vrot.slane %v1074_v19, 4 }
 0x1c9   :  { %v1031_v2 = vadd.f32 %v1030_v28, %v5994_v38 }
 0x1ca   :  { %v1110_v35 = vadd.f32 %v1109_v15, %v3473_v33  ;;  %v1002_v22 = vadd.f32 %v1001_v23, %v1000_v16  ;;  %v1076_v28 = vadd.f32 %v1075_v53, %v1074_v19  ;;  %v6000_v15 = vld [vmem:[#allocation109_spill] sm:$0xff] }
 0x1cb   :  { %v1032_v0 = vadd.f32 %v1031_v2, %v5996_v1 }
 0x1cc   :  { %v1111_v43 = vadd.f32 %v1110_v35, %v3496_v59  ;;  %v1003_v24 = vrot.slane %v1002_v22, 2  ;;  %v1077_v2 = vrot.slane %v1076_v28, 2 }
 0x1cd   :  { %v1033_v9 = vadd.f32 %v1032_v0, %v5997_v57 }
 0x1ce   :  { %v1112_v51 = vrot.slane %v1111_v43, 4  ;;  %v1004_v59 = vadd.f32 %v1003_v24, %v1002_v22  ;;  %v1078_v0 = vadd.f32 %v1077_v2, %v1076_v28 }
 0x1cf   :  { %v1034_v30 = vadd.f32 %v1033_v9, %v5998_v31 }
 0x1d0   :  { %v1113_v38 = vadd.f32 %v1112_v51, %v1111_v43  ;;  %v1005_v20 = vrot.slane %v1004_v59, 1  ;;  %v1079_v23 = vrot.slane %v1078_v0, 1 }
 0x1d1   :  { %v1035_v41 = vadd.f32 %v1034_v30, %v5999_v48 }
 0x1d2   :  { %v1114_v1 = vrot.slane %v1113_v38, 2  ;;  %v1006_v53 = vadd.f32 %v1005_v20, %v1004_v59 }
 0x1d3   :  { %v1036_v33 = vadd.f32 %v1035_v41, %v6000_v15  ;;  %v1080_v41 = vadd.f32 %v1079_v23, %v1078_v0 }
 0x1d4   :  { %v1115_v57 = vadd.f32 %v1114_v1, %v1113_v38 }
 0x1d5   :  { %v1037_v45 = vadd.f32 %v1036_v33, %v6001_v8 }
 0x1d6   :  { %v1116_v16 = vrot.slane %v1115_v57, 1 }
 0x1d7   :  { %v1038_v35 = vrot.slane %v1037_v45, 4 }
 0x1d8   :  { %v1117_v33 = vadd.f32 %v1116_v16, %v1115_v57 }
 0x1d9   :  { %v1039_v34 = vadd.f32 %v1038_v35, %v1037_v45 }
 0x1db   :  { %v1040_v27 = vrot.slane %v1039_v34, 2 }
 0x1dd   :  { %v1041_v9 = vadd.f32 %v1040_v27, %v1039_v34 }
 0x1df   :  { %v1042_v30 = vrot.slane %v1041_v9, 1 }
 0x1e1   :  { %v1043_v19 = vadd.f32 %v1042_v30, %v1041_v9 }
 0x1e3   :  { %v1123_v43 = vsel %vm1122_vm2, %v1043_v19, %v1006_v53 }
 0x1e4   :  { %v1125_v22 = vsel %vm1124_vm3, %v1080_v41, %v1123_v43 }
 0x1e5   :  { %v1127_v45 = vsel %vm1126_vm4, %v1117_v33, %v1125_v22 }
 0x1e6   :  { %1145 = vmatmul.f32.vlgmr.msrb.gmra.mxu1 %v1127_v45 }
 0x263   :  { %v1146_v1 = vpop.f32.mrf.mxu1 }
 0x264   :  { %v1149_v27 = vmul.f32 0.00048828125, %v1146_v1 }
 0x266   :  { %2459 = vmatmul.msk.f32.vlgmr.msrb.gmra.mxu2 %vm1150_vm5, %v1149_v27 }
 0x2e9   :  { %v3512_v34 = vpop.f32.mrf.mxu2 }
 0x2ea   :  { %6002 = vst [vmem:[#allocation130_spill] sm:$0xff] %v3512_v34  ;;  %v1175_v20 = vrot.slane %v3512_v34, 1  ;;  %v1176_v59 = vrot.slane %v3512_v34, 2  ;;  %v1177_v57 = vrot.slane %v3512_v34, 3  ;;  %v1178_v38 = vperm.slane %v3512_v34, 0  ;;  %v6043_v34 = vld [vmem:[#allocation65_spill] sm:$0xff] }
 0x2ec   :  { %v3518_v51 = vperm.slane %v1175_v20, 0  ;;  %v3520_v28 = vperm.slane %v1176_v59, 0  ;;  %v3522_v24 = vperm.slane %v1177_v57, 0  ;;  %v3525_v2 = vsub.f32 %v2789_v4, %v1178_v38  ;;  %v6041_v4 = vld [vmem:[#allocation61_spill] sm:$0xff] }
 0x2ed   :  { %v3528_v35 = vsub.f32 %v2811_v11, %v1178_v38  ;;  %v3531_v0 = vsub.f32 %v2833_v18, %v1178_v38  ;;  %v3534_v9 = vsub.f32 %v2855_v25, %v1178_v38  ;;  %v3537_v23 = vsub.f32 %v2877_v32, %v1178_v38  ;;  %v6033_v32 = vld [vmem:[#allocation45_spill] sm:$0xff] }
 0x2ee   :  { %v3540_v16 = vsub.f32 %v2899_v39, %v1178_v38  ;;  %v3543_v30 = vsub.f32 %v2921_v46, %v1178_v38  ;;  %v3546_v53 = vsub.f32 %v2948_v55, %v1178_v38  ;;  %v3549_v19 = vsub.f32 %v2972_v63, %v1178_v38  ;;  %v6028_v63 = vld [vmem:[#allocation29_spill] sm:$0xff] }
 0x2ef   :  { %v3552_v41 = vsub.f32 %v2999_v12, %v1178_v38  ;;  %v3555_v33 = vsub.f32 %v3023_v26, %v1178_v38  ;;  %v3558_v43 = vsub.f32 %v3050_v42, %v1178_v38  ;;  %v3561_v22 = vsub.f32 %v3074_v56, %v1178_v38  ;;  %v6025_v42 = vld [vmem:[#allocation18_spill] sm:$0xff]  ;;  %v6026_v26 = vld [vmem:[#allocation21_spill] sm:$0xff] }
 0x2f0   :  { %v3564_v45 = vsub.f32 %v3101_v14, %v1178_v38  ;;  %v3567_v1 = vsub.f32 %v3125_v40, %v1178_v38  ;;  %v3570_v27 = vsub.f32 %v3152_v10, %v1178_v38  ;;  %v3573_v20 = vsub.f32 %v5935_v58, %v1178_v38  ;;  %v6027_v12 = vld [vmem:[#allocation25_spill] sm:$0xff] }
 0x2f1   :  { %v3576_v59 = vsub.f32 %v5940_v17, %v1178_v38  ;;  %v3579_v57 = vsub.f32 %v5944_v5, %v1178_v38  ;;  %v3582_v56 = vsub.f32 %v5948_v36, %v1178_v38  ;;  %v3585_v14 = vsub.f32 %v5952_v7, %v1178_v38  ;;  %v6029_v55 = vld [vmem:[#allocation33_spill] sm:$0xff] }
 0x2f2   :  { %6003 = vst [vmem:[#allocation131_spill] sm:$0xff] %v3564_v45  ;;  %v3588_v40 = vsub.f32 %v5956_v52, %v1178_v38  ;;  %v3591_v10 = vsub.f32 %v5961_v54, %v1178_v38  ;;  %v3594_v58 = vsub.f32 %v5965_v61, %v1178_v38  ;;  %v3597_v17 = vsub.f32 %v5969_v29, %v1178_v38  ;;  %v6030_v46 = vld [vmem:[#allocation37_spill] sm:$0xff]  ;;  %v6141_v45 = vld [vmem:[#allocation87_spill] sm:$0xff] }
 0x2f3   :  { %6004 = vst [vmem:[#allocation132_spill] sm:$0xff] %v3567_v1  ;;  %v3600_v5 = vsub.f32 %v5973_v50, %v1178_v38  ;;  %v3603_v36 = vsub.f32 %v5977_v37, %v1178_v38  ;;  %v3606_v7 = vsub.f32 %v5981_v62, %v1178_v38  ;;  %v3609_v52 = vsub.f32 %v5984_v60, %v1178_v38  ;;  %v6024_v37 = vld [vmem:[#allocation15_spill] sm:$0xff]  ;;  %v6031_v39 = vld [vmem:[#allocation41_spill] sm:$0xff]  ;;  %v6135_v1 = vld [vmem:[#allocation74_spill] sm:$0xff] }
 0x2f4   :  { %6005 = vst [vmem:[#allocation133_spill] sm:$0xff] %v3570_v27  ;;  %v3612_v54 = vsub.f32 %v5986_v21, %v1178_v38  ;;  %v3615_v61 = vsub.f32 %v5989_v44, %v1178_v38  ;;  %v3618_v29 = vsub.f32 %v5992_v3, %v1178_v38  ;;  %v3622_v50 = vsub.f32 %v3355_v49, %v3518_v51  ;;  %v6022_v44 = vld [vmem:[#allocation9_spill] sm:$0xff]  ;;  %v6023_v3 = vld [vmem:[#allocation12_spill] sm:$0xff]  ;;  %v6129_v27 = vld [vmem:[#allocation62_spill] sm:$0xff] }
 0x2f5   :  { %6006 = vst [vmem:[#allocation134_spill] sm:$0xff] %v3573_v20  ;;  %v3626_v62 = vsub.f32 %v3371_v47, %v3518_v51  ;;  %v3630_v60 = vsub.f32 %v2795_v6, %v3518_v51  ;;  %v3634_v21 = vsub.f32 %v2817_v13, %v3518_v51  ;;  %v3638_v38 = vsub.f32 %v6022_v44, %v3518_v51  ;;  %v6035_v25 = vld [vmem:[#allocation49_spill] sm:$0xff] }
 0x2f6   :  { %6007 = vst [vmem:[#allocation135_spill] sm:$0xff] %v3576_v59  ;;  %v3642_v49 = vsub.f32 %v6023_v3, %v3518_v51  ;;  %v3646_v47 = vsub.f32 %v6024_v37, %v3518_v51  ;;  %v3650_v6 = vsub.f32 %v6025_v42, %v3518_v51  ;;  %v3654_v13 = vsub.f32 %v6026_v26, %v3518_v51  ;;  %v6037_v18 = vld [vmem:[#allocation53_spill] sm:$0xff]  ;;  %v6097_v59 = vld [vmem:[#allocation79_spill] sm:$0xff] }
 0x2f7   :  { %6008 = vst [vmem:[#allocation136_spill] sm:$0xff] %v3579_v57  ;;  %v3658_v44 = vsub.f32 %v6027_v12, %v3518_v51  ;;  %v3662_v3 = vsub.f32 %v6028_v63, %v3518_v51  ;;  %v3666_v37 = vsub.f32 %v6029_v55, %v3518_v51  ;;  %v3670_v42 = vsub.f32 %v6030_v46, %v3518_v51  ;;  %v6039_v11 = vld [vmem:[#allocation57_spill] sm:$0xff]  ;;  %v6093_v57 = vld [vmem:[#allocation71_spill] sm:$0xff] }
 0x2f8   :  { %6009 = vst [vmem:[#allocation137_spill] sm:$0xff] %v3582_v56  ;;  %v3674_v26 = vsub.f32 %v6031_v39, %v3518_v51  ;;  %v3678_v12 = vsub.f32 %v6033_v32, %v3518_v51  ;;  %v3682_v63 = vsub.f32 %v6035_v25, %v3518_v51  ;;  %v3686_v55 = vsub.f32 %v6037_v18, %v3518_v51  ;;  %v6089_v56 = vld [vmem:[#allocation63_spill] sm:$0xff] }
 0x2f9   :  { %6010 = vst [vmem:[#allocation138_spill] sm:$0xff] %v3585_v14  ;;  %v3690_v46 = vsub.f32 %v6039_v11, %v3518_v51  ;;  %v3694_v39 = vsub.f32 %v6041_v4, %v3518_v51  ;;  %v3698_v32 = vsub.f32 %v6043_v34, %v3518_v51  ;;  %v6085_v14 = vld [vmem:[#allocation55_spill] sm:$0xff] }
 0x2fa   :  { %6011 = vst [vmem:[#allocation139_spill] sm:$0xff] %v3588_v40  ;;  %v6081_v40 = vld [vmem:[#allocation47_spill] sm:$0xff] }
 0x2fb   :  { %6012 = vst [vmem:[#allocation140_spill] sm:$0xff] %v3591_v10  ;;  %v6077_v10 = vld [vmem:[#allocation39_spill] sm:$0xff] }
 0x2fc   :  { %6013 = vst [vmem:[#allocation141_spill] sm:$0xff] %v3594_v58  ;;  %v6075_v58 = vld [vmem:[#allocation31_spill] sm:$0xff] }
 0x2fd   :  { %6014 = vst [vmem:[#allocation142_spill] sm:$0xff] %v3597_v17  ;;  %v6059_v17 = vld [vmem:[#allocation97_spill] sm:$0xff] }
 0x2fe   :  { %6015 = vst [vmem:[#allocation143_spill] sm:$0xff] %v3600_v5  ;;  %v6057_v5 = vld [vmem:[#allocation93_spill] sm:$0xff] }
 0x2ff   :  { %6016 = vst [vmem:[#allocation144_spill] sm:$0xff] %v3603_v36  ;;  %v6055_v36 = vld [vmem:[#allocation90_spill] sm:$0xff] }
 0x300   :  { %6017 = vst [vmem:[#allocation145_spill] sm:$0xff] %v3606_v7  ;;  %v6053_v7 = vld [vmem:[#allocation85_spill] sm:$0xff] }
 0x301   :  { %6018 = vst [vmem:[#allocation146_spill] sm:$0xff] %v3609_v52  ;;  %v6051_v52 = vld [vmem:[#allocation81_spill] sm:$0xff]  ;;  %v3718_v34 = vsub.f32 %v6053_v7, %v3518_v51  ;;  %v3738_v7 = vsub.f32 %v5999_v48, %v3518_v51  ;;  %v6068_v48 = vld [vmem:[#allocation7_spill] sm:$0xff] }
 0x302   :  { %6019 = vst [vmem:[#allocation147_spill] sm:$0xff] %v3612_v54  ;;  %v6049_v54 = vld [vmem:[#allocation77_spill] sm:$0xff]  ;;  %v3714_v4 = vsub.f32 %v6051_v52, %v3518_v51  ;;  %v3734_v52 = vsub.f32 %v5998_v31, %v3518_v51  ;;  %v6067_v31 = vld [vmem:[#allocation4_spill] sm:$0xff] }
 0x303   :  { %6020 = vst [vmem:[#allocation148_spill] sm:$0xff] %v3615_v61  ;;  %v6047_v61 = vld [vmem:[#allocation73_spill] sm:$0xff]  ;;  %v3710_v11 = vsub.f32 %v6049_v54, %v3518_v51  ;;  %v3730_v54 = vsub.f32 %v6059_v17, %v3518_v51 }
 0x304   :  { %6021 = vst [vmem:[#allocation149_spill] sm:$0xff] %v3618_v29  ;;  %v6045_v29 = vld [vmem:[#allocation69_spill] sm:$0xff]  ;;  %v3706_v18 = vsub.f32 %v6047_v61, %v3518_v51  ;;  %v3726_v61 = vsub.f32 %v6057_v5, %v3518_v51  ;;  %v3746_v5 = vsub.f32 %v6001_v8, %v3518_v51 }
 0x305   :  { %6032 = vst [vmem:[#allocation150_spill] sm:$0xff] %v3674_v26  ;;  %v3702_v25 = vsub.f32 %v6045_v29, %v3518_v51  ;;  %v3722_v29 = vsub.f32 %v6055_v36, %v3518_v51  ;;  %v3742_v36 = vsub.f32 %v6000_v15, %v3518_v51  ;;  %v6069_v15 = vld [vmem:[#allocation10_spill] sm:$0xff]  ;;  %v6070_v51 = vld [vmem:[#allocation13_spill] sm:$0xff] }
 0x306   :  { %6034 = vst [vmem:[#allocation151_spill] sm:$0xff] %v3678_v12  ;;  %v3766_v8 = vsub.f32 %v6070_v51, %v3520_v28  ;;  %v3786_v51 = vsub.f32 %v6075_v58, %v3520_v28  ;;  %v6133_v12 = vld [vmem:[#allocation70_spill] sm:$0xff] }
 0x307   :  { %6036 = vst [vmem:[#allocation152_spill] sm:$0xff] %v3682_v63  ;;  %v6128_v63 = vld [vmem:[#allocation58_spill] sm:$0xff] }
 0x308   :  { %6038 = vst [vmem:[#allocation153_spill] sm:$0xff] %v3686_v55  ;;  %v6121_v55 = vld [vmem:[#allocation30_spill] sm:$0xff] }
 0x309   :  { %6040 = vst [vmem:[#allocation154_spill] sm:$0xff] %v3690_v46  ;;  %v6095_v46 = vld [vmem:[#allocation75_spill] sm:$0xff]  ;;  %v6139_v26 = vld [vmem:[#allocation82_spill] sm:$0xff] }
 0x30a   :  { %6042 = vst [vmem:[#allocation155_spill] sm:$0xff] %v3694_v39  ;;  %v6091_v39 = vld [vmem:[#allocation67_spill] sm:$0xff] }
 0x30b   :  { %6044 = vst [vmem:[#allocation156_spill] sm:$0xff] %v3698_v32  ;;  %v6087_v32 = vld [vmem:[#allocation59_spill] sm:$0xff] }
 0x30c   :  { %6046 = vst [vmem:[#allocation157_spill] sm:$0xff] %v3702_v25  ;;  %v6083_v25 = vld [vmem:[#allocation51_spill] sm:$0xff] }
 0x30d   :  { %6048 = vst [vmem:[#allocation158_spill] sm:$0xff] %v3706_v18  ;;  %v6079_v18 = vld [vmem:[#allocation43_spill] sm:$0xff]  ;;  %v3806_v58 = vsub.f32 %v6083_v25, %v3520_v28  ;;  %v3826_v25 = vsub.f32 %v6093_v57, %v3520_v28 }
 0x30e   :  { %6050 = vst [vmem:[#allocation159_spill] sm:$0xff] %v3710_v11  ;;  %v6076_v11 = vld [vmem:[#allocation35_spill] sm:$0xff] }
 0x30f   :  { %6052 = vst [vmem:[#allocation160_spill] sm:$0xff] %v3714_v4  ;;  %v6074_v4 = vld [vmem:[#allocation27_spill] sm:$0xff] }
 0x310   :  { %6054 = vst [vmem:[#allocation161_spill] sm:$0xff] %v3718_v34  ;;  %v6073_v34 = vld [vmem:[#allocation23_spill] sm:$0xff] }
 0x311   :  { %6056 = vst [vmem:[#allocation162_spill] sm:$0xff] %v3722_v29 }
 0x312   :  { %6058 = vst [vmem:[#allocation163_spill] sm:$0xff] %v3726_v61  ;;  %v6065_v61 = vld [vmem:[#allocation116_spill] sm:$0xff] }
 0x313   :  { %6060 = vst [vmem:[#allocation164_spill] sm:$0xff] %v3730_v54  ;;  %v1250_v17 = vsub.f32 %v6065_v61, %v3520_v28  ;;  %v6066_v54 = vld [vmem:[#allocation120_spill] sm:$0xff] }
 0x314   :  { %6061 = vst [vmem:[#allocation165_spill] sm:$0xff] %v3734_v52  ;;  %v1251_v29 = vsub.f32 %v6066_v54, %v3520_v28  ;;  %v3754_v52 = vsub.f32 %v6067_v31, %v3520_v28  ;;  %v6071_v61 = vld [vmem:[#allocation16_spill] sm:$0xff]  ;;  %v6072_v54 = vld [vmem:[#allocation19_spill] sm:$0xff] }
 0x315   :  { %6062 = vst [vmem:[#allocation166_spill] sm:$0xff] %v3738_v7  ;;  %v3758_v7 = vsub.f32 %v6068_v48, %v3520_v28  ;;  %v3774_v31 = vsub.f32 %v6072_v54, %v3520_v28  ;;  %v3778_v48 = vsub.f32 %v6073_v34, %v3520_v28  ;;  %v3794_v54 = vsub.f32 %v6077_v10, %v3520_v28 }
 0x316   :  { %6063 = vst [vmem:[#allocation167_spill] sm:$0xff] %v3742_v36  ;;  %v3762_v36 = vsub.f32 %v6069_v15, %v3520_v28  ;;  %v3782_v15 = vsub.f32 %v6074_v4, %v3520_v28  ;;  %v3798_v34 = vsub.f32 %v6079_v18, %v3520_v28  ;;  %v3802_v4 = vsub.f32 %v6081_v40, %v3520_v28 }
 0x317   :  { %6064 = vst [vmem:[#allocation168_spill] sm:$0xff] %v3746_v5  ;;  %v3770_v5 = vsub.f32 %v6071_v61, %v3520_v28  ;;  %v3790_v61 = vsub.f32 %v6076_v11, %v3520_v28  ;;  %v3810_v11 = vsub.f32 %v6085_v14, %v3520_v28  ;;  %v3814_v10 = vsub.f32 %v6087_v32, %v3520_v28 }
 0x318   :  { %6078 = vst [vmem:[#allocation169_spill] sm:$0xff] %v3794_v54  ;;  %v3818_v18 = vsub.f32 %v6089_v56, %v3520_v28  ;;  %v3822_v40 = vsub.f32 %v6091_v39, %v3520_v28  ;;  %v3830_v14 = vsub.f32 %v6095_v46, %v3520_v28  ;;  %v3834_v32 = vsub.f32 %v6097_v59, %v3520_v28 }
 0x319   :  { %6080 = vst [vmem:[#allocation170_spill] sm:$0xff] %v3798_v34  ;;  %v6137_v34 = vld [vmem:[#allocation78_spill] sm:$0xff] }
 0x31a   :  { %6082 = vst [vmem:[#allocation171_spill] sm:$0xff] %v3802_v4  ;;  %v6131_v4 = vld [vmem:[#allocation66_spill] sm:$0xff] }
 0x31b   :  { %6084 = vst [vmem:[#allocation172_spill] sm:$0xff] %v3806_v58 }
 0x31c   :  { %6086 = vst [vmem:[#allocation173_spill] sm:$0xff] %v3810_v11 }
 0x31d   :  { %6088 = vst [vmem:[#allocation174_spill] sm:$0xff] %v3814_v10  ;;  %v6099_v10 = vld [vmem:[#allocation83_spill] sm:$0xff] }
 0x31e   :  { %6090 = vst [vmem:[#allocation175_spill] sm:$0xff] %v3818_v18  ;;  %v3838_v56 = vsub.f32 %v6099_v10, %v3520_v28  ;;  %v6101_v18 = vld [vmem:[#allocation86_spill] sm:$0xff] }
 0x31f   :  { %6092 = vst [vmem:[#allocation176_spill] sm:$0xff] %v3822_v40  ;;  %v3842_v39 = vsub.f32 %v6101_v18, %v3520_v28  ;;  %v6103_v40 = vld [vmem:[#allocation91_spill] sm:$0xff] }
 0x320   :  { %6094 = vst [vmem:[#allocation177_spill] sm:$0xff] %v3826_v25  ;;  %v3846_v57 = vsub.f32 %v6103_v40, %v3520_v28  ;;  %v6105_v25 = vld [vmem:[#allocation95_spill] sm:$0xff] }
 0x321   :  { %6096 = vst [vmem:[#allocation178_spill] sm:$0xff] %v3830_v14  ;;  %v3850_v46 = vsub.f32 %v6105_v25, %v3520_v28  ;;  %v6107_v14 = vld [vmem:[#allocation99_spill] sm:$0xff] }
 0x322   :  { %6098 = vst [vmem:[#allocation179_spill] sm:$0xff] %v3834_v32  ;;  %v3854_v59 = vsub.f32 %v6107_v14, %v3520_v28  ;;  %v6109_v32 = vld [vmem:[#allocation103_spill] sm:$0xff] }
 0x323   :  { %6100 = vst [vmem:[#allocation180_spill] sm:$0xff] %v3838_v56  ;;  %v3858_v10 = vsub.f32 %v6109_v32, %v3520_v28  ;;  %v6111_v56 = vld [vmem:[#allocation106_spill] sm:$0xff] }
 0x324   :  { %6102 = vst [vmem:[#allocation181_spill] sm:$0xff] %v3842_v39  ;;  %v3862_v18 = vsub.f32 %v6111_v56, %v3520_v28  ;;  %v6113_v39 = vld [vmem:[#allocation110_spill] sm:$0xff] }
 0x325   :  { %6104 = vst [vmem:[#allocation182_spill] sm:$0xff] %v3846_v57  ;;  %v3866_v40 = vsub.f32 %v6113_v39, %v3520_v28  ;;  %v6115_v57 = vld [vmem:[#allocation114_spill] sm:$0xff]  ;;  %v1286_v39 = vsub.f32 %v6121_v55, %v3522_v24 }
 0x326   :  { %6106 = vst [vmem:[#allocation183_spill] sm:$0xff] %v3850_v46  ;;  %v3870_v25 = vsub.f32 %v6115_v57, %v3520_v28  ;;  %v6117_v46 = vld [vmem:[#allocation118_spill] sm:$0xff] }
 0x327   :  { %6108 = vst [vmem:[#allocation184_spill] sm:$0xff] %v3854_v59  ;;  %v1282_v14 = vsub.f32 %v6117_v46, %v3522_v24  ;;  %v6118_v59 = vld [vmem:[#allocation122_spill] sm:$0xff] }
 0x328   :  { %6110 = vst [vmem:[#allocation185_spill] sm:$0xff] %v3858_v10  ;;  %v1283_v11 = vsub.f32 %v6118_v59, %v3522_v24  ;;  %v6119_v32 = vld [vmem:[#allocation22_spill] sm:$0xff] }
 0x329   :  { %6112 = vst [vmem:[#allocation186_spill] sm:$0xff] %v3862_v18  ;;  %v1284_v10 = vsub.f32 %v6119_v32, %v3522_v24  ;;  %v6120_v56 = vld [vmem:[#allocation26_spill] sm:$0xff] }
 0x32a   :  { %6114 = vst [vmem:[#allocation187_spill] sm:$0xff] %v3866_v40  ;;  %v1285_v18 = vsub.f32 %v6120_v56, %v3522_v24  ;;  %v6122_v40 = vld [vmem:[#allocation34_spill] sm:$0xff] }
 0x32b   :  { %6116 = vst [vmem:[#allocation188_spill] sm:$0xff] %v3870_v25  ;;  %v3884_v20 = vsub.f32 %v6122_v40, %v3522_v24  ;;  %v6123_v28 = vld [vmem:[#allocation38_spill] sm:$0xff] }
 0x32c   :  { %v3888_v57 = vsub.f32 %v6123_v28, %v3522_v24  ;;  %v6124_v46 = vld [vmem:[#allocation42_spill] sm:$0xff]  ;;  %v3908_v28 = vsub.f32 %v6128_v63, %v3522_v24  ;;  %v3928_v63 = vsub.f32 %v6137_v34, %v3522_v24 }
 0x32d   :  { %v3892_v59 = vsub.f32 %v6124_v46, %v3522_v24  ;;  %v6125_v32 = vld [vmem:[#allocation46_spill] sm:$0xff]  ;;  %v3912_v46 = vsub.f32 %v6129_v27, %v3522_v24  ;;  %v3932_v27 = vsub.f32 %v6139_v26, %v3522_v24 }
 0x32e   :  { %v3896_v25 = vsub.f32 %v6125_v32, %v3522_v24  ;;  %v6126_v56 = vld [vmem:[#allocation50_spill] sm:$0xff]  ;;  %v3916_v32 = vsub.f32 %v6131_v4, %v3522_v24  ;;  %6138 = vst [vmem:[#allocation193_spill] sm:$0xff] %v3928_v63  ;;  %v3936_v4 = vsub.f32 %v6141_v45, %v3522_v24  ;;  %v6149_v63 = vld [vmem:[#allocation107_spill] sm:$0xff] }
 0x32f   :  { %v3900_v58 = vsub.f32 %v6126_v56, %v3522_v24  ;;  %v6127_v55 = vld [vmem:[#allocation54_spill] sm:$0xff]  ;;  %6130 = vst [vmem:[#allocation189_spill] sm:$0xff] %v3912_v46  ;;  %v3920_v56 = vsub.f32 %v6133_v12, %v3522_v24  ;;  %v3952_v26 = vsub.f32 %v6149_v63, %v3522_v24  ;;  %v1410_v63 = vmul.f32 %v1282_v14, %v1282_v14 }
 0x330   :  { %v3904_v40 = vsub.f32 %v6127_v55, %v3522_v24  ;;  %6132 = vst [vmem:[#allocation190_spill] sm:$0xff] %v3916_v32  ;;  %v3924_v55 = vsub.f32 %v6135_v1, %v3522_v24  ;;  %v6143_v32 = vld [vmem:[#allocation94_spill] sm:$0xff] }
 0x331   :  { %6134 = vst [vmem:[#allocation191_spill] sm:$0xff] %v3920_v56  ;;  %v3940_v12 = vsub.f32 %v6143_v32, %v3522_v24  ;;  %v6145_v56 = vld [vmem:[#allocation98_spill] sm:$0xff]  ;;  %v1314_v32 = vmul.f32 %v3525_v2, %v3525_v2 }
 0x332   :  { %6136 = vst [vmem:[#allocation192_spill] sm:$0xff] %v3924_v55  ;;  %v3944_v1 = vsub.f32 %v6145_v56, %v3522_v24  ;;  %v6147_v55 = vld [vmem:[#allocation102_spill] sm:$0xff]  ;;  %v1346_v56 = vmul.f32 %v3622_v50, %v3622_v50 }
 0x333   :  { %6140 = vst [vmem:[#allocation194_spill] sm:$0xff] %v3932_v27  ;;  %v3948_v34 = vsub.f32 %v6147_v55, %v3522_v24  ;;  %v6151_v27 = vld [vmem:[#allocation113_spill] sm:$0xff]  ;;  %v1347_v55 = vmul.f32 %v3626_v62, %v3626_v62  ;;  %v6159_v50 = vld [vmem:[#allocation126_spill] sm:$0xff]  ;;  %v6161_v62 = vld [vmem:[#allocation127_spill] sm:$0xff] }
 0x334   :  { %6142 = vst [vmem:[#allocation195_spill] sm:$0xff] %v3936_v4  ;;  %v3956_v45 = vsub.f32 %v6151_v27, %v3522_v24  ;;  %v6153_v4 = vld [vmem:[#allocation117_spill] sm:$0xff]  ;;  %v3980_v54 = vsub.f32 %v6159_v50, %v3522_v24  ;;  %v3984_v14 = vsub.f32 %v6161_v62, %v3522_v24  ;;  %v1316_v50 = vmul.f32 %v3531_v0, %v3531_v0 }
 0x335   :  { %6144 = vst [vmem:[#allocation196_spill] sm:$0xff] %v3940_v12  ;;  %v1315_v12 = vmul.f32 %v3528_v35, %v3528_v35  ;;  %v3968_v27 = vsub.f32 %v6153_v4, %v3522_v24  ;;  %v6157_v35 = vld [vmem:[#allocation124_spill] sm:$0xff]  ;;  %v1380_v62 = vmul.f32 %v3754_v52, %v3754_v52  ;;  %v1381_v0 = vmul.f32 %v3758_v7, %v3758_v7 }
 0x336   :  { %6146 = vst [vmem:[#allocation197_spill] sm:$0xff] %v3944_v1  ;;  %v1379_v1 = vmul.f32 %v1251_v29, %v1251_v29  ;;  %v3976_v46 = vsub.f32 %v6157_v35, %v3522_v24  ;;  %v6165_v29 = vld [vmem:[#allocation129_spill] sm:$0xff]  ;;  %v6167_v4 = vld [vmem:[#allocation88_spill] sm:$0xff]  ;;  %v1350_v52 = vmul.f32 %v3638_v38, %v3638_v38  ;;  %v1383_v7 = vmul.f32 %v3766_v8, %v3766_v8 }
 0x337   :  { %6148 = vst [vmem:[#allocation198_spill] sm:$0xff] %v3948_v34  ;;  %v1378_v34 = vmul.f32 %v1250_v17, %v1250_v17  ;;  %v3996_v35 = vsub.f32 %v6167_v4, %v3522_v24  ;;  %v1416_v8 = vmul.f32 %v3888_v57, %v3888_v57  ;;  %v1322_v57 = vmul.f32 %v3549_v19, %v3549_v19 }
 0x338   :  { %6150 = vst [vmem:[#allocation199_spill] sm:$0xff] %v3952_v26  ;;  %v1411_v26 = vmul.f32 %v1283_v11, %v1283_v11  ;;  %v6163_v11 = vld [vmem:[#allocation128_spill] sm:$0xff]  ;;  %v1387_v19 = vmul.f32 %v3782_v15, %v3782_v15  ;;  %v1420_v15 = vmul.f32 %v3904_v40, %v3904_v40  ;;  %v1326_v40 = vmul.f32 %v3561_v22, %v3561_v22  ;;  %v6173_v22 = vld [vmem:[#allocation170_spill] sm:$0xff] }
 0x339   :  { %6152 = vst [vmem:[#allocation200_spill] sm:$0xff] %v3956_v45  ;;  %v6155_v45 = vld [vmem:[#allocation121_spill] sm:$0xff]  ;;  %v3988_v17 = vsub.f32 %v6163_v11, %v3522_v24  ;;  %v1412_v11 = vmul.f32 %v1284_v10, %v1284_v10 }
 0x33a   :  { %6154 = vst [vmem:[#allocation201_spill] sm:$0xff] %v3968_v27  ;;  %v3972_v2 = vsub.f32 %v6155_v45, %v3522_v24  ;;  %v3992_v45 = vsub.f32 %v6165_v29, %v3522_v24  ;;  %v1317_v29 = vmul.f32 %v3534_v9, %v3534_v9  ;;  %v1349_v24 = vmul.f32 %v3634_v21, %v3634_v21 }
 0x33b   :  { %6158 = vst [vmem:[#allocation203_spill] sm:$0xff] %v3976_v46  ;;  %v1516_v46 = vadd.f32 %v1379_v1, %v1378_v34  ;;  %v1415_v21 = vmul.f32 %v3884_v20, %v3884_v20  ;;  %v1352_v9 = vmul.f32 %v3646_v47, %v3646_v47  ;;  %v1353_v20 = vmul.f32 %v3650_v6, %v3650_v6 }
 0x33c   :  { %6156 = vst [vmem:[#allocation202_spill] sm:$0xff] %v3972_v2  ;;  %v1553_v2 = vadd.f32 %v1411_v26, %v1410_v63 }
 0x33d   :  { %6160 = vst [vmem:[#allocation204_spill] sm:$0xff] %v3980_v54  ;;  %v1348_v54 = vmul.f32 %v3630_v60, %v3630_v60 }
 0x33e   :  { %6162 = vst [vmem:[#allocation205_spill] sm:$0xff] %v3984_v14  ;;  %v1442_v14 = vadd.f32 %v1315_v12, %v1314_v32  ;;  %v1554_v27 = vadd.f32 %v1553_v2, %v1412_v11  ;;  %v1318_v32 = vmul.f32 %v3537_v23, %v3537_v23  ;;  %v1414_v12 = vmul.f32 %v1286_v39, %v1286_v39 }
 0x33f   :  { %6164 = vst [vmem:[#allocation206_spill] sm:$0xff] %v3988_v17  ;;  %v1479_v17 = vadd.f32 %v1347_v55, %v1346_v56  ;;  %v1382_v55 = vmul.f32 %v3762_v36, %v3762_v36  ;;  %v1320_v39 = vmul.f32 %v3543_v30, %v3543_v30  ;;  %v1384_v23 = vmul.f32 %v3770_v5, %v3770_v5 }
 0x340   :  { %6166 = vst [vmem:[#allocation207_spill] sm:$0xff] %v3992_v45  ;;  %v1443_v4 = vadd.f32 %v1442_v14, %v1316_v50  ;;  %v1517_v45 = vadd.f32 %v1516_v46, %v1380_v62  ;;  %v1351_v46 = vmul.f32 %v3642_v49, %v3642_v49  ;;  %v1385_v30 = vmul.f32 %v3774_v31, %v3774_v31 }
 0x341   :  { %6168 = vst [vmem:[#allocation208_spill] sm:$0xff] %v3996_v35  ;;  %v1413_v35 = vmul.f32 %v1285_v18, %v1285_v18  ;;  %v1480_v60 = vadd.f32 %v1479_v17, %v1348_v54  ;;  %v1319_v18 = vmul.f32 %v3540_v16, %v3540_v16  ;;  %v1417_v5 = vmul.f32 %v3892_v59, %v3892_v59 }
 0x342   :  { %v1444_v63 = vadd.f32 %v1443_v4, %v1317_v29  ;;  %v1518_v56 = vadd.f32 %v1517_v45, %v1381_v0  ;;  %v1354_v50 = vmul.f32 %v3654_v13, %v3654_v13  ;;  %v1418_v31 = vmul.f32 %v3896_v25, %v3896_v25 }
 0x343   :  { %v1481_v26 = vadd.f32 %v1480_v60, %v1349_v24  ;;  %v1555_v10 = vadd.f32 %v1554_v27, %v1413_v35  ;;  %v1321_v27 = vmul.f32 %v3546_v53, %v3546_v53  ;;  %v1386_v53 = vmul.f32 %v3778_v48, %v3778_v48 }
 0x344   :  { %v1445_v54 = vadd.f32 %v1444_v63, %v1318_v32  ;;  %v1519_v36 = vadd.f32 %v1518_v56, %v1382_v55  ;;  %v1323_v59 = vmul.f32 %v3552_v41, %v3552_v41  ;;  %v1355_v17 = vmul.f32 %v3658_v44, %v3658_v44 }
 0x345   :  { %v1482_v34 = vadd.f32 %v1481_v26, %v1350_v52  ;;  %v1556_v4 = vadd.f32 %v1555_v10, %v1414_v12  ;;  %v1419_v48 = vmul.f32 %v3900_v58, %v3900_v58  ;;  %v1324_v25 = vmul.f32 %v3555_v33, %v3555_v33 }
 0x346   :  { %v1446_v49 = vadd.f32 %v1445_v54, %v1319_v18  ;;  %v1520_v45 = vadd.f32 %v1519_v36, %v1383_v7  ;;  %v1356_v60 = vmul.f32 %v3662_v3, %v3662_v3  ;;  %v1388_v41 = vmul.f32 %v3786_v51, %v3786_v51  ;;  %v6172_v36 = vld [vmem:[#allocation150_spill] sm:$0xff] }
 0x347   :  { %v1483_v16 = vadd.f32 %v1482_v34, %v1351_v46  ;;  %v1557_v1 = vadd.f32 %v1556_v4, %v1415_v21  ;;  %v1325_v58 = vmul.f32 %v3558_v43, %v3558_v43  ;;  %v1357_v63 = vmul.f32 %v3666_v37, %v3666_v37  ;;  %v6169_v43 = vld [vmem:[#allocation169_spill] sm:$0xff] }
 0x348   :  { %v1447_v47 = vadd.f32 %v1446_v49, %v1320_v39  ;;  %v1521_v2 = vadd.f32 %v1520_v45, %v1384_v23  ;;  %v1389_v33 = vmul.f32 %v3790_v61, %v3790_v61  ;;  %v1421_v51 = vmul.f32 %v3908_v28, %v3908_v28  ;;  %v6170_v46 = vld [vmem:[#allocation189_spill] sm:$0xff]  ;;  %v6171_v28 = vld [vmem:[#allocation131_spill] sm:$0xff]  ;;  %v6175_v45 = vld [vmem:[#allocation132_spill] sm:$0xff] }
 0x349   :  { %v1484_v38 = vadd.f32 %v1483_v16, %v1352_v9  ;;  %v1558_v35 = vadd.f32 %v1557_v1, %v1416_v8  ;;  %v1358_v10 = vmul.f32 %v3670_v42, %v3670_v42  ;;  %v1390_v18 = vmul.f32 %v6169_v43, %v6169_v43  ;;  %v6174_v9 = vld [vmem:[#allocation190_spill] sm:$0xff] }
 0x34a   :  { %v1448_v6 = vadd.f32 %v1447_v47, %v1321_v27  ;;  %v1522_v14 = vadd.f32 %v1521_v2, %v1385_v30  ;;  %v1422_v61 = vmul.f32 %v6170_v46, %v6170_v46  ;;  %v1327_v34 = vmul.f32 %v6171_v28, %v6171_v28  ;;  %v6176_v27 = vld [vmem:[#allocation151_spill] sm:$0xff] }
 0x34b   :  { %v1485_v62 = vadd.f32 %v1484_v38, %v1353_v20  ;;  %v1559_v11 = vadd.f32 %v1558_v35, %v1417_v5  ;;  %v1359_v4 = vmul.f32 %v6172_v36, %v6172_v36  ;;  %v1391_v39 = vmul.f32 %v6173_v22, %v6173_v22  ;;  %v6177_v30 = vld [vmem:[#allocation171_spill] sm:$0xff] }
 0x34c   :  { %v1449_v13 = vadd.f32 %v1448_v6, %v1322_v57  ;;  %v1523_v24 = vadd.f32 %v1522_v14, %v1386_v53  ;;  %v1423_v23 = vmul.f32 %v6174_v9, %v6174_v9  ;;  %v1328_v1 = vmul.f32 %v6175_v45, %v6175_v45  ;;  %v6178_v38 = vld [vmem:[#allocation191_spill] sm:$0xff]  ;;  %v6179_v53 = vld [vmem:[#allocation133_spill] sm:$0xff]  ;;  %v6181_v14 = vld [vmem:[#allocation172_spill] sm:$0xff] }
 0x34d   :  { %v1486_v29 = vadd.f32 %v1485_v62, %v1354_v50  ;;  %v1560_v0 = vadd.f32 %v1559_v11, %v1418_v31  ;;  %v1360_v20 = vmul.f32 %v6176_v27, %v6176_v27  ;;  %v1392_v47 = vmul.f32 %v6177_v30, %v6177_v30  ;;  %v6180_v31 = vld [vmem:[#allocation152_spill] sm:$0xff]  ;;  %v6193_v28 = vld [vmem:[#allocation175_spill] sm:$0xff] }
 0x34e   :  { %v1450_v44 = vadd.f32 %v1449_v13, %v1323_v59  ;;  %v1524_v52 = vadd.f32 %v1523_v24, %v1387_v19  ;;  %v1424_v2 = vmul.f32 %v6178_v38, %v6178_v38  ;;  %v1329_v6 = vmul.f32 %v6179_v53, %v6179_v53  ;;  %v6183_v24 = vld [vmem:[#allocation134_spill] sm:$0xff]  ;;  %v6197_v45 = vld [vmem:[#allocation176_spill] sm:$0xff]  ;;  %v6201_v53 = vld [vmem:[#allocation177_spill] sm:$0xff] }
 0x34f   :  { %v1487_v32 = vadd.f32 %v1486_v29, %v1355_v17  ;;  %v1561_v55 = vadd.f32 %v1560_v0, %v1419_v48  ;;  %v1361_v62 = vmul.f32 %v6180_v31, %v6180_v31  ;;  %v1393_v11 = vmul.f32 %v6181_v14, %v6181_v14  ;;  %v6182_v17 = vld [vmem:[#allocation192_spill] sm:$0xff] }
 0x350   :  { %v1451_v3 = vadd.f32 %v1450_v44, %v1324_v25  ;;  %v1525_v26 = vadd.f32 %v1524_v52, %v1388_v41  ;;  %v1425_v19 = vmul.f32 %v6182_v17, %v6182_v17  ;;  %v1330_v0 = vmul.f32 %v6183_v24, %v6183_v24  ;;  %v6184_v25 = vld [vmem:[#allocation153_spill] sm:$0xff]  ;;  %v6205_v24 = vld [vmem:[#allocation178_spill] sm:$0xff] }
 0x351   :  { %v1488_v12 = vadd.f32 %v1487_v32, %v1356_v60  ;;  %v1562_v56 = vadd.f32 %v1561_v55, %v1420_v15  ;;  %v1362_v60 = vmul.f32 %v6184_v25, %v6184_v25  ;;  %v6185_v41 = vld [vmem:[#allocation173_spill] sm:$0xff] }
 0x352   :  { %v1452_v37 = vadd.f32 %v1451_v3, %v1325_v58  ;;  %v1526_v54 = vadd.f32 %v1525_v26, %v1389_v33  ;;  %v1394_v44 = vmul.f32 %v6185_v41, %v6185_v41  ;;  %v6186_v32 = vld [vmem:[#allocation193_spill] sm:$0xff]  ;;  %v6187_v33 = vld [vmem:[#allocation135_spill] sm:$0xff]  ;;  %v6189_v26 = vld [vmem:[#allocation174_spill] sm:$0xff] }
 0x353   :  { %v1489_v7 = vadd.f32 %v1488_v12, %v1357_v63  ;;  %v1563_v21 = vadd.f32 %v1562_v56, %v1421_v51  ;;  %v1426_v52 = vmul.f32 %v6186_v32, %v6186_v32  ;;  %v1331_v3 = vmul.f32 %v6187_v33, %v6187_v33  ;;  %v6188_v51 = vld [vmem:[#allocation154_spill] sm:$0xff]  ;;  %v6209_v33 = vld [vmem:[#allocation179_spill] sm:$0xff] }
 0x354   :  { %v1453_v42 = vadd.f32 %v1452_v37, %v1326_v40  ;;  %v1527_v8 = vadd.f32 %v1526_v54, %v1390_v18  ;;  %v1363_v12 = vmul.f32 %v6188_v51, %v6188_v51  ;;  %v1395_v56 = vmul.f32 %v6189_v26, %v6189_v26  ;;  %v6192_v54 = vld [vmem:[#allocation155_spill] sm:$0xff] }
 0x355   :  { %v1490_v49 = vadd.f32 %v1489_v7, %v1358_v10  ;;  %v1564_v16 = vadd.f32 %v1563_v21, %v1422_v61  ;;  %v6190_v10 = vld [vmem:[#allocation194_spill] sm:$0xff]  ;;  %v6191_v61 = vld [vmem:[#allocation136_spill] sm:$0xff]  ;;  %v1364_v21 = vmul.f32 %v6192_v54, %v6192_v54 }
 0x356   :  { %v1454_v5 = vadd.f32 %v1453_v42, %v1327_v34  ;;  %v1528_v57 = vadd.f32 %v1527_v8, %v1391_v39  ;;  %v1427_v43 = vmul.f32 %v6190_v10, %v6190_v10  ;;  %v1332_v7 = vmul.f32 %v6191_v61, %v6191_v61  ;;  %v6196_v8 = vld [vmem:[#allocation156_spill] sm:$0xff] }
 0x357   :  { %v1491_v35 = vadd.f32 %v1490_v49, %v1359_v4  ;;  %v1565_v50 = vadd.f32 %v1564_v16, %v1423_v23  ;;  %v1396_v34 = vmul.f32 %v6193_v28, %v6193_v28  ;;  %v6194_v4 = vld [vmem:[#allocation195_spill] sm:$0xff]  ;;  %v6195_v23 = vld [vmem:[#allocation137_spill] sm:$0xff]  ;;  %v1365_v16 = vmul.f32 %v6196_v8, %v6196_v8  ;;  %v6213_v61 = vld [vmem:[#allocation180_spill] sm:$0xff] }
 0x358   :  { %v1455_v59 = vadd.f32 %v1454_v5, %v1328_v1  ;;  %v1529_v48 = vadd.f32 %v1528_v57, %v1392_v47  ;;  %v1428_v22 = vmul.f32 %v6194_v4, %v6194_v4  ;;  %v1333_v49 = vmul.f32 %v6195_v23, %v6195_v23  ;;  %v6200_v57 = vld [vmem:[#allocation157_spill] sm:$0xff] }
 0x359   :  { %v1492_v13 = vadd.f32 %v1491_v35, %v1360_v20  ;;  %v1566_v29 = vadd.f32 %v1565_v50, %v1424_v2  ;;  %v1397_v1 = vmul.f32 %v6197_v45, %v6197_v45  ;;  %v6198_v20 = vld [vmem:[#allocation196_spill] sm:$0xff]  ;;  %v6199_v2 = vld [vmem:[#allocation138_spill] sm:$0xff]  ;;  %v1366_v50 = vmul.f32 %v6200_v57, %v6200_v57  ;;  %v6217_v23 = vld [vmem:[#allocation181_spill] sm:$0xff] }
 0x35a   :  { %v1456_v15 = vadd.f32 %v1455_v59, %v1329_v6  ;;  %v1530_v58 = vadd.f32 %v1529_v48, %v1393_v11  ;;  %v1429_v30 = vmul.f32 %v6198_v20, %v6198_v20  ;;  %v1334_v35 = vmul.f32 %v6199_v2, %v6199_v2  ;;  %v6204_v48 = vld [vmem:[#allocation158_spill] sm:$0xff] }
 0x35b   :  { %v1493_v55 = vadd.f32 %v1492_v13, %v1361_v62  ;;  %v1567_v63 = vadd.f32 %v1566_v29, %v1425_v19  ;;  %v1398_v6 = vmul.f32 %v6201_v53, %v6201_v53  ;;  %v6202_v62 = vld [vmem:[#allocation197_spill] sm:$0xff]  ;;  %v6203_v19 = vld [vmem:[#allocation139_spill] sm:$0xff]  ;;  %v1367_v29 = vmul.f32 %v6204_v48, %v6204_v48  ;;  %v6221_v2 = vld [vmem:[#allocation182_spill] sm:$0xff] }
 0x35c   :  { %v1457_v40 = vadd.f32 %v1456_v15, %v1330_v0  ;;  %v1531_v37 = vadd.f32 %v1530_v58, %v1394_v44  ;;  %v1430_v14 = vmul.f32 %v6202_v62, %v6202_v62  ;;  %v1335_v13 = vmul.f32 %v6203_v19, %v6203_v19  ;;  %v6208_v58 = vld [vmem:[#allocation159_spill] sm:$0xff] }
 0x35d   :  { %v1494_v18 = vadd.f32 %v1493_v55, %v1362_v60  ;;  %v1568_v46 = vadd.f32 %v1567_v63, %v1426_v52  ;;  %v1399_v0 = vmul.f32 %v6205_v24, %v6205_v24  ;;  %v6206_v60 = vld [vmem:[#allocation198_spill] sm:$0xff]  ;;  %v6207_v52 = vld [vmem:[#allocation140_spill] sm:$0xff]  ;;  %v1368_v63 = vmul.f32 %v6208_v58, %v6208_v58  ;;  %v6225_v19 = vld [vmem:[#allocation183_spill] sm:$0xff] }
 0x35e   :  { %v1458_v36 = vadd.f32 %v1457_v40, %v1331_v3  ;;  %v1532_v42 = vadd.f32 %v1531_v37, %v1395_v56  ;;  %v1431_v41 = vmul.f32 %v6206_v60, %v6206_v60  ;;  %v1336_v55 = vmul.f32 %v6207_v52, %v6207_v52  ;;  %v6212_v37 = vld [vmem:[#allocation160_spill] sm:$0xff] }
 0x35f   :  { %v1495_v39 = vadd.f32 %v1494_v18, %v1363_v12  ;;  %v1569_v9 = vadd.f32 %v1568_v46, %v1427_v43  ;;  %v1400_v3 = vmul.f32 %v6209_v33, %v6209_v33  ;;  %v6210_v12 = vld [vmem:[#allocation199_spill] sm:$0xff]  ;;  %v6211_v43 = vld [vmem:[#allocation141_spill] sm:$0xff]  ;;  %v1369_v46 = vmul.f32 %v6212_v37, %v6212_v37  ;;  %v6229_v52 = vld [vmem:[#allocation184_spill] sm:$0xff] }
 0x360   :  { %v1459_v27 = vadd.f32 %v1458_v36, %v1332_v7  ;;  %v1533_v5 = vadd.f32 %v1532_v42, %v1396_v34  ;;  %v1432_v26 = vmul.f32 %v6210_v12, %v6210_v12  ;;  %v1337_v18 = vmul.f32 %v6211_v43, %v6211_v43  ;;  %v6216_v42 = vld [vmem:[#allocation161_spill] sm:$0xff] }
 0x361   :  { %v1496_v47 = vadd.f32 %v1495_v39, %v1364_v21  ;;  %v1570_v38 = vadd.f32 %v1569_v9, %v1428_v22  ;;  %v1401_v7 = vmul.f32 %v6213_v61, %v6213_v61  ;;  %v6214_v21 = vld [vmem:[#allocation200_spill] sm:$0xff]  ;;  %v6215_v22 = vld [vmem:[#allocation142_spill] sm:$0xff]  ;;  %v1370_v9 = vmul.f32 %v6216_v42, %v6216_v42  ;;  %v6233_v43 = vld [vmem:[#allocation185_spill] sm:$0xff] }
 0x362   :  { %v1460_v31 = vadd.f32 %v1459_v27, %v1333_v49  ;;  %v1534_v17 = vadd.f32 %v1533_v5, %v1397_v1  ;;  %v1433_v28 = vmul.f32 %v6214_v21, %v6214_v21  ;;  %v1338_v39 = vmul.f32 %v6215_v22, %v6215_v22  ;;  %v6220_v5 = vld [vmem:[#allocation162_spill] sm:$0xff] }
 0x363   :  { %v1497_v11 = vadd.f32 %v1496_v47, %v1365_v16  ;;  %v1571_v59 = vadd.f32 %v1570_v38, %v1429_v30  ;;  %v1402_v49 = vmul.f32 %v6217_v23, %v6217_v23  ;;  %v6218_v16 = vld [vmem:[#allocation201_spill] sm:$0xff]  ;;  %v6219_v30 = vld [vmem:[#allocation143_spill] sm:$0xff]  ;;  %v1371_v38 = vmul.f32 %v6220_v5, %v6220_v5  ;;  %v6237_v22 = vld [vmem:[#allocation186_spill] sm:$0xff] }
 0x364   :  { %v1461_v25 = vadd.f32 %v1460_v31, %v1334_v35  ;;  %v1535_v32 = vadd.f32 %v1534_v17, %v1398_v6  ;;  %v1434_v45 = vmul.f32 %v6218_v16, %v6218_v16  ;;  %v1339_v47 = vmul.f32 %v6219_v30, %v6219_v30  ;;  %v6241_v30 = vld [vmem:[#allocation187_spill] sm:$0xff] }
 0x365   :  { %v1572_v44 = vadd.f32 %v1571_v59, %v1430_v14  ;;  %v1498_v15 = vadd.f32 %v1497_v11, %v1366_v50  ;;  %v1403_v35 = vmul.f32 %v6221_v2, %v6221_v2  ;;  %v6222_v50 = vld [vmem:[#allocation202_spill] sm:$0xff]  ;;  %v6223_v14 = vld [vmem:[#allocation144_spill] sm:$0xff]  ;;  %v6224_v59 = vld [vmem:[#allocation163_spill] sm:$0xff] }
 0x366   :  { %v1462_v51 = vadd.f32 %v1461_v25, %v1335_v13  ;;  %v1536_v10 = vadd.f32 %v1535_v32, %v1399_v0  ;;  %v1435_v53 = vmul.f32 %v6222_v50, %v6222_v50  ;;  %v1340_v11 = vmul.f32 %v6223_v14, %v6223_v14  ;;  %v6245_v14 = vld [vmem:[#allocation188_spill] sm:$0xff] }
 0x367   :  { %v1573_v56 = vadd.f32 %v1572_v44, %v1431_v41  ;;  %v1499_v40 = vadd.f32 %v1498_v15, %v1367_v29  ;;  %v1372_v17 = vmul.f32 %v6224_v59, %v6224_v59  ;;  %v1404_v13 = vmul.f32 %v6225_v19, %v6225_v19  ;;  %v6226_v29 = vld [vmem:[#allocation203_spill] sm:$0xff]  ;;  %v6227_v41 = vld [vmem:[#allocation145_spill] sm:$0xff]  ;;  %v6228_v15 = vld [vmem:[#allocation164_spill] sm:$0xff] }
 0x368   :  { %v1463_v54 = vadd.f32 %v1462_v51, %v1336_v55  ;;  %v1537_v4 = vadd.f32 %v1536_v10, %v1400_v3  ;;  %v1436_v24 = vmul.f32 %v6226_v29, %v6226_v29  ;;  %v1341_v44 = vmul.f32 %v6227_v41, %v6227_v41 }
 0x369   :  { %v1574_v34 = vadd.f32 %v1573_v56, %v1432_v26  ;;  %v1500_v36 = vadd.f32 %v1499_v40, %v1368_v63  ;;  %v1373_v32 = vmul.f32 %v6228_v15, %v6228_v15  ;;  %v1405_v55 = vmul.f32 %v6229_v52, %v6229_v52  ;;  %v6230_v63 = vld [vmem:[#allocation204_spill] sm:$0xff]  ;;  %v6231_v26 = vld [vmem:[#allocation146_spill] sm:$0xff]  ;;  %v6232_v40 = vld [vmem:[#allocation165_spill] sm:$0xff] }
 0x36a   :  { %v1464_v8 = vadd.f32 %v1463_v54, %v1337_v18  ;;  %v1538_v20 = vadd.f32 %v1537_v4, %v1401_v7  ;;  %v1437_v33 = vmul.f32 %v6230_v63, %v6230_v63  ;;  %v1342_v56 = vmul.f32 %v6231_v26, %v6231_v26 }
 0x36b   :  { %v1575_v1 = vadd.f32 %v1574_v34, %v1433_v28  ;;  %v1501_v27 = vadd.f32 %v1500_v36, %v1369_v46  ;;  %v1374_v10 = vmul.f32 %v6232_v40, %v6232_v40  ;;  %v1406_v18 = vmul.f32 %v6233_v43, %v6233_v43  ;;  %v6234_v46 = vld [vmem:[#allocation205_spill] sm:$0xff]  ;;  %v6235_v28 = vld [vmem:[#allocation147_spill] sm:$0xff]  ;;  %v6236_v36 = vld [vmem:[#allocation166_spill] sm:$0xff] }
 0x36c   :  { %v1465_v57 = vadd.f32 %v1464_v8, %v1338_v39  ;;  %v1539_v62 = vadd.f32 %v1538_v20, %v1402_v49  ;;  %v1438_v61 = vmul.f32 %v6234_v46, %v6234_v46  ;;  %v1343_v34 = vmul.f32 %v6235_v28, %v6235_v28 }
 0x36d   :  { %v1576_v6 = vadd.f32 %v1575_v1, %v1434_v45  ;;  %v1502_v31 = vadd.f32 %v1501_v27, %v1370_v9  ;;  %v1375_v4 = vmul.f32 %v6236_v36, %v6236_v36  ;;  %v1407_v39 = vmul.f32 %v6237_v22, %v6237_v22  ;;  %v6238_v9 = vld [vmem:[#allocation206_spill] sm:$0xff]  ;;  %v6239_v45 = vld [vmem:[#allocation148_spill] sm:$0xff]  ;;  %v6240_v27 = vld [vmem:[#allocation167_spill] sm:$0xff] }
 0x36e   :  { %v1466_v48 = vadd.f32 %v1465_v57, %v1339_v47  ;;  %v1540_v60 = vadd.f32 %v1539_v62, %v1403_v35  ;;  %v1439_v23 = vmul.f32 %v6238_v9, %v6238_v9  ;;  %v1344_v1 = vmul.f32 %v6239_v45, %v6239_v45 }
 0x36f   :  { %v1577_v0 = vadd.f32 %v1576_v6, %v1435_v53  ;;  %v1503_v25 = vadd.f32 %v1502_v31, %v1371_v38  ;;  %v1376_v20 = vmul.f32 %v6240_v27, %v6240_v27  ;;  %v1408_v47 = vmul.f32 %v6241_v30, %v6241_v30  ;;  %v6242_v38 = vld [vmem:[#allocation207_spill] sm:$0xff]  ;;  %v6243_v53 = vld [vmem:[#allocation149_spill] sm:$0xff]  ;;  %v6244_v31 = vld [vmem:[#allocation168_spill] sm:$0xff] }
 0x370   :  { %v1467_v58 = vadd.f32 %v1466_v48, %v1340_v11  ;;  %v1541_v12 = vadd.f32 %v1540_v60, %v1404_v13  ;;  %v1440_v2 = vmul.f32 %v6242_v38, %v6242_v38  ;;  %v1345_v6 = vmul.f32 %v6243_v53, %v6243_v53  ;;  %v2489_v38 = vld [vmem:[%s5573_s3] ss:$0 sm:$0xff] }
 0x371   :  { %v1578_v3 = vadd.f32 %v1577_v0, %v1436_v24  ;;  %v1504_v51 = vadd.f32 %v1503_v25, %v1372_v17  ;;  %v1377_v62 = vmul.f32 %v6244_v31, %v6244_v31  ;;  %v1409_v11 = vmul.f32 %v6245_v14, %v6245_v14  ;;  %v6246_v17 = vld [vmem:[#allocation208_spill] sm:$0xff] }
 0x372   :  { %v1468_v37 = vadd.f32 %v1467_v58, %v1341_v44  ;;  %v1542_v21 = vadd.f32 %v1541_v12, %v1405_v55  ;;  %v1441_v19 = vmul.f32 %v6246_v17, %v6246_v17  ;;  %v6253_v17 = vld [vmem:[#allocation7_spill] sm:$0xff] }
 0x373   :  { %v1579_v7 = vadd.f32 %v1578_v3, %v1437_v33  ;;  %v1505_v54 = vadd.f32 %v1504_v51, %v1373_v32 }
 0x374   :  { %v1469_v42 = vadd.f32 %v1468_v37, %v1342_v56  ;;  %v1543_v16 = vadd.f32 %v1542_v21, %v1406_v18 }
 0x375   :  { %v1580_v49 = vadd.f32 %v1579_v7, %v1438_v61  ;;  %v1506_v8 = vadd.f32 %v1505_v54, %v1374_v10 }
 0x376   :  { %v1470_v5 = vadd.f32 %v1469_v42, %v1343_v34  ;;  %v1544_v50 = vadd.f32 %v1543_v16, %v1407_v39 }
 0x377   :  { %v1581_v35 = vadd.f32 %v1580_v49, %v1439_v23  ;;  %v1507_v57 = vadd.f32 %v1506_v8, %v1375_v4 }
 0x378   :  { %v1471_v59 = vadd.f32 %v1470_v5, %v1344_v1  ;;  %v1545_v29 = vadd.f32 %v1544_v50, %v1408_v47  ;;  %v2488_v1 = vld [vmem:[%s5572_s2] ss:$0 sm:$0xff] }
 0x379   :  { %v1582_v13 = vadd.f32 %v1581_v35, %v1440_v2  ;;  %v1508_v48 = vadd.f32 %v1507_v57, %v1376_v20  ;;  %v6248_v47 = vld [vmem:[#allocation130_spill] sm:$0xff] }
 0x37a   :  { %v1472_v24 = vadd.f32 %v1471_v59, %v1345_v6  ;;  %v1546_v60 = vadd.f32 %v1545_v29, %v1409_v11  ;;  %v6250_v6 = vld [vmem:[#allocation116_spill] sm:$0xff]  ;;  %v6255_v29 = vld [vmem:[#allocation13_spill] sm:$0xff] }
 0x37b   :  { %v1583_v0 = vadd.f32 %v1582_v13, %v1441_v19  ;;  %v1509_v25 = vadd.f32 %v1508_v48, %v1377_v62  ;;  %v6251_v62 = vld [vmem:[#allocation120_spill] sm:$0xff]  ;;  %v6254_v13 = vld [vmem:[#allocation10_spill] sm:$0xff] }
 0x37c   :  { %v1473_v41 = vrot.slane %v1472_v24, 4  ;;  %v1547_v32 = vrot.slane %v1546_v60, 4  ;;  %v6252_v11 = vld [vmem:[#allocation4_spill] sm:$0xff] }
 0x37d   :  { %v1584_v44 = vrot.slane %v1583_v0, 4  ;;  %v1510_v15 = vrot.slane %v1509_v25, 4 }
 0x37e   :  { %v1474_v52 = vadd.f32 %v1473_v41, %v1472_v24  ;;  %v1548_v63 = vadd.f32 %v1547_v32, %v1546_v60  ;;  %v6257_v60 = vld [vmem:[#allocation19_spill] sm:$0xff] }
 0x37f   :  { %v1585_v55 = vadd.f32 %v1584_v44, %v1583_v0  ;;  %v1511_v58 = vadd.f32 %v1510_v15, %v1509_v25  ;;  %v6256_v0 = vld [vmem:[#allocation16_spill] sm:$0xff]  ;;  %v6258_v44 = vld [vmem:[#allocation23_spill] sm:$0xff] }
 0x380   :  { %v1475_v33 = vrot.slane %v1474_v52, 2  ;;  %v1549_v12 = vrot.slane %v1548_v63, 2  ;;  %v6259_v32 = vld [vmem:[#allocation27_spill] sm:$0xff] }
 0x381   :  { %v1586_v3 = vrot.slane %v1585_v55, 2  ;;  %v1512_v51 = vrot.slane %v1511_v58, 2 }
 0x382   :  { %v1476_v26 = vadd.f32 %v1475_v33, %v1474_v52  ;;  %v1550_v40 = vadd.f32 %v1549_v12, %v1548_v63  ;;  %v6261_v63 = vld [vmem:[#allocation35_spill] sm:$0xff] }
 0x383   :  { %v1513_v56 = vadd.f32 %v1512_v51, %v1511_v58  ;;  %v1587_v10 = vadd.f32 %v1586_v3, %v1585_v55  ;;  %v6260_v55 = vld [vmem:[#allocation31_spill] sm:$0xff] }
 0x384   :  { %v1477_v43 = vrot.slane %v1476_v26, 1  ;;  %v1551_v37 = vrot.slane %v1550_v40, 1  ;;  %v6262_v3 = vld [vmem:[#allocation39_spill] sm:$0xff] }
 0x385   :  { %v1514_v18 = vrot.slane %v1513_v56, 1  ;;  %v1588_v46 = vrot.slane %v1587_v10, 1  ;;  %v6263_v12 = vld [vmem:[#allocation43_spill] sm:$0xff] }
 0x386   :  { %v1478_v61 = vadd.f32 %v1477_v43, %v1476_v26  ;;  %v1552_v54 = vadd.f32 %v1551_v37, %v1550_v40 }
 0x387   :  { %v1515_v7 = vadd.f32 %v1514_v18, %v1513_v56  ;;  %v1589_v21 = vadd.f32 %v1588_v46, %v1587_v10  ;;  %v6264_v56 = vld [vmem:[#allocation47_spill] sm:$0xff] }
 0x388   :  { %v6265_v10 = vld [vmem:[#allocation51_spill] sm:$0xff] }
 0x389   :  { %v1594_v28 = vsel %vm1122_vm2, %v1515_v7, %v1478_v61  ;;  %v6266_v18 = vld [vmem:[#allocation55_spill] sm:$0xff] }
 0x38a   :  { %v1595_v34 = vsel %vm1124_vm3, %v1552_v54, %v1594_v28  ;;  %v6267_v46 = vld [vmem:[#allocation59_spill] sm:$0xff] }
 0x38b   :  { %v1596_v36 = vsel %vm1126_vm4, %v1589_v21, %v1595_v34  ;;  %v6268_v7 = vld [vmem:[#allocation63_spill] sm:$0xff] }
 0x38c   :  { %1614 = vmatmul.f32.vlgmr.msrb.gmra.mxu3 %v1596_v36  ;;  %v6269_v21 = vld [vmem:[#allocation67_spill] sm:$0xff] }
 0x38d   :  { %v6270_v34 = vld [vmem:[#allocation71_spill] sm:$0xff] }
 0x40f   :  { %v1615_v4 = vpop.f32.mrf.mxu3 }
 0x410   :  { %v1618_v22 = vmul.f32 0.00048828125, %v1615_v4  ;;  %v6271_v4 = vld [vmem:[#allocation75_spill] sm:$0xff] }
 0x412   :  { %v1619_v39 = vadd.f32 1e-05, %v1618_v22 }
 0x414   :  { %2490 = vrsqrt.f32 %v1619_v39  ;;  %vm1626_vm7 = vweird.f32 %v1619_v39 }
 0x41a   :  { %v2491_v42 = vpop.eup %2490 }
 0x41b   :  { %v1621_v9 = vmul.f32 %v2491_v42, %v1619_v39  ;;  %vm1627_vm6 = vweird.f32 %v2491_v42  ;;  %v6272_v39 = vld [vmem:[#allocation79_spill] sm:$0xff] }
 0x41c   :  { %vm1628_vm8 = vmor %vm1626_vm7, %vm1627_vm6 }
 0x41d   :  { %v1622_v23 = vmul.f32 %v2491_v42, %v1621_v9  ;;  %v6273_v9 = vld [vmem:[#allocation83_spill] sm:$0xff] }
 0x41f   :  { %v1623_v49 = vmul.f32 0.5, %v1622_v23 }
 0x421   :  { %v1624_v8 = vsub.f32 1.5, %v1623_v49  ;;  %v6274_v49 = vld [vmem:[#allocation86_spill] sm:$0xff] }
 0x423   :  { %v1625_v16 = vmul.f32 %v2491_v42, %v1624_v8 }
 0x425   :  { %v1629_v45 = vsel %vm1628_vm8, %v2491_v42, %v1625_v16  ;;  %v6275_v16 = vld [vmem:[#allocation91_spill] sm:$0xff] }
 0x426   :  { %2460 = vmatmul.msk.f32.vlgmr.msra.gmra.mxu2 %vm1150_vm5, %v1629_v45 }
 0x4a9   :  { %v1650_v27 = vpop.f32.mrf.mxu2 }
 0x4aa   :  { %v4239_v20 = vmul.f32 %v2488_v1, %v1650_v27  ;;  %v6276_v1 = vld [vmem:[#allocation95_spill] sm:$0xff] }
 0x4ac   :  { %6247 = vst [vmem:[#allocation169_spill] sm:$0xff] %v4239_v20  ;;  %v1664_v30 = vrot.slane %v4239_v20, 2  ;;  %v1657_v5 = vmul.f32 %v4239_v20, %v6248_v47  ;;  %v1665_v2 = vrot.slane %v4239_v20, 3  ;;  %v4249_v57 = vperm.slane %v4239_v20, 0 }
 0x4ae   :  { %v1668_v35 = vperm.slane %v1664_v30, 0  ;;  %6249 = vst [vmem:[#allocation189_spill] sm:$0xff] %v4249_v57  ;;  %v4251_v50 = vsub.f32 %v2489_v38, %v1657_v5  ;;  %v4253_v53 = vperm.slane %v1665_v2, 0  ;;  %v6277_v30 = vld [vmem:[#allocation99_spill] sm:$0xff]  ;;  %v6279_v2 = vld [vmem:[#allocation106_spill] sm:$0xff] }
 0x4af   :  { %v6278_v5 = vld [vmem:[#allocation103_spill] sm:$0xff] }
 0x4b0   :  { %v4256_v31 = vmul.f32 %v1668_v35, %v6250_v6  ;;  %v4259_v14 = vmul.f32 %v1668_v35, %v6251_v62  ;;  %v4262_v59 = vmul.f32 %v1668_v35, %v6252_v11  ;;  %v4265_v19 = vmul.f32 %v1668_v35, %v6253_v17  ;;  %v6280_v62 = vld [vmem:[#allocation110_spill] sm:$0xff] }
 0x4b1   :  { %v4268_v48 = vmul.f32 %v1668_v35, %v6254_v13  ;;  %v4271_v24 = vmul.f32 %v1668_v35, %v6255_v29  ;;  %v4274_v25 = vmul.f32 %v1668_v35, %v6256_v0  ;;  %v4277_v41 = vmul.f32 %v1668_v35, %v6257_v60  ;;  %v6281_v17 = vld [vmem:[#allocation114_spill] sm:$0xff] }
 0x4b2   :  { %v4280_v15 = vmul.f32 %v1668_v35, %v6258_v44  ;;  %v4283_v52 = vmul.f32 %v1668_v35, %v6259_v32  ;;  %v4286_v58 = vmul.f32 %v1668_v35, %v6260_v55  ;;  %v4289_v33 = vmul.f32 %v1668_v35, %v6261_v63  ;;  %v6282_v29 = vld [vmem:[#allocation118_spill] sm:$0xff] }
 0x4b3   :  { %v4292_v51 = vmul.f32 %v1668_v35, %v6262_v3  ;;  %v4295_v26 = vmul.f32 %v1668_v35, %v6263_v12  ;;  %v4298_v40 = vmul.f32 %v1668_v35, %v6264_v56  ;;  %v4301_v43 = vmul.f32 %v1668_v35, %v6265_v10  ;;  %v6283_v60 = vld [vmem:[#allocation122_spill] sm:$0xff] }
 0x4b4   :  { %v4304_v37 = vmul.f32 %v1668_v35, %v6266_v18  ;;  %v4307_v61 = vmul.f32 %v1668_v35, %v6267_v46  ;;  %v4310_v54 = vmul.f32 %v1668_v35, %v6268_v7  ;;  %v4313_v28 = vmul.f32 %v1668_v35, %v6269_v21  ;;  %v6284_v32 = vld [vmem:[#allocation22_spill] sm:$0xff] }
 0x4b5   :  { %v4316_v36 = vmul.f32 %v1668_v35, %v6270_v34  ;;  %v4319_v22 = vmul.f32 %v1668_v35, %v6271_v4  ;;  %v4322_v42 = vmul.f32 %v1668_v35, %v6272_v39  ;;  %v4325_v23 = vmul.f32 %v1668_v35, %v6273_v9  ;;  %v6285_v63 = vld [vmem:[#allocation26_spill] sm:$0xff] }
 0x4b6   :  { %v4328_v8 = vmul.f32 %v1668_v35, %v6274_v49  ;;  %v4331_v45 = vmul.f32 %v1668_v35, %v6275_v16  ;;  %v4334_v27 = vmul.f32 %v1668_v35, %v6276_v1  ;;  %v4337_v47 = vmul.f32 %v1668_v35, %v6277_v30  ;;  %v6286_v12 = vld [vmem:[#allocation30_spill] sm:$0xff] }
 0x4b7   :  { %v4340_v38 = vmul.f32 %v1668_v35, %v6278_v5  ;;  %v4343_v6 = vmul.f32 %v1668_v35, %v6279_v2  ;;  %v4346_v11 = vmul.f32 %v1668_v35, %v6280_v62  ;;  %v4349_v13 = vmul.f32 %v1668_v35, %v6281_v17  ;;  %v6287_v10 = vld [vmem:[#allocation34_spill] sm:$0xff] }
 0x4b8   :  { %v4353_v0 = vmul.f32 %v4253_v53, %v6282_v29  ;;  %v4357_v44 = vmul.f32 %v4253_v53, %v6283_v60  ;;  %v4361_v55 = vmul.f32 %v4253_v53, %v6284_v32  ;;  %v4365_v3 = vmul.f32 %v4253_v53, %v6285_v63  ;;  %v6288_v46 = vld [vmem:[#allocation38_spill] sm:$0xff] }
 0x4b9   :  { %v4369_v35 = vmul.f32 %v4253_v53, %v6286_v12  ;;  %v1804_v56 = vrot.slane %v4251_v50, 2  ;;  %v4374_v18 = vmul.f32 %v4253_v53, %v6287_v10  ;;  %v4378_v7 = vmul.f32 %v4253_v53, %v6288_v46  ;;  %v6289_v21 = vld [vmem:[#allocation42_spill] sm:$0xff] }
 0x4ba   :  { %v4382_v34 = vmul.f32 %v4253_v53, %v6289_v21  ;;  %v6290_v4 = vld [vmem:[#allocation46_spill] sm:$0xff] }
 0x4bb   :  { %v4386_v39 = vmul.f32 %v4253_v53, %v6290_v4  ;;  %v6291_v9 = vld [vmem:[#allocation50_spill] sm:$0xff] }
 0x4bc   :  { %v4390_v49 = vmul.f32 %v4253_v53, %v6291_v9  ;;  %v6292_v16 = vld [vmem:[#allocation54_spill] sm:$0xff]  ;;  %v6301_v9 = vld [vmem:[#allocation87_spill] sm:$0xff] }
 0x4bd   :  { %v4394_v1 = vmul.f32 %v4253_v53, %v6292_v16  ;;  %v6293_v30 = vld [vmem:[#allocation58_spill] sm:$0xff]  ;;  %v4426_v16 = vmul.f32 %v4253_v53, %v6301_v9  ;;  %v6311_v9 = vld [vmem:[#allocation113_spill] sm:$0xff] }
 0x4be   :  { %v4398_v5 = vmul.f32 %v4253_v53, %v6293_v30  ;;  %v6294_v2 = vld [vmem:[#allocation62_spill] sm:$0xff]  ;;  %v1805_v30 = vrot.slane %v4251_v50, 3 }
 0x4bf   :  { %v4402_v62 = vmul.f32 %v4253_v53, %v6294_v2  ;;  %v6295_v17 = vld [vmem:[#allocation66_spill] sm:$0xff]  ;;  %6302 = vst [vmem:[#allocation150_spill] sm:$0xff] %v4426_v16  ;;  %v1808_v2 = vperm.slane %v1804_v56, 0  ;;  %v4447_v16 = vmul.f32 %v4253_v53, %v6311_v9  ;;  %v6313_v56 = vld [vmem:[#allocation117_spill] sm:$0xff] }
 0x4c0   :  { %v4406_v29 = vmul.f32 %v4253_v53, %v6295_v17  ;;  %v6296_v60 = vld [vmem:[#allocation70_spill] sm:$0xff] }
 0x4c1   :  { %v4410_v32 = vmul.f32 %v4253_v53, %v6296_v60  ;;  %v6297_v63 = vld [vmem:[#allocation74_spill] sm:$0xff]  ;;  %6312 = vst [vmem:[#allocation171_spill] sm:$0xff] %v4447_v16  ;;  %v6322_v16 = vld [vmem:[#allocation128_spill] sm:$0xff] }
 0x4c2   :  { %v4414_v12 = vmul.f32 %v4253_v53, %v6297_v63  ;;  %v6298_v10 = vld [vmem:[#allocation78_spill] sm:$0xff] }
 0x4c3   :  { %v4418_v46 = vmul.f32 %v4253_v53, %v6298_v10  ;;  %v6299_v21 = vld [vmem:[#allocation82_spill] sm:$0xff] }
 0x4c4   :  { %v4422_v4 = vmul.f32 %v4253_v53, %v6299_v21  ;;  %v6303_v17 = vld [vmem:[#allocation94_spill] sm:$0xff]  ;;  %v6309_v21 = vld [vmem:[#allocation107_spill] sm:$0xff] }
 0x4c5   :  { %v4431_v60 = vmul.f32 %v4253_v53, %v6303_v17  ;;  %v6305_v63 = vld [vmem:[#allocation98_spill] sm:$0xff]  ;;  %v4451_v17 = vmul.f32 %v4253_v53, %v6313_v56  ;;  %v4471_v56 = vmul.f32 %v4253_v53, %v6322_v16  ;;  %v4493_v16 = vadd.f32 %v1808_v2, %v4262_v59 }
 0x4c6   :  { %6300 = vst [vmem:[#allocation131_spill] sm:$0xff] %v4422_v4  ;;  %v4435_v20 = vmul.f32 %v4253_v53, %v6305_v63  ;;  %v6307_v10 = vld [vmem:[#allocation102_spill] sm:$0xff]  ;;  %v4443_v4 = vmul.f32 %v4253_v53, %v6309_v21  ;;  %v4514_v59 = vadd.f32 %v1808_v2, %v4283_v52  ;;  %v4535_v52 = vadd.f32 %v1808_v2, %v4304_v37 }
 0x4c7   :  { %6304 = vst [vmem:[#allocation170_spill] sm:$0xff] %v4431_v60  ;;  %v4439_v57 = vmul.f32 %v4253_v53, %v6307_v10  ;;  %v6315_v60 = vld [vmem:[#allocation121_spill] sm:$0xff]  ;;  %v4556_v37 = vadd.f32 %v1808_v2, %v4325_v23  ;;  %v4577_v23 = vadd.f32 %v1808_v2, %v4346_v11 }
 0x4c8   :  { %6306 = vst [vmem:[#allocation190_spill] sm:$0xff] %v4435_v20  ;;  %v4455_v63 = vmul.f32 %v4253_v53, %v6315_v60  ;;  %v6317_v20 = vld [vmem:[#allocation124_spill] sm:$0xff] }
 0x4c9   :  { %6308 = vst [vmem:[#allocation132_spill] sm:$0xff] %v4439_v57  ;;  %v4459_v10 = vmul.f32 %v4253_v53, %v6317_v20  ;;  %v6319_v57 = vld [vmem:[#allocation126_spill] sm:$0xff] }
 0x4ca   :  { %6310 = vst [vmem:[#allocation151_spill] sm:$0xff] %v4443_v4  ;;  %v4463_v21 = vmul.f32 %v4253_v53, %v6319_v57  ;;  %v6320_v4 = vld [vmem:[#allocation127_spill] sm:$0xff]  ;;  %v4484_v57 = vperm.slane %v1805_v30, 0  ;;  %v4505_v30 = vadd.f32 %v1808_v2, %v4274_v25  ;;  %v4526_v25 = vadd.f32 %v1808_v2, %v4295_v26 }
 0x4cb   :  { %6314 = vst [vmem:[#allocation191_spill] sm:$0xff] %v4451_v17  ;;  %v4467_v9 = vmul.f32 %v4253_v53, %v6320_v4  ;;  %v6323_v17 = vld [vmem:[#allocation129_spill] sm:$0xff]  ;;  %v4487_v4 = vadd.f32 %v1808_v2, %v4256_v31  ;;  %v4508_v31 = vadd.f32 %v1808_v2, %v4277_v41  ;;  %v4529_v41 = vadd.f32 %v1808_v2, %v4298_v40 }
 0x4cc   :  { %6316 = vst [vmem:[#allocation133_spill] sm:$0xff] %v4455_v63  ;;  %v4475_v60 = vmul.f32 %v4253_v53, %v6323_v17  ;;  %v6324_v63 = vld [vmem:[#allocation88_spill] sm:$0xff]  ;;  %v4496_v17 = vadd.f32 %v1808_v2, %v4265_v19  ;;  %v4517_v19 = vadd.f32 %v1808_v2, %v4286_v58  ;;  %v4538_v58 = vadd.f32 %v1808_v2, %v4307_v61 }
 0x4cd   :  { %6318 = vst [vmem:[#allocation152_spill] sm:$0xff] %v4459_v10  ;;  %v4479_v20 = vmul.f32 %v4253_v53, %v6324_v63  ;;  %v4482_v10 = vperm.slane %v4251_v50, 0  ;;  %v4499_v53 = vadd.f32 %v1808_v2, %v4268_v48  ;;  %v4502_v63 = vadd.f32 %v1808_v2, %v4271_v24 }
 0x4ce   :  { %6321 = vst [vmem:[#allocation172_spill] sm:$0xff] %v4467_v9  ;;  %v4490_v9 = vadd.f32 %v1808_v2, %v4259_v14  ;;  %v4511_v14 = vadd.f32 %v1808_v2, %v4280_v15  ;;  %v4520_v48 = vadd.f32 %v1808_v2, %v4289_v33  ;;  %v4523_v24 = vadd.f32 %v1808_v2, %v4292_v51 }
 0x4cf   :  { %v4532_v15 = vadd.f32 %v1808_v2, %v4301_v43  ;;  %v4541_v33 = vadd.f32 %v1808_v2, %v4310_v54  ;;  %v4544_v51 = vadd.f32 %v1808_v2, %v4313_v28  ;;  %v4547_v26 = vadd.f32 %v1808_v2, %v4316_v36  ;;  %6328 = vst [vmem:[#allocation173_spill] sm:$0xff] %v4577_v23 }
 0x4d0   :  { %v4550_v40 = vadd.f32 %v1808_v2, %v4319_v22  ;;  %v4553_v43 = vadd.f32 %v1808_v2, %v4322_v42  ;;  %v4559_v61 = vadd.f32 %v1808_v2, %v4328_v8  ;;  %v4562_v54 = vadd.f32 %v1808_v2, %v4331_v45 }
 0x4d1   :  { %v4565_v28 = vadd.f32 %v1808_v2, %v4334_v27  ;;  %v4568_v36 = vadd.f32 %v1808_v2, %v4337_v47  ;;  %v4571_v22 = vadd.f32 %v1808_v2, %v4340_v38  ;;  %v4574_v42 = vadd.f32 %v1808_v2, %v4343_v6 }
 0x4d2   :  { %v4580_v8 = vadd.f32 %v1808_v2, %v4349_v13  ;;  %v4584_v45 = vadd.f32 %v4484_v57, %v4353_v0  ;;  %v4588_v27 = vadd.f32 %v4484_v57, %v4357_v44  ;;  %v4592_v47 = vadd.f32 %v4484_v57, %v4361_v55  ;;  %v6351_v2 = vld [vmem:[#allocation170_spill] sm:$0xff] }
 0x4d3   :  { %6325 = vst [vmem:[#allocation192_spill] sm:$0xff] %v4568_v36  ;;  %v4596_v38 = vadd.f32 %v4484_v57, %v4365_v3  ;;  %v4600_v6 = vadd.f32 %v4484_v57, %v4369_v35  ;;  %v4604_v11 = vadd.f32 %v4484_v57, %v4374_v18  ;;  %v4608_v13 = vadd.f32 %v4484_v57, %v4378_v7  ;;  %v6392_v36 = vld [vmem:[#allocation64_spill] sm:$0xff] }
 0x4d4   :  { %6326 = vst [vmem:[#allocation134_spill] sm:$0xff] %v4571_v22  ;;  %v4612_v0 = vadd.f32 %v4484_v57, %v4382_v34  ;;  %v4616_v44 = vadd.f32 %v4484_v57, %v4386_v39  ;;  %v4620_v55 = vadd.f32 %v4484_v57, %v4390_v49  ;;  %v4624_v3 = vadd.f32 %v4484_v57, %v4394_v1  ;;  %v6347_v1 = vld [vmem:[#allocation131_spill] sm:$0xff]  ;;  %v6391_v22 = vld [vmem:[#allocation60_spill] sm:$0xff] }
 0x4d5   :  { %6327 = vst [vmem:[#allocation153_spill] sm:$0xff] %v4574_v42  ;;  %v4628_v35 = vadd.f32 %v4484_v57, %v4398_v5  ;;  %v4632_v18 = vadd.f32 %v4484_v57, %v4402_v62  ;;  %v4636_v7 = vadd.f32 %v4484_v57, %v4406_v29  ;;  %v4640_v34 = vadd.f32 %v4484_v57, %v4410_v32  ;;  %v6349_v62 = vld [vmem:[#allocation150_spill] sm:$0xff] }
 0x4d6   :  { %6329 = vst [vmem:[#allocation193_spill] sm:$0xff] %v4580_v8  ;;  %v4644_v39 = vadd.f32 %v4484_v57, %v4414_v12  ;;  %v4648_v49 = vadd.f32 %v4484_v57, %v4418_v46  ;;  %v4652_v5 = vadd.f32 %v4484_v57, %v6347_v1  ;;  %v4656_v29 = vadd.f32 %v4484_v57, %v6349_v62  ;;  %v6390_v8 = vld [vmem:[#allocation56_spill] sm:$0xff] }
 0x4d7   :  { %6330 = vst [vmem:[#allocation135_spill] sm:$0xff] %v4584_v45  ;;  %v4660_v32 = vadd.f32 %v4484_v57, %v6351_v2 }
 0x4d8   :  { %6331 = vst [vmem:[#allocation154_spill] sm:$0xff] %v4588_v27 }
 0x4d9   :  { %6332 = vst [vmem:[#allocation174_spill] sm:$0xff] %v4592_v47 }
 0x4da   :  { %6333 = vst [vmem:[#allocation194_spill] sm:$0xff] %v4596_v38 }
 0x4db   :  { %6334 = vst [vmem:[#allocation136_spill] sm:$0xff] %v4600_v6 }
 0x4dc   :  { %6335 = vst [vmem:[#allocation155_spill] sm:$0xff] %v4604_v11 }
 0x4dd   :  { %6336 = vst [vmem:[#allocation175_spill] sm:$0xff] %v4608_v13 }
 0x4de   :  { %6337 = vst [vmem:[#allocation195_spill] sm:$0xff] %v4612_v0  ;;  %v6386_v0 = vld [vmem:[#allocation40_spill] sm:$0xff] }
 0x4df   :  { %6338 = vst [vmem:[#allocation137_spill] sm:$0xff] %v4616_v44 }
 0x4e0   :  { %6339 = vst [vmem:[#allocation156_spill] sm:$0xff] %v4620_v55 }
 0x4e1   :  { %6340 = vst [vmem:[#allocation176_spill] sm:$0xff] %v4624_v3 }
 0x4e2   :  { %6341 = vst [vmem:[#allocation196_spill] sm:$0xff] %v4628_v35 }
 0x4e3   :  { %6342 = vst [vmem:[#allocation138_spill] sm:$0xff] %v4632_v18 }
 0x4e4   :  { %6343 = vst [vmem:[#allocation157_spill] sm:$0xff] %v4636_v7 }
 0x4e5   :  { %6344 = vst [vmem:[#allocation177_spill] sm:$0xff] %v4640_v34  ;;  %v6353_v34 = vld [vmem:[#allocation190_spill] sm:$0xff] }
 0x4e6   :  { %6345 = vst [vmem:[#allocation197_spill] sm:$0xff] %v4644_v39  ;;  %v4664_v12 = vadd.f32 %v4484_v57, %v6353_v34  ;;  %v6355_v39 = vld [vmem:[#allocation132_spill] sm:$0xff] }
 0x4e7   :  { %6346 = vst [vmem:[#allocation139_spill] sm:$0xff] %v4648_v49  ;;  %v4668_v46 = vadd.f32 %v4484_v57, %v6355_v39  ;;  %v6357_v49 = vld [vmem:[#allocation151_spill] sm:$0xff] }
 0x4e8   :  { %6348 = vst [vmem:[#allocation158_spill] sm:$0xff] %v4652_v5  ;;  %v4672_v1 = vadd.f32 %v4484_v57, %v6357_v49  ;;  %v6359_v5 = vld [vmem:[#allocation171_spill] sm:$0xff]  ;;  %v4692_v49 = vadd.f32 %v4484_v57, %v4463_v21 }
 0x4e9   :  { %6350 = vst [vmem:[#allocation178_spill] sm:$0xff] %v4656_v29  ;;  %v4676_v62 = vadd.f32 %v4484_v57, %v6359_v5  ;;  %v6361_v29 = vld [vmem:[#allocation191_spill] sm:$0xff] }
 0x4ea   :  { %6352 = vst [vmem:[#allocation198_spill] sm:$0xff] %v4660_v32  ;;  %v4680_v2 = vadd.f32 %v4484_v57, %v6361_v29  ;;  %v6363_v32 = vld [vmem:[#allocation133_spill] sm:$0xff]  ;;  %v4700_v29 = vadd.f32 %v4484_v57, %v4471_v56 }
 0x4eb   :  { %6354 = vst [vmem:[#allocation140_spill] sm:$0xff] %v4664_v12  ;;  %v4684_v34 = vadd.f32 %v4484_v57, %v6363_v32  ;;  %v6365_v12 = vld [vmem:[#allocation152_spill] sm:$0xff]  ;;  %v4704_v32 = vadd.f32 %v4484_v57, %v4475_v60  ;;  %v6375_v56 = vld [vmem:[#allocation5_spill] sm:$0xff] }
 0x4ec   :  { %6356 = vst [vmem:[#allocation159_spill] sm:$0xff] %v4668_v46  ;;  %v4688_v39 = vadd.f32 %v4484_v57, %v6365_v12  ;;  %v4708_v12 = vadd.f32 %v4484_v57, %v4479_v20  ;;  %v6376_v60 = vld [vmem:[#allocation8_spill] sm:$0xff] }
 0x4ed   :  { %6358 = vst [vmem:[#allocation179_spill] sm:$0xff] %v4672_v1  ;;  %v6368_v1 = vld [vmem:[#allocation172_spill] sm:$0xff] }
 0x4ee   :  { %6360 = vst [vmem:[#allocation199_spill] sm:$0xff] %v4676_v62  ;;  %v4696_v5 = vadd.f32 %v4484_v57, %v6368_v1  ;;  %v6380_v62 = vld [vmem:[#allocation17_spill] sm:$0xff]  ;;  %v6381_v46 = vld [vmem:[#allocation20_spill] sm:$0xff] }
 0x4ef   :  { %6362 = vst [vmem:[#allocation141_spill] sm:$0xff] %v4680_v2 }
 0x4f0   :  { %6364 = vst [vmem:[#allocation160_spill] sm:$0xff] %v4684_v34  ;;  %v6374_v34 = vld [vmem:[#allocation189_spill] sm:$0xff] }
 0x4f1   :  { %6366 = vst [vmem:[#allocation180_spill] sm:$0xff] %v4688_v39  ;;  %v6373_v39 = vld [vmem:[#allocation2_spill] sm:$0xff] }
 0x4f2   :  { %6367 = vst [vmem:[#allocation200_spill] sm:$0xff] %v4692_v49  ;;  %v1674_v21 = vmul.f32 %v6374_v34, %v6373_v39  ;;  %v6378_v39 = vld [vmem:[#allocation169_spill] sm:$0xff] }
 0x4f3   :  { %6369 = vst [vmem:[#allocation142_spill] sm:$0xff] %v4696_v5  ;;  %v6377_v5 = vld [vmem:[#allocation11_spill] sm:$0xff] }
 0x4f4   :  { %6370 = vst [vmem:[#allocation161_spill] sm:$0xff] %v4700_v29  ;;  %v1814_v49 = vadd.f32 %v4482_v10, %v1674_v21  ;;  %v1675_v29 = vmul.f32 %v6374_v34, %v6375_v56  ;;  %v1677_v20 = vmul.f32 %v6374_v34, %v6377_v5  ;;  %v6379_v21 = vld [vmem:[#allocation14_spill] sm:$0xff]  ;;  %v6382_v5 = vld [vmem:[#allocation24_spill] sm:$0xff] }
 0x4f5   :  { %6371 = vst [vmem:[#allocation181_spill] sm:$0xff] %v4704_v32  ;;  %v1676_v32 = vmul.f32 %v6374_v34, %v6376_v60  ;;  %v1680_v60 = vmul.f32 %v6374_v34, %v6381_v46  ;;  %v6385_v46 = vld [vmem:[#allocation36_spill] sm:$0xff] }
 0x4f6   :  { %6372 = vst [vmem:[#allocation201_spill] sm:$0xff] %v4708_v12  ;;  %v1942_v2 = vmul.f32 0.2, %v1814_v49  ;;  %v1815_v57 = vadd.f32 %v4482_v10, %v1675_v29  ;;  %v1663_v12 = vrot.slane %v6378_v39, 1  ;;  %v1817_v56 = vadd.f32 %v4482_v10, %v1677_v20  ;;  %v6384_v20 = vld [vmem:[#allocation32_spill] sm:$0xff] }
 0x4f7   :  { %v1681_v29 = vmul.f32 %v6374_v34, %v6382_v5  ;;  %v1683_v55 = vmul.f32 %v6374_v34, %v6384_v20 }
 0x4f8   :  { %v2070_v1 = vmax.f32 %v1814_v49, %v1942_v2  ;;  %v1678_v2 = vmul.f32 %v6374_v34, %v6379_v21  ;;  %v1816_v49 = vadd.f32 %v4482_v10, %v1676_v32  ;;  %v1943_v18 = vmul.f32 0.2, %v1815_v57  ;;  %v6383_v21 = vld [vmem:[#allocation28_spill] sm:$0xff] }
 0x4f9   :  { %v4736_v35 = vperm.slane %v1663_v12, 0  ;;  %v1682_v32 = vmul.f32 %v6374_v34, %v6383_v21  ;;  %v1821_v44 = vadd.f32 %v4482_v10, %v1681_v29  ;;  %v1945_v5 = vmul.f32 0.2, %v1817_v56  ;;  %v6387_v12 = vld [vmem:[#allocation44_spill] sm:$0xff] }
 0x4fa   :  { %2198 = vst [vmem:[%s5574_s6] sm:$0xff] %v2070_v1  ;;  %v1679_v1 = vmul.f32 %v6374_v34, %v6380_v62  ;;  %v1818_v7 = vadd.f32 %v4482_v10, %v1678_v2  ;;  %v1820_v62 = vadd.f32 %v4482_v10, %v1680_v60  ;;  %v1944_v3 = vmul.f32 0.2, %v1816_v49  ;;  %v6388_v60 = vld [vmem:[#allocation48_spill] sm:$0xff] }
 0x4fb   :  { %v1684_v2 = vmul.f32 %v6374_v34, %v6385_v46  ;;  %v1686_v13 = vmul.f32 %v6374_v34, %v6387_v12  ;;  %v1822_v21 = vadd.f32 %v4482_v10, %v1682_v32  ;;  %v1687_v6 = vmul.f32 %v6374_v34, %v6388_v60  ;;  %v6389_v46 = vld [vmem:[#allocation52_spill] sm:$0xff] }
 0x4fc   :  { %v1819_v39 = vadd.f32 %v4482_v10, %v1679_v1  ;;  %v1685_v1 = vmul.f32 %v6374_v34, %v6386_v0  ;;  %v1946_v11 = vmul.f32 0.2, %v1818_v7  ;;  %v1823_v20 = vadd.f32 %v4482_v10, %v1683_v55 }
 0x4fd   :  { %v2071_v47 = vmax.f32 %v1815_v57, %v1943_v18  ;;  %v1688_v29 = vmul.f32 %v6374_v34, %v6389_v46  ;;  %v1824_v27 = vadd.f32 %v4482_v10, %v1684_v2  ;;  %v1948_v45 = vmul.f32 0.2, %v1820_v62 }
 0x4fe   :  { %v1947_v38 = vmul.f32 0.2, %v1819_v39  ;;  %v2072_v0 = vmax.f32 %v1816_v49, %v1944_v3  ;;  %v1689_v12 = vmul.f32 %v6374_v34, %v6390_v8  ;;  %v1825_v32 = vadd.f32 %v4482_v10, %v1685_v1  ;;  %v6393_v8 = vld [vmem:[#allocation68_spill] sm:$0xff] }
 0x4ff   :  { %v1949_v23 = vmul.f32 0.2, %v1821_v44  ;;  %v2073_v42 = vmax.f32 %v1817_v56, %v1945_v5  ;;  %v1690_v60 = vmul.f32 %v6374_v34, %v6391_v22  ;;  %v1826_v55 = vadd.f32 %v4482_v10, %v1686_v13  ;;  %2199 = vst [vmem:[%s5574_s6 + $0x8] sm:$0xff] %v2071_v47 }
 0x500   :  { %v1950_v18 = vmul.f32 0.2, %v1822_v21  ;;  %v2074_v57 = vmax.f32 %v1818_v7, %v1946_v11  ;;  %v1691_v46 = vmul.f32 %v6374_v34, %v6392_v36  ;;  %v4766_v2 = vadd.f32 %v4482_v10, %v1687_v6  ;;  %2200 = vst [vmem:[%s5574_s6 + $0x10] sm:$0xff] %v2072_v0  ;;  %v6394_v36 = vld [vmem:[#allocation72_spill] sm:$0xff] }
 0x501   :  { %v1951_v3 = vmul.f32 0.2, %v1823_v20  ;;  %v2075_v49 = vmax.f32 %v1819_v39, %v1947_v38  ;;  %v1692_v56 = vmul.f32 %v6374_v34, %v6393_v8  ;;  %v4774_v22 = vadd.f32 %v4482_v10, %v1688_v29  ;;  %2201 = vst [vmem:[%s5574_s6 + $0x18] sm:$0xff] %v2073_v42  ;;  %v6395_v39 = vld [vmem:[#allocation76_spill] sm:$0xff] }
 0x502   :  { %v1952_v13 = vmul.f32 0.2, %v1824_v27  ;;  %v2076_v11 = vmax.f32 %v1820_v62, %v1948_v45  ;;  %v1693_v6 = vmul.f32 %v6374_v34, %v6394_v36  ;;  %v4782_v38 = vadd.f32 %v4482_v10, %v1689_v12  ;;  %2202 = vst [vmem:[%s5574_s6 + $0x20] sm:$0xff] %v2074_v57  ;;  %v6396_v29 = vld [vmem:[#allocation80_spill] sm:$0xff] }
 0x503   :  { %v1953_v7 = vmul.f32 0.2, %v1825_v32  ;;  %v2077_v47 = vmax.f32 %v1821_v44, %v1949_v23  ;;  %v1694_v5 = vmul.f32 %v6374_v34, %v6395_v39  ;;  %v4790_v45 = vadd.f32 %v4482_v10, %v1690_v60  ;;  %2203 = vst [vmem:[%s5574_s6 + $0x28] sm:$0xff] %v2075_v49  ;;  %v6397_v12 = vld [vmem:[#allocation84_spill] sm:$0xff] }
 0x504   :  { %v1954_v62 = vmul.f32 0.2, %v1826_v55  ;;  %v2078_v1 = vmax.f32 %v1822_v21, %v1950_v18  ;;  %v1695_v0 = vmul.f32 %v6374_v34, %v6396_v29  ;;  %v4798_v23 = vadd.f32 %v4482_v10, %v1691_v46  ;;  %2204 = vst [vmem:[%s5574_s6 + $0x30] sm:$0xff] %v2076_v11  ;;  %v6398_v46 = vld [vmem:[#allocation89_spill] sm:$0xff] }
 0x505   :  { %v1955_v42 = vmul.f32 0.2, %v4766_v2  ;;  %v2079_v44 = vmax.f32 %v1823_v20, %v1951_v3  ;;  %v1696_v21 = vmul.f32 %v6374_v34, %v6397_v12  ;;  %v4807_v60 = vadd.f32 %v4482_v10, %v1692_v56  ;;  %2205 = vst [vmem:[%s5574_s6 + $0x38] sm:$0xff] %v2077_v47  ;;  %v6399_v56 = vld [vmem:[#allocation92_spill] sm:$0xff] }
 0x506   :  { %v1956_v18 = vmul.f32 0.2, %v4774_v22  ;;  %v2080_v57 = vmax.f32 %v1824_v27, %v1952_v13  ;;  %v1697_v20 = vmul.f32 %v6374_v34, %v6398_v46  ;;  %v4816_v3 = vadd.f32 %v4482_v10, %v1693_v6  ;;  %2206 = vst [vmem:[%s5574_s6 + $0x40] sm:$0xff] %v2078_v1  ;;  %v6400_v6 = vld [vmem:[#allocation96_spill] sm:$0xff] }
 0x507   :  { %v1957_v49 = vmul.f32 0.2, %v4782_v38  ;;  %v2081_v8 = vmax.f32 %v1825_v32, %v1953_v7  ;;  %v1698_v27 = vmul.f32 %v6374_v34, %v6399_v56  ;;  %v4825_v13 = vadd.f32 %v4482_v10, %v1694_v5  ;;  %2207 = vst [vmem:[%s5574_s6 + $0x48] sm:$0xff] %v2079_v44  ;;  %v6401_v5 = vld [vmem:[#allocation100_spill] sm:$0xff] }
 0x508   :  { %v1958_v11 = vmul.f32 0.2, %v4790_v45  ;;  %v2082_v36 = vmax.f32 %v1826_v55, %v1954_v62  ;;  %v1699_v32 = vmul.f32 %v6374_v34, %v6400_v6  ;;  %v4834_v7 = vadd.f32 %v4482_v10, %v1695_v0  ;;  %2208 = vst [vmem:[%s5574_s6 + $0x50] sm:$0xff] %v2080_v57  ;;  %v6402_v0 = vld [vmem:[#allocation104_spill] sm:$0xff] }
 0x509   :  { %v1959_v47 = vmul.f32 0.2, %v4798_v23  ;;  %v2083_v39 = vmax.f32 %v4766_v2, %v1955_v42  ;;  %v1700_v55 = vmul.f32 %v6374_v34, %v6401_v5  ;;  %v4844_v62 = vadd.f32 %v4482_v10, %v1696_v21  ;;  %2209 = vst [vmem:[%s5574_s6 + $0x58] sm:$0xff] %v2081_v8  ;;  %v6403_v46 = vld [vmem:[#allocation108_spill] sm:$0xff]  ;;  %v6404_v8 = vld [vmem:[#allocation111_spill] sm:$0xff] }
 0x50a   :  { %v1960_v1 = vmul.f32 0.2, %v4807_v60  ;;  %v2084_v29 = vmax.f32 %v4774_v22, %v1956_v18  ;;  %v1701_v2 = vmul.f32 %v6374_v34, %v6402_v0  ;;  %v4854_v42 = vadd.f32 %v4482_v10, %v1697_v20  ;;  %2210 = vst [vmem:[%s5574_s6 + $0x60] sm:$0xff] %v2082_v36  ;;  %v6405_v36 = vld [vmem:[#allocation115_spill] sm:$0xff] }
 0x50b   :  { %v1961_v44 = vmul.f32 0.2, %v4816_v3  ;;  %v2085_v12 = vmax.f32 %v4782_v38, %v1957_v49  ;;  %v1803_v22 = vrot.slane %v4251_v50, 1  ;;  %v4863_v21 = vadd.f32 %v4482_v10, %v1698_v27  ;;  %2211 = vst [vmem:[%s5574_s6 + $0x68] sm:$0xff] %v2083_v39 }
 0x50c   :  { %v1962_v18 = vmul.f32 0.2, %v4825_v13  ;;  %v2086_v57 = vmax.f32 %v4790_v45, %v1958_v11  ;;  %v1702_v38 = vmul.f32 %v6374_v34, %v6403_v46  ;;  %v4873_v20 = vadd.f32 %v4482_v10, %v1699_v32  ;;  %2212 = vst [vmem:[%s5574_s6 + $0x70] sm:$0xff] %v2084_v29 }
 0x50d   :  { %v1963_v49 = vmul.f32 0.2, %v4834_v7  ;;  %v2087_v50 = vmax.f32 %v4798_v23, %v1959_v47  ;;  %v1703_v45 = vmul.f32 %v6374_v34, %v6404_v8  ;;  %v4883_v56 = vadd.f32 %v4482_v10, %v1700_v55  ;;  %2213 = vst [vmem:[%s5574_s6 + $0x78] sm:$0xff] %v2085_v12 }
 0x50e   :  { %v1964_v27 = vmul.f32 0.2, %v4844_v62  ;;  %v2088_v11 = vmax.f32 %v4807_v60, %v1960_v1  ;;  %v1704_v23 = vmul.f32 %v6374_v34, %v6405_v36  ;;  %v4893_v6 = vadd.f32 %v4482_v10, %v1701_v2  ;;  %2214 = vst [vmem:[%s5574_s6 + $0x80] sm:$0xff] %v2086_v57  ;;  %v6406_v1 = vld [vmem:[#allocation119_spill] sm:$0xff] }
 0x50f   :  { %v1965_v32 = vmul.f32 0.2, %v4854_v42  ;;  %v2089_v47 = vmax.f32 %v4816_v3, %v1961_v44  ;;  %v4900_v39 = vperm.slane %v1803_v22, 0  ;;  %v4903_v60 = vadd.f32 %v4482_v10, %v1702_v38  ;;  %2215 = vst [vmem:[%s5574_s6 + $0x88] sm:$0xff] %v2087_v50  ;;  %v6407_v44 = vld [vmem:[#allocation123_spill] sm:$0xff] }
 0x510   :  { %v1966_v5 = vmul.f32 0.2, %v4863_v21  ;;  %v2090_v55 = vmax.f32 %v4825_v13, %v1962_v18  ;;  %v1705_v3 = vmul.f32 %v6374_v34, %v6406_v1  ;;  %v4913_v29 = vadd.f32 %v4482_v10, %v1703_v45  ;;  %2216 = vst [vmem:[%s5574_s6 + $0x90] sm:$0xff] %v2088_v11  ;;  %v6408_v18 = vld [vmem:[#allocation125_spill] sm:$0xff] }
 0x511   :  { %v1967_v0 = vmul.f32 0.2, %v4873_v20  ;;  %v2091_v2 = vmax.f32 %v4834_v7, %v1963_v49  ;;  %v1706_v13 = vmul.f32 %v4736_v35, %v6407_v44  ;;  %v4923_v12 = vadd.f32 %v4482_v10, %v1704_v23  ;;  %2217 = vst [vmem:[%s5574_s6 + $0x98] sm:$0xff] %v2089_v47  ;;  %v6409_v49 = vld [vmem:[#allocation3_spill] sm:$0xff]  ;;  %v6411_v23 = vld [vmem:[#allocation9_spill] sm:$0xff] }
 0x512   :  { %v1968_v22 = vmul.f32 0.2, %v4883_v56  ;;  %v2092_v34 = vmax.f32 %v4844_v62, %v1964_v27  ;;  %v1707_v7 = vmul.f32 %v4736_v35, %v6408_v18  ;;  %v4933_v57 = vadd.f32 %v4482_v10, %v1705_v3  ;;  %2218 = vst [vmem:[%s5574_s6 + $0xa0] sm:$0xff] %v2090_v55  ;;  %v6410_v10 = vld [vmem:[#allocation6_spill] sm:$0xff]  ;;  %v6412_v55 = vld [vmem:[#allocation12_spill] sm:$0xff] }
 0x513   :  { %v1969_v46 = vmul.f32 0.2, %v4893_v6  ;;  %v2093_v38 = vmax.f32 %v4854_v42, %v1965_v32  ;;  %v1708_v62 = vmul.f32 %v4736_v35, %v6409_v49  ;;  %v4943_v50 = vadd.f32 %v4900_v39, %v1706_v13  ;;  %2219 = vst [vmem:[%s5574_s6 + $0xa8] sm:$0xff] %v2091_v2  ;;  %v6413_v2 = vld [vmem:[#allocation15_spill] sm:$0xff] }
 0x514   :  { %v1970_v8 = vmul.f32 0.2, %v4903_v60  ;;  %v2094_v45 = vmax.f32 %v4863_v21, %v1966_v5  ;;  %v1709_v42 = vmul.f32 %v4736_v35, %v6410_v10  ;;  %v4953_v27 = vadd.f32 %v4900_v39, %v1707_v7  ;;  %2220 = vst [vmem:[%s5574_s6 + $0xb0] sm:$0xff] %v2092_v34  ;;  %v6414_v34 = vld [vmem:[#allocation18_spill] sm:$0xff] }
 0x515   :  { %v1971_v11 = vmul.f32 0.2, %v4913_v29  ;;  %v2095_v36 = vmax.f32 %v4873_v20, %v1967_v0  ;;  %v1710_v21 = vmul.f32 %v4736_v35, %v6411_v23  ;;  %v4963_v32 = vadd.f32 %v4900_v39, %v1708_v62  ;;  %2221 = vst [vmem:[%s5574_s6 + $0xb8] sm:$0xff] %v2093_v38  ;;  %v6415_v38 = vld [vmem:[#allocation21_spill] sm:$0xff] }
 0x516   :  { %v1972_v47 = vmul.f32 0.2, %v4923_v12  ;;  %v2096_v5 = vmax.f32 %v4883_v56, %v1968_v22  ;;  %v1711_v20 = vmul.f32 %v4736_v35, %v6412_v55  ;;  %v4973_v1 = vadd.f32 %v4900_v39, %v1709_v42  ;;  %2222 = vst [vmem:[%s5574_s6 + $0xc0] sm:$0xff] %v2094_v45  ;;  %v6416_v45 = vld [vmem:[#allocation25_spill] sm:$0xff] }
 0x517   :  { %v1973_v3 = vmul.f32 0.2, %v4933_v57  ;;  %v2097_v0 = vmax.f32 %v4893_v6, %v1969_v46  ;;  %v1712_v56 = vmul.f32 %v4736_v35, %v6413_v2  ;;  %v4983_v44 = vadd.f32 %v4900_v39, %v1710_v21  ;;  %2223 = vst [vmem:[%s5574_s6 + $0xc8] sm:$0xff] %v2095_v36  ;;  %v6417_v36 = vld [vmem:[#allocation29_spill] sm:$0xff] }
 0x518   :  { %v1974_v13 = vmul.f32 0.2, %v4943_v50  ;;  %v2098_v22 = vmax.f32 %v4903_v60, %v1970_v8  ;;  %v1713_v6 = vmul.f32 %v4736_v35, %v6414_v34  ;;  %v4993_v18 = vadd.f32 %v4900_v39, %v1711_v20  ;;  %2224 = vst [vmem:[%s5574_s6 + $0xd0] sm:$0xff] %v2096_v5  ;;  %v6418_v5 = vld [vmem:[#allocation33_spill] sm:$0xff] }
 0x519   :  { %v1975_v7 = vmul.f32 0.2, %v4953_v27  ;;  %v2099_v46 = vmax.f32 %v4913_v29, %v1971_v11  ;;  %v1714_v60 = vmul.f32 %v4736_v35, %v6415_v38  ;;  %v5003_v49 = vadd.f32 %v4900_v39, %v1712_v56  ;;  %2225 = vst [vmem:[%s5574_s6 + $0xd8] sm:$0xff] %v2097_v0  ;;  %v6419_v0 = vld [vmem:[#allocation37_spill] sm:$0xff] }
 0x51a   :  { %v1976_v62 = vmul.f32 0.2, %v4963_v32  ;;  %v2100_v8 = vmax.f32 %v4923_v12, %v1972_v47  ;;  %v1715_v29 = vmul.f32 %v4736_v35, %v6416_v45  ;;  %v5013_v10 = vadd.f32 %v4900_v39, %v1713_v6  ;;  %2226 = vst [vmem:[%s5574_s6 + $0xe0] sm:$0xff] %v2098_v22  ;;  %v6420_v22 = vld [vmem:[#allocation41_spill] sm:$0xff] }
 0x51b   :  { %v1977_v42 = vmul.f32 0.2, %v4973_v1  ;;  %v2101_v11 = vmax.f32 %v4933_v57, %v1973_v3  ;;  %v1716_v12 = vmul.f32 %v4736_v35, %v6417_v36  ;;  %v5023_v23 = vadd.f32 %v4900_v39, %v1714_v60  ;;  %2227 = vst [vmem:[%s5574_s6 + $0xe8] sm:$0xff] %v2099_v46  ;;  %v6421_v46 = vld [vmem:[#allocation45_spill] sm:$0xff] }
 0x51c   :  { %v1978_v21 = vmul.f32 0.2, %v4983_v44  ;;  %v2102_v47 = vmax.f32 %v4943_v50, %v1974_v13  ;;  %v1717_v57 = vmul.f32 %v4736_v35, %v6418_v5  ;;  %v5033_v55 = vadd.f32 %v4900_v39, %v1715_v29  ;;  %2228 = vst [vmem:[%s5574_s6 + $0xf0] sm:$0xff] %v2100_v8  ;;  %v6422_v8 = vld [vmem:[#allocation49_spill] sm:$0xff] }
 0x51d   :  { %v1979_v20 = vmul.f32 0.2, %v4993_v18  ;;  %v2103_v3 = vmax.f32 %v4953_v27, %v1975_v7  ;;  %v1718_v50 = vmul.f32 %v4736_v35, %v6419_v0  ;;  %v5043_v2 = vadd.f32 %v4900_v39, %v1716_v12  ;;  %2229 = vst [vmem:[%s5574_s6 + $0xf8] sm:$0xff] %v2101_v11  ;;  %v6423_v11 = vld [vmem:[#allocation53_spill] sm:$0xff] }
 0x51e   :  { %v1980_v56 = vmul.f32 0.2, %v5003_v49  ;;  %v2104_v13 = vmax.f32 %v4963_v32, %v1976_v62  ;;  %v1719_v27 = vmul.f32 %v4736_v35, %v6420_v22  ;;  %v5053_v34 = vadd.f32 %v4900_v39, %v1717_v57  ;;  %2230 = vst [vmem:[%s5574_s6 + $0x100] sm:$0xff] %v2102_v47  ;;  %v6424_v47 = vld [vmem:[#allocation57_spill] sm:$0xff] }
 0x51f   :  { %v1981_v6 = vmul.f32 0.2, %v5013_v10  ;;  %v2105_v7 = vmax.f32 %v4973_v1, %v1977_v42  ;;  %v1720_v32 = vmul.f32 %v4736_v35, %v6421_v46  ;;  %v5063_v38 = vadd.f32 %v4900_v39, %v1718_v50  ;;  %2231 = vst [vmem:[%s5574_s6 + $0x108] sm:$0xff] %v2103_v3  ;;  %v6425_v3 = vld [vmem:[#allocation61_spill] sm:$0xff] }
 0x520   :  { %v1982_v60 = vmul.f32 0.2, %v5023_v23  ;;  %v2106_v62 = vmax.f32 %v4983_v44, %v1978_v21  ;;  %v1721_v1 = vmul.f32 %v4736_v35, %v6422_v8  ;;  %v5073_v45 = vadd.f32 %v4900_v39, %v1719_v27  ;;  %2232 = vst [vmem:[%s5574_s6 + $0x110] sm:$0xff] %v2104_v13  ;;  %v6426_v13 = vld [vmem:[#allocation65_spill] sm:$0xff] }
 0x521   :  { %v1983_v29 = vmul.f32 0.2, %v5033_v55  ;;  %v2107_v42 = vmax.f32 %v4993_v18, %v1979_v20  ;;  %v1722_v44 = vmul.f32 %v4736_v35, %v6423_v11  ;;  %v5083_v36 = vadd.f32 %v4900_v39, %v1720_v32  ;;  %2233 = vst [vmem:[%s5574_s6 + $0x118] sm:$0xff] %v2105_v7  ;;  %v6427_v7 = vld [vmem:[#allocation69_spill] sm:$0xff] }
 0x522   :  { %v1984_v12 = vmul.f32 0.2, %v5043_v2  ;;  %v2108_v21 = vmax.f32 %v5003_v49, %v1980_v56  ;;  %v1723_v18 = vmul.f32 %v4736_v35, %v6424_v47  ;;  %v5093_v5 = vadd.f32 %v4900_v39, %v1721_v1  ;;  %2234 = vst [vmem:[%s5574_s6 + $0x120] sm:$0xff] %v2106_v62  ;;  %v6428_v62 = vld [vmem:[#allocation73_spill] sm:$0xff] }
 0x523   :  { %v1985_v57 = vmul.f32 0.2, %v5053_v34  ;;  %v2109_v20 = vmax.f32 %v5013_v10, %v1981_v6  ;;  %v1724_v49 = vmul.f32 %v4736_v35, %v6425_v3  ;;  %v5103_v0 = vadd.f32 %v4900_v39, %v1722_v44  ;;  %2235 = vst [vmem:[%s5574_s6 + $0x128] sm:$0xff] %v2107_v42  ;;  %v6429_v42 = vld [vmem:[#allocation77_spill] sm:$0xff] }
 0x524   :  { %v1986_v50 = vmul.f32 0.2, %v5063_v38  ;;  %v2110_v56 = vmax.f32 %v5023_v23, %v1982_v60  ;;  %v1725_v10 = vmul.f32 %v4736_v35, %v6426_v13  ;;  %v5113_v22 = vadd.f32 %v4900_v39, %v1723_v18  ;;  %2236 = vst [vmem:[%s5574_s6 + $0x130] sm:$0xff] %v2108_v21  ;;  %v6430_v21 = vld [vmem:[#allocation81_spill] sm:$0xff] }
 0x525   :  { %v1987_v27 = vmul.f32 0.2, %v5073_v45  ;;  %v2111_v6 = vmax.f32 %v5033_v55, %v1983_v29  ;;  %v1726_v23 = vmul.f32 %v4736_v35, %v6427_v7  ;;  %v1864_v46 = vadd.f32 %v4900_v39, %v1724_v49  ;;  %2237 = vst [vmem:[%s5574_s6 + $0x138] sm:$0xff] %v2109_v20  ;;  %v6431_v20 = vld [vmem:[#allocation85_spill] sm:$0xff] }
 0x526   :  { %v1988_v32 = vmul.f32 0.2, %v5083_v36  ;;  %v2112_v60 = vmax.f32 %v5043_v2, %v1984_v12  ;;  %v1727_v55 = vmul.f32 %v4736_v35, %v6428_v62  ;;  %v1865_v8 = vadd.f32 %v4900_v39, %v1725_v10  ;;  %2238 = vst [vmem:[%s5574_s6 + $0x140] sm:$0xff] %v2110_v56  ;;  %v6432_v56 = vld [vmem:[#allocation90_spill] sm:$0xff] }
 0x527   :  { %v1989_v1 = vmul.f32 0.2, %v5093_v5  ;;  %v2113_v29 = vmax.f32 %v5053_v34, %v1985_v57  ;;  %v1728_v2 = vmul.f32 %v4736_v35, %v6429_v42  ;;  %v1866_v11 = vadd.f32 %v4900_v39, %v1726_v23  ;;  %2239 = vst [vmem:[%s5574_s6 + $0x148] sm:$0xff] %v2111_v6  ;;  %v6433_v6 = vld [vmem:[#allocation93_spill] sm:$0xff] }
 0x528   :  { %v1990_v44 = vmul.f32 0.2, %v5103_v0  ;;  %v2114_v12 = vmax.f32 %v5063_v38, %v1986_v50  ;;  %v1729_v34 = vmul.f32 %v4736_v35, %v6430_v21  ;;  %v1867_v47 = vadd.f32 %v4900_v39, %v1727_v55  ;;  %2240 = vst [vmem:[%s5574_s6 + $0x150] sm:$0xff] %v2112_v60  ;;  %v6434_v60 = vld [vmem:[#allocation97_spill] sm:$0xff] }
 0x529   :  { %v1991_v18 = vmul.f32 0.2, %v5113_v22  ;;  %v2115_v57 = vmax.f32 %v5073_v45, %v1987_v27  ;;  %v1730_v38 = vmul.f32 %v4736_v35, %v6431_v20  ;;  %v1868_v3 = vadd.f32 %v4900_v39, %v1728_v2  ;;  %2241 = vst [vmem:[%s5574_s6 + $0x158] sm:$0xff] %v2113_v29  ;;  %v6435_v29 = vld [vmem:[#allocation101_spill] sm:$0xff] }
 0x52a   :  { %v1992_v49 = vmul.f32 0.2, %v1864_v46  ;;  %v2116_v50 = vmax.f32 %v5083_v36, %v1988_v32  ;;  %v1731_v13 = vmul.f32 %v4736_v35, %v6432_v56  ;;  %v1869_v45 = vadd.f32 %v4900_v39, %v1729_v34  ;;  %2242 = vst [vmem:[%s5574_s6 + $0x160] sm:$0xff] %v2114_v12  ;;  %v6436_v12 = vld [vmem:[#allocation105_spill] sm:$0xff] }
 0x52b   :  { %v1993_v10 = vmul.f32 0.2, %v1865_v8  ;;  %v2117_v27 = vmax.f32 %v5093_v5, %v1989_v1  ;;  %v1732_v7 = vmul.f32 %v4736_v35, %v6433_v6  ;;  %v1870_v36 = vadd.f32 %v4900_v39, %v1730_v38  ;;  %2243 = vst [vmem:[%s5574_s6 + $0x168] sm:$0xff] %v2115_v57  ;;  %v6437_v57 = vld [vmem:[#allocation109_spill] sm:$0xff] }
 0x52c   :  { %v1994_v23 = vmul.f32 0.2, %v1866_v11  ;;  %v2118_v32 = vmax.f32 %v5103_v0, %v1990_v44  ;;  %v1733_v62 = vmul.f32 %v4736_v35, %v6434_v60  ;;  %v1871_v5 = vadd.f32 %v4900_v39, %v1731_v13  ;;  %2244 = vst [vmem:[%s5574_s6 + $0x170] sm:$0xff] %v2116_v50  ;;  %v6438_v50 = vld [vmem:[#allocation112_spill] sm:$0xff] }
 0x52d   :  { %v1995_v55 = vmul.f32 0.2, %v1867_v47  ;;  %v2119_v1 = vmax.f32 %v5113_v22, %v1991_v18  ;;  %v1734_v42 = vmul.f32 %v4736_v35, %v6435_v29  ;;  %v1872_v0 = vadd.f32 %v4900_v39, %v1732_v7  ;;  %2245 = vst [vmem:[%s5574_s6 + $0x178] sm:$0xff] %v2117_v27 }
 0x52e   :  { %v1996_v2 = vmul.f32 0.2, %v1868_v3  ;;  %v2120_v44 = vmax.f32 %v1864_v46, %v1992_v49  ;;  %v1735_v21 = vmul.f32 %v4736_v35, %v6436_v12  ;;  %v1873_v22 = vadd.f32 %v4900_v39, %v1733_v62  ;;  %2246 = vst [vmem:[%s5574_s6 + $0x180] sm:$0xff] %v2118_v32 }
 0x52f   :  { %v1997_v34 = vmul.f32 0.2, %v1869_v45  ;;  %v2121_v18 = vmax.f32 %v1865_v8, %v1993_v10  ;;  %v1736_v20 = vmul.f32 %v4736_v35, %v6437_v57  ;;  %v1874_v46 = vadd.f32 %v4900_v39, %v1734_v42  ;;  %2247 = vst [vmem:[%s5574_s6 + $0x188] sm:$0xff] %v2119_v1 }
 0x530   :  { %v1998_v38 = vmul.f32 0.2, %v1870_v36  ;;  %v2122_v49 = vmax.f32 %v1866_v11, %v1994_v23  ;;  %v1737_v56 = vmul.f32 %v4736_v35, %v6438_v50  ;;  %v1875_v8 = vadd.f32 %v4900_v39, %v1735_v21  ;;  %2248 = vst [vmem:[%s5574_s6 + $0x190] sm:$0xff] %v2120_v44 }
 0x531   :  { %v1999_v13 = vmul.f32 0.2, %v1871_v5  ;;  %v2123_v10 = vmax.f32 %v1867_v47, %v1995_v55  ;;  %v1876_v27 = vadd.f32 %v4900_v39, %v1736_v20  ;;  %v2000_v6 = vmul.f32 0.2, %v1872_v0  ;;  %2249 = vst [vmem:[%s5574_s6 + $0x198] sm:$0xff] %v2121_v18 }
 0x532   :  { %v2124_v7 = vmax.f32 %v1868_v3, %v1996_v2  ;;  %v1877_v11 = vadd.f32 %v4900_v39, %v1737_v56  ;;  %v2001_v23 = vmul.f32 0.2, %v1873_v22  ;;  %v2125_v35 = vmax.f32 %v1869_v45, %v1997_v34  ;;  %2250 = vst [vmem:[%s5574_s6 + $0x1a0] sm:$0xff] %v2122_v49 }
 0x533   :  { %v2002_v47 = vmul.f32 0.2, %v1874_v46  ;;  %v2126_v32 = vmax.f32 %v1870_v36, %v1998_v38  ;;  %v2003_v60 = vmul.f32 0.2, %v1875_v8  ;;  %v2127_v3 = vmax.f32 %v1871_v5, %v1999_v13  ;;  %2251 = vst [vmem:[%s5574_s6 + $0x1a8] sm:$0xff] %v2123_v10 }
 0x534   :  { %v2004_v62 = vmul.f32 0.2, %v1876_v27  ;;  %v2128_v39 = vmax.f32 %v1872_v0, %v2000_v6  ;;  %2252 = vst [vmem:[%s5574_s6 + $0x1b0] sm:$0xff] %v2124_v7  ;;  %v2005_v45 = vmul.f32 0.2, %v1877_v11  ;;  %v2129_v55 = vmax.f32 %v1873_v22, %v2001_v23 }
 0x535   :  { %2253 = vst [vmem:[%s5574_s6 + $0x1b8] sm:$0xff] %v2125_v35  ;;  %v2006_v36 = vmul.f32 0.2, %v4487_v4  ;;  %v2130_v1 = vmax.f32 %v1874_v46, %v2002_v47  ;;  %v2007_v5 = vmul.f32 0.2, %v4490_v9  ;;  %v2131_v29 = vmax.f32 %v1875_v8, %v2003_v60 }
 0x536   :  { %2254 = vst [vmem:[%s5574_s6 + $0x1c0] sm:$0xff] %v2126_v32  ;;  %v2008_v42 = vmul.f32 0.2, %v4493_v16  ;;  %v2132_v0 = vmax.f32 %v1876_v27, %v2004_v62  ;;  %v2009_v2 = vmul.f32 0.2, %v4496_v17  ;;  %v2133_v44 = vmax.f32 %v1877_v11, %v2005_v45 }
 0x537   :  { %2255 = vst [vmem:[%s5574_s6 + $0x1c8] sm:$0xff] %v2127_v3  ;;  %v2010_v12 = vmul.f32 0.2, %v4499_v53  ;;  %v2134_v21 = vmax.f32 %v4487_v4, %v2006_v36  ;;  %v2011_v22 = vmul.f32 0.2, %v4502_v63  ;;  %v2135_v34 = vmax.f32 %v4490_v9, %v2007_v5 }
 0x538   :  { %2256 = vst [vmem:[%s5574_s6 + $0x1d0] sm:$0xff] %v2128_v39  ;;  %v2012_v18 = vmul.f32 0.2, %v4505_v30  ;;  %v2136_v57 = vmax.f32 %v4493_v16, %v2008_v42  ;;  %v2013_v4 = vmul.f32 0.2, %v4508_v31  ;;  %v2137_v20 = vmax.f32 %v4496_v17, %v2009_v2 }
 0x539   :  { %2257 = vst [vmem:[%s5574_s6 + $0x1d8] sm:$0xff] %v2129_v55  ;;  %v2014_v9 = vmul.f32 0.2, %v4511_v14  ;;  %v2138_v46 = vmax.f32 %v4499_v53, %v2010_v12  ;;  %v2015_v16 = vmul.f32 0.2, %v4514_v59  ;;  %v2139_v38 = vmax.f32 %v4502_v63, %v2011_v22 }
 0x53a   :  { %2258 = vst [vmem:[%s5574_s6 + $0x1e0] sm:$0xff] %v2130_v1  ;;  %v2016_v17 = vmul.f32 0.2, %v4517_v19  ;;  %v2140_v49 = vmax.f32 %v4505_v30, %v2012_v18  ;;  %v2017_v53 = vmul.f32 0.2, %v4520_v48  ;;  %v2141_v50 = vmax.f32 %v4508_v31, %v2013_v4  ;;  %v6447_v4 = vld [vmem:[#allocation194_spill] sm:$0xff] }
 0x53b   :  { %2259 = vst [vmem:[%s5574_s6 + $0x1e8] sm:$0xff] %v2131_v29  ;;  %v2018_v63 = vmul.f32 0.2, %v4523_v24  ;;  %v2142_v56 = vmax.f32 %v4511_v14, %v2014_v9  ;;  %v2019_v30 = vmul.f32 0.2, %v4526_v25  ;;  %v2143_v8 = vmax.f32 %v4514_v59, %v2015_v16 }
 0x53c   :  { %2260 = vst [vmem:[%s5574_s6 + $0x1f0] sm:$0xff] %v2132_v0  ;;  %v2020_v31 = vmul.f32 0.2, %v4529_v41  ;;  %v2144_v13 = vmax.f32 %v4517_v19, %v2016_v17  ;;  %v2021_v14 = vmul.f32 0.2, %v4532_v15  ;;  %v2145_v10 = vmax.f32 %v4520_v48, %v2017_v53  ;;  %v6449_v17 = vld [vmem:[#allocation155_spill] sm:$0xff] }
 0x53d   :  { %2261 = vst [vmem:[%s5574_s6 + $0x1f8] sm:$0xff] %v2133_v44  ;;  %v2022_v59 = vmul.f32 0.2, %v4535_v52  ;;  %v2146_v27 = vmax.f32 %v4523_v24, %v2018_v63  ;;  %v2023_v19 = vmul.f32 0.2, %v4538_v58  ;;  %v2147_v6 = vmax.f32 %v4526_v25, %v2019_v30  ;;  %v6451_v30 = vld [vmem:[#allocation195_spill] sm:$0xff] }
 0x53e   :  { %2262 = vst [vmem:[%s5574_s6 + $0x200] sm:$0xff] %v2134_v21  ;;  %v2024_v48 = vmul.f32 0.2, %v4541_v33  ;;  %v2148_v7 = vmax.f32 %v4529_v41, %v2020_v31  ;;  %v2025_v24 = vmul.f32 0.2, %v4544_v51  ;;  %v2149_v11 = vmax.f32 %v4532_v15, %v2021_v14 }
 0x53f   :  { %2263 = vst [vmem:[%s5574_s6 + $0x208] sm:$0xff] %v2135_v34  ;;  %v2026_v25 = vmul.f32 0.2, %v4547_v26  ;;  %v2150_v23 = vmax.f32 %v4535_v52, %v2022_v59  ;;  %v2027_v41 = vmul.f32 0.2, %v4550_v40  ;;  %v2151_v35 = vmax.f32 %v4538_v58, %v2023_v19  ;;  %v6446_v34 = vld [vmem:[#allocation174_spill] sm:$0xff] }
 0x540   :  { %2264 = vst [vmem:[%s5574_s6 + $0x210] sm:$0xff] %v2136_v57  ;;  %v2028_v15 = vmul.f32 0.2, %v4553_v43  ;;  %v2152_v47 = vmax.f32 %v4541_v33, %v2024_v48  ;;  %v2029_v52 = vmul.f32 0.2, %v4556_v37  ;;  %v2153_v32 = vmax.f32 %v4544_v51, %v2025_v24  ;;  %v6453_v59 = vld [vmem:[#allocation156_spill] sm:$0xff] }
 0x541   :  { %2265 = vst [vmem:[%s5574_s6 + $0x218] sm:$0xff] %v2137_v20  ;;  %v2030_v58 = vmul.f32 0.2, %v4559_v61  ;;  %v2154_v60 = vmax.f32 %v4547_v26, %v2026_v25  ;;  %v2031_v33 = vmul.f32 0.2, %v4562_v54  ;;  %v2155_v3 = vmax.f32 %v4550_v40, %v2027_v41  ;;  %v6439_v26 = vld [vmem:[#allocation192_spill] sm:$0xff] }
 0x542   :  { %2266 = vst [vmem:[%s5574_s6 + $0x220] sm:$0xff] %v2138_v46  ;;  %v2032_v51 = vmul.f32 0.2, %v4565_v28  ;;  %v2156_v62 = vmax.f32 %v4553_v43, %v2028_v15  ;;  %v2033_v39 = vmul.f32 0.2, %v6439_v26  ;;  %v2157_v45 = vmax.f32 %v4556_v37, %v2029_v52  ;;  %v6440_v40 = vld [vmem:[#allocation134_spill] sm:$0xff] }
 0x543   :  { %2267 = vst [vmem:[%s5574_s6 + $0x228] sm:$0xff] %v2139_v38  ;;  %v2034_v55 = vmul.f32 0.2, %v6440_v40  ;;  %v2158_v36 = vmax.f32 %v4559_v61, %v2030_v58  ;;  %v6441_v43 = vld [vmem:[#allocation153_spill] sm:$0xff]  ;;  %v2159_v5 = vmax.f32 %v4562_v54, %v2031_v33  ;;  %v6444_v54 = vld [vmem:[#allocation135_spill] sm:$0xff]  ;;  %v6448_v46 = vld [vmem:[#allocation136_spill] sm:$0xff] }
 0x544   :  { %2268 = vst [vmem:[%s5574_s6 + $0x230] sm:$0xff] %v2140_v49  ;;  %v2035_v1 = vmul.f32 0.2, %v6441_v43  ;;  %v6442_v37 = vld [vmem:[#allocation173_spill] sm:$0xff]  ;;  %v2160_v42 = vmax.f32 %v4565_v28, %v2032_v51  ;;  %v2161_v2 = vmax.f32 %v6439_v26, %v2033_v39  ;;  %v2038_v44 = vmul.f32 0.2, %v6444_v54 }
 0x545   :  { %2269 = vst [vmem:[%s5574_s6 + $0x238] sm:$0xff] %v2141_v50  ;;  %v2036_v29 = vmul.f32 0.2, %v6442_v37  ;;  %v6443_v61 = vld [vmem:[#allocation193_spill] sm:$0xff]  ;;  %v2162_v12 = vmax.f32 %v6440_v40, %v2034_v55  ;;  %v6445_v28 = vld [vmem:[#allocation154_spill] sm:$0xff]  ;;  %v6450_v50 = vld [vmem:[#allocation175_spill] sm:$0xff] }
 0x546   :  { %2270 = vst [vmem:[%s5574_s6 + $0x240] sm:$0xff] %v2142_v56  ;;  %v2037_v0 = vmul.f32 0.2, %v6443_v61  ;;  %v2039_v21 = vmul.f32 0.2, %v6445_v28  ;;  %v2163_v22 = vmax.f32 %v6441_v43, %v2035_v1  ;;  %v2166_v38 = vmax.f32 %v6444_v54, %v2038_v44  ;;  %v6455_v24 = vld [vmem:[#allocation196_spill] sm:$0xff] }
 0x547   :  { %2271 = vst [vmem:[%s5574_s6 + $0x248] sm:$0xff] %v2143_v8  ;;  %v2040_v18 = vmul.f32 0.2, %v6446_v34  ;;  %v2164_v57 = vmax.f32 %v6442_v37, %v2036_v29  ;;  %v2041_v20 = vmul.f32 0.2, %v6447_v4  ;;  %v6457_v15 = vld [vmem:[#allocation157_spill] sm:$0xff] }
 0x548   :  { %2272 = vst [vmem:[%s5574_s6 + $0x250] sm:$0xff] %v2144_v13  ;;  %v2165_v9 = vmax.f32 %v6443_v61, %v2037_v0  ;;  %v2042_v16 = vmul.f32 0.2, %v6448_v46  ;;  %v2043_v49 = vmul.f32 0.2, %v6449_v17  ;;  %v2167_v53 = vmax.f32 %v6445_v28, %v2039_v21  ;;  %v6452_v13 = vld [vmem:[#allocation137_spill] sm:$0xff] }
 0x549   :  { %2273 = vst [vmem:[%s5574_s6 + $0x258] sm:$0xff] %v2145_v10  ;;  %v2044_v63 = vmul.f32 0.2, %v6450_v50  ;;  %v2168_v56 = vmax.f32 %v6446_v34, %v2040_v18  ;;  %v2045_v8 = vmul.f32 0.2, %v6451_v30  ;;  %v2169_v31 = vmax.f32 %v6447_v4, %v2041_v20  ;;  %v6459_v33 = vld [vmem:[#allocation197_spill] sm:$0xff] }
 0x54a   :  { %2274 = vst [vmem:[%s5574_s6 + $0x260] sm:$0xff] %v2146_v27  ;;  %v2046_v14 = vmul.f32 0.2, %v6452_v13  ;;  %v2170_v10 = vmax.f32 %v6448_v46, %v2042_v16  ;;  %v2047_v27 = vmul.f32 0.2, %v6453_v59  ;;  %v2171_v19 = vmax.f32 %v6449_v17, %v2043_v49 }
 0x54b   :  { %2275 = vst [vmem:[%s5574_s6 + $0x268] sm:$0xff] %v2147_v6  ;;  %v6454_v6 = vld [vmem:[#allocation176_spill] sm:$0xff]  ;;  %v2173_v25 = vmax.f32 %v6451_v30, %v2045_v8 }
 0x54c   :  { %2276 = vst [vmem:[%s5574_s6 + $0x270] sm:$0xff] %v2148_v7  ;;  %v2048_v48 = vmul.f32 0.2, %v6454_v6  ;;  %v2172_v7 = vmax.f32 %v6450_v50, %v2044_v63  ;;  %v2175_v52 = vmax.f32 %v6453_v59, %v2047_v27 }
 0x54d   :  { %2277 = vst [vmem:[%s5574_s6 + $0x278] sm:$0xff] %v2149_v11  ;;  %v2049_v11 = vmul.f32 0.2, %v6455_v24 }
 0x54e   :  { %2278 = vst [vmem:[%s5574_s6 + $0x280] sm:$0xff] %v2150_v23  ;;  %v6456_v23 = vld [vmem:[#allocation138_spill] sm:$0xff] }
 0x54f   :  { %2279 = vst [vmem:[%s5574_s6 + $0x288] sm:$0xff] %v2151_v35  ;;  %v2050_v41 = vmul.f32 0.2, %v6456_v23  ;;  %v2174_v35 = vmax.f32 %v6452_v13, %v2046_v14  ;;  %v2177_v51 = vmax.f32 %v6455_v24, %v2049_v11 }
 0x550   :  { %2280 = vst [vmem:[%s5574_s6 + $0x290] sm:$0xff] %v2152_v47  ;;  %v2051_v47 = vmul.f32 0.2, %v6457_v15 }
 0x551   :  { %2281 = vst [vmem:[%s5574_s6 + $0x298] sm:$0xff] %v2153_v32  ;;  %v6458_v32 = vld [vmem:[#allocation177_spill] sm:$0xff]  ;;  %v2178_v39 = vmax.f32 %v6456_v23, %v2050_v41 }
 0x552   :  { %2282 = vst [vmem:[%s5574_s6 + $0x2a0] sm:$0xff] %v2154_v60  ;;  %v2052_v58 = vmul.f32 0.2, %v6458_v32  ;;  %v2176_v60 = vmax.f32 %v6454_v6, %v2048_v48  ;;  %v2179_v55 = vmax.f32 %v6457_v15, %v2051_v47 }
 0x553   :  { %2283 = vst [vmem:[%s5574_s6 + $0x2a8] sm:$0xff] %v2155_v3  ;;  %v2053_v3 = vmul.f32 0.2, %v6459_v33 }
 0x554   :  { %2284 = vst [vmem:[%s5574_s6 + $0x2b0] sm:$0xff] %v2156_v62  ;;  %v6460_v62 = vld [vmem:[#allocation139_spill] sm:$0xff]  ;;  %v2180_v1 = vmax.f32 %v6458_v32, %v2052_v58 }
 0x555   :  { %2285 = vst [vmem:[%s5574_s6 + $0x2b8] sm:$0xff] %v2157_v45  ;;  %v2054_v26 = vmul.f32 0.2, %v6460_v62  ;;  %v6461_v45 = vld [vmem:[#allocation158_spill] sm:$0xff]  ;;  %v2181_v29 = vmax.f32 %v6459_v33, %v2053_v3 }
 0x556   :  { %2286 = vst [vmem:[%s5574_s6 + $0x2c0] sm:$0xff] %v2158_v36  ;;  %v2055_v40 = vmul.f32 0.2, %v6461_v45  ;;  %v6462_v36 = vld [vmem:[#allocation178_spill] sm:$0xff] }
 0x557   :  { %2287 = vst [vmem:[%s5574_s6 + $0x2c8] sm:$0xff] %v2159_v5  ;;  %v2056_v43 = vmul.f32 0.2, %v6462_v36  ;;  %v6463_v5 = vld [vmem:[#allocation198_spill] sm:$0xff]  ;;  %v2182_v0 = vmax.f32 %v6460_v62, %v2054_v26 }
 0x558   :  { %2288 = vst [vmem:[%s5574_s6 + $0x2d0] sm:$0xff] %v2160_v42  ;;  %v2057_v37 = vmul.f32 0.2, %v6463_v5  ;;  %v6464_v42 = vld [vmem:[#allocation140_spill] sm:$0xff]  ;;  %v2183_v44 = vmax.f32 %v6461_v45, %v2055_v40 }
 0x559   :  { %2289 = vst [vmem:[%s5574_s6 + $0x2d8] sm:$0xff] %v2161_v2  ;;  %v2058_v61 = vmul.f32 0.2, %v6464_v42  ;;  %v6465_v2 = vld [vmem:[#allocation159_spill] sm:$0xff]  ;;  %v2184_v21 = vmax.f32 %v6462_v36, %v2056_v43 }
 0x55a   :  { %2290 = vst [vmem:[%s5574_s6 + $0x2e0] sm:$0xff] %v2162_v12  ;;  %v2059_v54 = vmul.f32 0.2, %v6465_v2  ;;  %v6466_v12 = vld [vmem:[#allocation179_spill] sm:$0xff]  ;;  %v2185_v18 = vmax.f32 %v6463_v5, %v2057_v37 }
 0x55b   :  { %2291 = vst [vmem:[%s5574_s6 + $0x2e8] sm:$0xff] %v2163_v22  ;;  %v2060_v28 = vmul.f32 0.2, %v6466_v12  ;;  %v6467_v22 = vld [vmem:[#allocation199_spill] sm:$0xff]  ;;  %v2186_v20 = vmax.f32 %v6464_v42, %v2058_v61 }
 0x55c   :  { %2292 = vst [vmem:[%s5574_s6 + $0x2f0] sm:$0xff] %v2164_v57  ;;  %v2061_v34 = vmul.f32 0.2, %v6467_v22  ;;  %v6468_v57 = vld [vmem:[#allocation141_spill] sm:$0xff]  ;;  %v2187_v16 = vmax.f32 %v6465_v2, %v2059_v54 }
 0x55d   :  { %2293 = vst [vmem:[%s5574_s6 + $0x2f8] sm:$0xff] %v2165_v9  ;;  %v2062_v4 = vmul.f32 0.2, %v6468_v57  ;;  %v6469_v9 = vld [vmem:[#allocation160_spill] sm:$0xff]  ;;  %v2188_v49 = vmax.f32 %v6466_v12, %v2060_v28 }
 0x55e   :  { %2294 = vst [vmem:[%s5574_s6 + $0x300] sm:$0xff] %v2166_v38  ;;  %v2063_v46 = vmul.f32 0.2, %v6469_v9  ;;  %v6470_v38 = vld [vmem:[#allocation180_spill] sm:$0xff]  ;;  %v2189_v63 = vmax.f32 %v6467_v22, %v2061_v34 }
 0x55f   :  { %2295 = vst [vmem:[%s5574_s6 + $0x308] sm:$0xff] %v2167_v53  ;;  %v2064_v17 = vmul.f32 0.2, %v6470_v38  ;;  %v6471_v53 = vld [vmem:[#allocation200_spill] sm:$0xff]  ;;  %v2190_v8 = vmax.f32 %v6468_v57, %v2062_v4 }
 0x560   :  { %2296 = vst [vmem:[%s5574_s6 + $0x310] sm:$0xff] %v2168_v56  ;;  %v2065_v50 = vmul.f32 0.2, %v6471_v53  ;;  %v6472_v56 = vld [vmem:[#allocation142_spill] sm:$0xff]  ;;  %v2191_v14 = vmax.f32 %v6469_v9, %v2063_v46 }
 0x561   :  { %2297 = vst [vmem:[%s5574_s6 + $0x318] sm:$0xff] %v2169_v31  ;;  %v2066_v30 = vmul.f32 0.2, %v6472_v56  ;;  %v6473_v31 = vld [vmem:[#allocation161_spill] sm:$0xff]  ;;  %v2192_v27 = vmax.f32 %v6470_v38, %v2064_v17 }
 0x562   :  { %2298 = vst [vmem:[%s5574_s6 + $0x320] sm:$0xff] %v2170_v10  ;;  %v2067_v13 = vmul.f32 0.2, %v6473_v31  ;;  %v6474_v10 = vld [vmem:[#allocation181_spill] sm:$0xff]  ;;  %v2193_v48 = vmax.f32 %v6471_v53, %v2065_v50 }
 0x563   :  { %2299 = vst [vmem:[%s5574_s6 + $0x328] sm:$0xff] %v2171_v19  ;;  %v2068_v59 = vmul.f32 0.2, %v6474_v10  ;;  %v6475_v19 = vld [vmem:[#allocation201_spill] sm:$0xff] }
 0x564   :  { %2300 = vst [vmem:[%s5574_s6 + $0x330] sm:$0xff] %v2172_v7  ;;  %v2069_v6 = vmul.f32 0.2, %v6475_v19  ;;  %v2194_v7 = vmax.f32 %v6472_v56, %v2066_v30  ;;  %v2195_v24 = vmax.f32 %v6473_v31, %v2067_v13 }
 0x565   :  { %2301 = vst [vmem:[%s5574_s6 + $0x338] sm:$0xff] %v2173_v25  ;;  %v2196_v11 = vmax.f32 %v6474_v10, %v2068_v59 }
 0x566   :  { %2302 = vst [vmem:[%s5574_s6 + $0x340] sm:$0xff] %v2174_v35  ;;  %v2197_v25 = vmax.f32 %v6475_v19, %v2069_v6 }
 0x567   :  { %2303 = vst [vmem:[%s5574_s6 + $0x348] sm:$0xff] %v2175_v52 }
 0x568   :  { %2304 = vst [vmem:[%s5574_s6 + $0x350] sm:$0xff] %v2176_v60 }
 0x569   :  { %2305 = vst [vmem:[%s5574_s6 + $0x358] sm:$0xff] %v2177_v51 }
 0x56a   :  { %2306 = vst [vmem:[%s5574_s6 + $0x360] sm:$0xff] %v2178_v39 }
 0x56b   :  { %2307 = vst [vmem:[%s5574_s6 + $0x368] sm:$0xff] %v2179_v55 }
 0x56c   :  { %2308 = vst [vmem:[%s5574_s6 + $0x370] sm:$0xff] %v2180_v1 }
 0x56d   :  { %2309 = vst [vmem:[%s5574_s6 + $0x378] sm:$0xff] %v2181_v29 }
 0x56e   :  { %2310 = vst [vmem:[%s5574_s6 + $0x380] sm:$0xff] %v2182_v0 }
 0x56f   :  { %2311 = vst [vmem:[%s5574_s6 + $0x388] sm:$0xff] %v2183_v44 }
 0x570   :  { %2312 = vst [vmem:[%s5574_s6 + $0x390] sm:$0xff] %v2184_v21 }
 0x571   :  { %2313 = vst [vmem:[%s5574_s6 + $0x398] sm:$0xff] %v2185_v18 }
 0x572   :  { %2314 = vst [vmem:[%s5574_s6 + $0x3a0] sm:$0xff] %v2186_v20 }
 0x573   :  { %2315 = vst [vmem:[%s5574_s6 + $0x3a8] sm:$0xff] %v2187_v16 }
 0x574   :  { %2316 = vst [vmem:[%s5574_s6 + $0x3b0] sm:$0xff] %v2188_v49 }
 0x575   :  { %2317 = vst [vmem:[%s5574_s6 + $0x3b8] sm:$0xff] %v2189_v63 }
 0x576   :  { %2318 = vst [vmem:[%s5574_s6 + $0x3c0] sm:$0xff] %v2190_v8 }
 0x577   :  { %2319 = vst [vmem:[%s5574_s6 + $0x3c8] sm:$0xff] %v2191_v14 }
 0x578   :  { %2320 = vst [vmem:[%s5574_s6 + $0x3d0] sm:$0xff] %v2192_v27 }
 0x579   :  { %2321 = vst [vmem:[%s5574_s6 + $0x3d8] sm:$0xff] %v2193_v48 }
 0x57a   :  { %2322 = vst [vmem:[%s5574_s6 + $0x3e0] sm:$0xff] %v2194_v7 }
 0x57b   :  { %2323 = vst [vmem:[%s5574_s6 + $0x3e8] sm:$0xff] %v2195_v24 }
 0x57c   :  { %2324 = vst [vmem:[%s5574_s6 + $0x3f0] sm:$0xff] %v2196_v11 }
 0x57d   :  { %2325 = vst [vmem:[%s5574_s6 + $0x3f8] sm:$0xff] %v2197_v25 }

</bundles_post_ra>
